<compile_context>
chip_gen: v7x
topology: tpu7x:2x2x1
jax: 0.10.0
libtpu: 0.0.40
codegen_flags: <defaults>
</compile_context>

<pallas_src>
import functools

import jax
import jax.numpy as jnp
from jax.experimental import pallas as pl
from jax.experimental.pallas import tpu as pltpu


# ----------------------------------------------------------------------------
# shared in-kernel helpers
# ----------------------------------------------------------------------------
def _mm_last(a, w):
    """a: (..., Din), w: (Dout, Din) -> (..., Dout) == a @ w.T, no transpose."""
    return jax.lax.dot_general(
        a, w,
        dimension_numbers=(((a.ndim - 1,), (1,)), ((), ())),
        preferred_element_type=jnp.float32)


def _layernorm(y, w, b, eps=1e-5):
    mu = jnp.mean(y, axis=-1, keepdims=True)
    var = jnp.mean((y - mu) ** 2, axis=-1, keepdims=True)
    return (y - mu) * jax.lax.rsqrt(var + eps) * w + b


def _tfm_layer(x, add_mask3, num_head,
               wq_ref, wk_ref, wv_ref, bq_ref, bk_ref, bv_ref,
               wo_ref, bo_ref, ln1w_ref, ln1b_ref,
               w1_ref, b1_ref, w2_ref, b2_ref, ln2w_ref, ln2b_ref):
    """One post-LN TransformerEncoderLayer (relu FFN, eval mode, no dropout).

    x: (B, S, D) f32; add_mask3: (B, 1, S) additive key mask (0 / -1e9).
    Per-head weights; 1/sqrt(hd) pre-folded into wq/bq; W_o folded per head.
    """
    B, S, D = x.shape
    attn = jnp.zeros((B, S, D), jnp.float32)
    for h in range(num_head):                       # H is tiny & static (unrolled)
        qh = _mm_last(x, wq_ref[h]) + bq_ref[h]     # (B, S, hd)
        kh = _mm_last(x, wk_ref[h]) + bk_ref[h]
        vh = _mm_last(x, wv_ref[h]) + bv_ref[h]
        sc = jnp.einsum('bqd,bkd->bqk', qh, kh,
                        preferred_element_type=jnp.float32)           # (B, S, S)
        sc = sc + add_mask3
        sc = sc - jnp.max(sc, axis=-1, keepdims=True)
        p = jnp.exp(sc)
        p = p * pl.reciprocal(jnp.sum(p, axis=-1, keepdims=True), approx=True)
        oh = jnp.einsum('bqk,bkd->bqd', p, vh,
                        preferred_element_type=jnp.float32)           # (B, S, hd)
        attn = attn + _mm_last(oh, wo_ref[h])       # W_o folded per head
    attn = attn + bo_ref[...]

    x1 = _layernorm(x + attn, ln1w_ref[...], ln1b_ref[...])
    hid = jnp.maximum(_mm_last(x1, w1_ref[...]) + b1_ref[...], 0.0)
    ffn = _mm_last(hid, w2_ref[...]) + b2_ref[...]
    return _layernorm(x1 + ffn, ln2w_ref[...], ln2b_ref[...])


# ----------------------------------------------------------------------------
# Kernel 1: fused input-encoding + full encoder stack (one pallas_call)
#   grid = (num_enc_layer,); stacked layer weights selected via index_map;
#   activation carried across layers in the resident output block.
# ----------------------------------------------------------------------------
def _encoder_fused_kernel(num_head,
                          h_ref, r_ref, t_ref, q_ref, v_ref,
                          wph_ref, wpr_ref, wpt_ref, pb_ref,
                          wqq_ref, wqv_ref, qb_ref,
                          mask_ref,
                          wq_ref, wk_ref, wv_ref, bq_ref, bk_ref, bv_ref,
                          wo_ref, bo_ref, ln1w_ref, ln1b_ref,
                          w1_ref, b1_ref, w2_ref, b2_ref, ln2w_ref, ln2b_ref,
                          o_ref):
    l = pl.program_id(0)

    @pl.when(l == 0)
    def _():
        # pri_enc over concat([h,r,t]) expressed as three D-contractions (no
        # concat); qv_enc over concat([q,v]) likewise; positional adds folded
        # into the biases at trace time.
        tri = (_mm_last(h_ref[...], wph_ref[...]) +
               _mm_last(r_ref[...], wpr_ref[...]) +
               _mm_last(t_ref[...], wpt_ref[...]) + pb_ref[...])       # (B,1,D)
        qv = (_mm_last(q_ref[...], wqq_ref[...]) +
              _mm_last(v_ref[...], wqv_ref[...]) + qb_ref[...])        # (B,K,D)
        o_ref[:, 0:1, :] = tri.astype(o_ref.dtype)
        o_ref[:, 1:, :] = qv.astype(o_ref.dtype)

    x = o_ref[...].astype(jnp.float32)                                 # (B,S,D)
    y = _tfm_layer(x, mask_ref[...], num_head,
                   wq_ref, wk_ref, wv_ref, bq_ref, bk_ref, bv_ref,
                   wo_ref, bo_ref, ln1w_ref, ln1b_ref,
                   w1_ref, b1_ref, w2_ref, b2_ref, ln2w_ref, ln2b_ref)
    o_ref[...] = y.astype(o_ref.dtype)              # carry to next layer / output


def _full_spec(shape):
    n = len(shape)
    return pl.BlockSpec(shape, lambda l, n=n: (0,) * n)


def _stacked_spec(shape):
    n = len(shape)
    return pl.BlockSpec((None,) + shape, lambda l, n=n: (l,) + (0,) * n)


def _stack_specs(H, hd, D, Dh):
    return [
        _stacked_spec((H, hd, D)),   # wq (scale folded)
        _stacked_spec((H, hd, D)),   # wk
        _stacked_spec((H, hd, D)),   # wv
        _stacked_spec((H, 1, hd)),   # bq (scale folded)
        _stacked_spec((H, 1, hd)),   # bk
        _stacked_spec((H, 1, hd)),   # bv
        _stacked_spec((H, D, hd)),   # wo (split per head along input dim)
        _stacked_spec((1, D)),       # bo
        _stacked_spec((1, D)), _stacked_spec((1, D)),     # ln1 w/b
        _stacked_spec((Dh, D)), _stacked_spec((1, Dh)),   # ffn w1/b1
        _stacked_spec((D, Dh)), _stacked_spec((1, D)),    # ffn w2/b2
        _stacked_spec((1, D)), _stacked_spec((1, D)),     # ln2 w/b
    ]


def _stack_args(stk):
    return (stk['wq'], stk['wk'], stk['wv'], stk['bq'], stk['bk'], stk['bv'],
            stk['wo'], stk['bo'], stk['ln1w'], stk['ln1b'],
            stk['w1'], stk['b1'], stk['w2'], stk['b2'],
            stk['ln2w'], stk['ln2b'])


def pallas_encoder(h_seq, r_seq, t_seq, q_seq, v_seq, proj, add_mask3,
                   stk, num_head):
    B, _, D = h_seq.shape
    K = q_seq.shape[1]
    S = 1 + K
    L, H, hd, _ = stk['wq'].shape
    Dh = stk['w1'].shape[1]

    kernel = functools.partial(_encoder_fused_kernel, num_head)
    return pl.pallas_call(
        kernel,
        out_shape=jax.ShapeDtypeStruct((B, S, D), jnp.float32),
        grid=(L,),
        in_specs=[
            _full_spec((B, 1, D)), _full_spec((B, 1, D)), _full_spec((B, 1, D)),
            _full_spec((B, K, D)), _full_spec((B, K, D)),
            _full_spec((D, D)), _full_spec((D, D)), _full_spec((D, D)),
            _full_spec((1, D)),
            _full_spec((D, D)), _full_spec((D, D)), _full_spec((1, D)),
            _full_spec((B, 1, S)),
        ] + _stack_specs(H, hd, D, Dh),
        out_specs=pl.BlockSpec((B, S, D), lambda l: (0, 0, 0)),   # resident carry
        compiler_params=pltpu.CompilerParams(
            dimension_semantics=("arbitrary",),           # sequential layer carry
            vmem_limit_bytes=32 * 1024 * 1024),
    )(h_seq, r_seq, t_seq, q_seq, v_seq,
      proj['wph'], proj['wpr'], proj['wpt'], proj['pb'],
      proj['wqq'], proj['wqv'], proj['qb'],
      add_mask3,
      *_stack_args(stk))


# ----------------------------------------------------------------------------
# Kernel 2: full decoder stack + fused ent/rel/num heads (one pallas_call)
#   grid = (num_dec_layer,); activation carried in a VMEM scratch; the three
#   head projections run only on the last layer step (pl.when finalize).
# ----------------------------------------------------------------------------
def _decoder_fused_kernel(num_head,
                          x_ref, mask_ref,
                          wq_ref, wk_ref, wv_ref, bq_ref, bk_ref, bv_ref,
                          wo_ref, bo_ref, ln1w_ref, ln1b_ref,
                          w1_ref, b1_ref, w2_ref, b2_ref, ln2w_ref, ln2b_ref,
                          we_ref, be_ref, wr_ref, br_ref, wn_ref, bn_ref,
                          ent_ref, rel_ref, num_ref,
                          carry_ref):
    l = pl.program_id(0)

    @pl.when(l == 0)
    def _():
        carry_ref[...] = x_ref[...].astype(carry_ref.dtype)

    x = carry_ref[...]                                                 # (B,4,D)
    y = _tfm_layer(x, mask_ref[...], num_head,
                   wq_ref, wk_ref, wv_ref, bq_ref, bk_ref, bv_ref,
                   wo_ref, bo_ref, ln1w_ref, ln1b_ref,
                   w1_ref, b1_ref, w2_ref, b2_ref, ln2w_ref, ln2b_ref)
    carry_ref[...] = y

    @pl.when(l == pl.num_programs(0) - 1)
    def _():
        ent_ref[...] = (_mm_last(y, we_ref[...]) + be_ref[...]).astype(ent_ref.dtype)
        rel_ref[...] = (_mm_last(y, wr_ref[...]) + br_ref[...]).astype(rel_ref.dtype)
        num_ref[...] = (_mm_last(y, wn_ref[...]) + bn_ref[...]).astype(num_ref.dtype)


def pallas_decoder(x, add_mask3, stk, heads, num_head):
    B, S, D = x.shape
    L, H, hd, _ = stk['wq'].shape
    Dh = stk['w1'].shape[1]
    ne = heads['we'].shape[0]
    nr = heads['wr'].shape[0]

    kernel = functools.partial(_decoder_fused_kernel, num_head)
    return pl.pallas_call(
        kernel,
        out_shape=(jax.ShapeDtypeStruct((B, S, ne), jnp.float32),
                   jax.ShapeDtypeStruct((B, S, nr), jnp.float32),
                   jax.ShapeDtypeStruct((B, S, nr), jnp.float32)),
        grid=(L,),
        in_specs=[
            _full_spec((B, S, D)),
            _full_spec((B, 1, S)),
        ] + _stack_specs(H, hd, D, Dh) + [
            _full_spec((ne, D)), _full_spec((1, ne)),
            _full_spec((nr, D)), _full_spec((1, nr)),
            _full_spec((nr, D)), _full_spec((1, nr)),
        ],
        out_specs=(pl.BlockSpec((B, S, ne), lambda l: (0, 0, 0)),
                   pl.BlockSpec((B, S, nr), lambda l: (0, 0, 0)),
                   pl.BlockSpec((B, S, nr), lambda l: (0, 0, 0))),
        scratch_shapes=[pltpu.VMEM((B, S, D), jnp.float32)],
        compiler_params=pltpu.CompilerParams(
            dimension_semantics=("arbitrary",),
            vmem_limit_bytes=32 * 1024 * 1024),
    )(x, add_mask3, *_stack_args(stk),
      heads['we'], heads['be'], heads['wr'], heads['br'],
      heads['wn'], heads['bn'])


# ----------------------------------------------------------------------------
# Parameter construction (deterministic, xavier-uniform style) + layer stacking
# ----------------------------------------------------------------------------
def _xavier(key, shape):
    fin = shape[-1]
    fout = shape[-2] if len(shape) > 1 else shape[-1]
    bound = (6.0 / (fin + fout)) ** 0.5
    return jax.random.uniform(key, shape, jnp.float32, -bound, bound)


def _stack_layer_params(layers, num_head):
    """Stack per-layer PyTorch-style params into leading-L arrays, pre-split per
    head and pre-fold the 1/sqrt(hd) attention scale (all at trace time)."""
    L = len(layers)
    D = layers[0]['wqkv'].shape[1]
    H = num_head
    hd = D // H
    scale = 1.0 / (float(hd) ** 0.5)

    def cat(name):
        return jnp.stack([lp[name] for lp in layers], axis=0)

    wqkv = cat('wqkv')                       # (L, 3D, D)
    bqkv = cat('bqkv')[:, 0, :]              # (L, 3D)
    wq = (wqkv[:, :D, :] * scale).reshape(L, H, hd, D)
    wk = wqkv[:, D:2 * D, :].reshape(L, H, hd, D)
    wv = wqkv[:, 2 * D:, :].reshape(L, H, hd, D)
    bq = (bqkv[:, :D] * scale).reshape(L, H, 1, hd)
    bk = bqkv[:, D:2 * D].reshape(L, H, 1, hd)
    bv = bqkv[:, 2 * D:].reshape(L, H, 1, hd)
    wo = cat('wo').reshape(L, D, H, hd).transpose(0, 2, 1, 3)   # (L, H, D, hd)
    return {
        'wq': wq, 'wk': wk, 'wv': wv, 'bq': bq, 'bk': bk, 'bv': bv,
        'wo': wo, 'bo': cat('bo'),
        'ln1w': cat('ln1w'), 'ln1b': cat('ln1b'),
        'w1': cat('w1'), 'b1': cat('b1'),
        'w2': cat('w2'), 'b2': cat('b2'),
        'ln2w': cat('ln2w'), 'ln2b': cat('ln2b'),
    }


def make_params(key, num_ent, num_rel, dim_model, num_head, dim_hid,
                num_enc_layer, num_dec_layer):
    keys = iter(jax.random.split(key, 64 + 16 * (num_enc_layer + num_dec_layer)))
    D, Dh = dim_model, dim_hid
    p = {}
    for name in ['pri_pos', 'qv_pos', 'h_pos', 'r_pos', 't_pos', 'q_pos', 'v_pos']:
        p[name] = _xavier(next(keys), (1, 1, D))
    p['ent_emb'] = _xavier(next(keys), (num_ent + 1 + num_rel, D))
    p['rel_emb'] = _xavier(next(keys), (num_rel + 1, D))
    p['pri_enc_w'] = _xavier(next(keys), (D, D * 3))
    p['pri_enc_b'] = jnp.zeros((D,), jnp.float32)
    p['qv_enc_w'] = _xavier(next(keys), (D, D * 2))
    p['qv_enc_b'] = jnp.zeros((D,), jnp.float32)
    p['ent_dec_w'] = _xavier(next(keys), (num_ent, D))
    p['ent_dec_b'] = jnp.zeros((num_ent,), jnp.float32)
    p['rel_dec_w'] = _xavier(next(keys), (num_rel, D))
    p['rel_dec_b'] = jnp.zeros((num_rel,), jnp.float32)
    p['num_dec_w'] = _xavier(next(keys), (num_rel, D))
    p['num_dec_b'] = jnp.zeros((num_rel,), jnp.float32)
    p['num_mask'] = jnp.float32(0.5)

    def make_layer():
        return {
            'wqkv': _xavier(next(keys), (3 * D, D)),
            'bqkv': jnp.zeros((1, 3 * D), jnp.float32),
            'wo': _xavier(next(keys), (D, D)),
            'bo': jnp.zeros((1, D), jnp.float32),
            'ln1w': jnp.ones((1, D), jnp.float32),
            'ln1b': jnp.zeros((1, D), jnp.float32),
            'w1': _xavier(next(keys), (Dh, D)),
            'b1': jnp.zeros((1, Dh), jnp.float32),
            'w2': _xavier(next(keys), (D, Dh)),
            'b2': jnp.zeros((1, D), jnp.float32),
            'ln2w': jnp.ones((1, D), jnp.float32),
            'ln2b': jnp.zeros((1, D), jnp.float32),
        }

    enc_layers = [make_layer() for _ in range(num_enc_layer)]
    dec_layers = [make_layer() for _ in range(num_dec_layer)]
    p['enc_stack'] = _stack_layer_params(enc_layers, num_head)
    p['dec_stack'] = _stack_layer_params(dec_layers, num_head)
    return p


# ----------------------------------------------------------------------------
# HyNT forward
# ----------------------------------------------------------------------------
@functools.partial(jax.jit, static_argnames=("dim_model", "num_head"))
def hynt_forward(params, src, num_values, src_key_padding_mask, mask_locs,
                 *, dim_model, num_head):
    B = src.shape[0]
    D = dim_model
    ent_w = params['ent_emb']
    rel_w = params['rel_emb']

    num_val = jnp.where(num_values != -1, num_values, params['num_mask'])

    # embedding gathers (JAX glue)
    h_seq = ent_w[src[:, 0]].reshape(B, 1, D)
    r_seq = rel_w[src[:, 1]].reshape(B, 1, D)
    t_seq = (ent_w[src[:, 2]] * num_val[:, 0:1]).reshape(B, 1, D)
    q_idx = src[:, 3::2]                                     # (B, K)
    v_idx = src[:, 4::2]                                     # (B, K)
    q_seq = rel_w[q_idx]                                     # (B, K, D)
    v_seq = ent_w[v_idx] * num_val[:, 1:, None]              # (B, K, D)

    # trace-time weight splits: pri_enc is Linear(3D, D), qv_enc is Linear(2D, D)
    wph, wpr, wpt = jnp.split(params['pri_enc_w'], 3, axis=1)          # (D,D) x3
    wqq, wqv = jnp.split(params['qv_enc_w'], 2, axis=1)                # (D,D) x2
    proj = {
        'wph': wph, 'wpr': wpr, 'wpt': wpt,
        'pb': params['pri_enc_b'][None, :] + params['pri_pos'][0],     # (1,D)
        'wqq': wqq, 'wqv': wqv,
        'qb': params['qv_enc_b'][None, :] + params['qv_pos'][0],       # (1,D)
    }

    enc_mask_add = jnp.where(src_key_padding_mask, -1e9, 0.0)
    enc_mask_add = enc_mask_add.astype(jnp.float32)[:, None, :]        # (B,1,S)

    # fused input encoding + full encoder stack (ONE pallas_call)
    enc_out = pallas_encoder(h_seq, r_seq, t_seq, q_seq, v_seq, proj,
                             enc_mask_add, params['enc_stack'], num_head)

    # boolean-mask token selection (exactly one True per row) via argmax gather
    mask_idx = jnp.argmax(mask_locs.astype(jnp.int32), axis=1)         # (B,)
    dec_in_rep = jnp.take_along_axis(enc_out, mask_idx[:, None, None], axis=1)

    triplet = jnp.stack([h_seq + params['h_pos'],
                         r_seq + params['r_pos'],
                         t_seq + params['t_pos']], axis=2)             # (B,1,3,D)
    qv = jnp.stack([q_seq + params['q_pos'],
                    v_seq + params['v_pos'],
                    jnp.zeros_like(v_seq)], axis=2)                    # (B,K,3,D)
    full_seq = jnp.concatenate([triplet, qv], axis=1)                  # (B,1+K,3,D)
    dec_in_part = jnp.take_along_axis(
        full_seq, mask_idx[:, None, None, None], axis=1)[:, 0]         # (B,3,D)
    dec_in_seq = jnp.concatenate([dec_in_rep, dec_in_part], axis=1)    # (B,4,D)

    dec_mask = jnp.zeros((B, 4), dtype=bool).at[:, 3].set(mask_idx != 0)
    dec_mask_add = jnp.where(dec_mask, -1e9, 0.0)
    dec_mask_add = dec_mask_add.astype(jnp.float32)[:, None, :]        # (B,1,4)

    heads = {
        'we': params['ent_dec_w'], 'be': params['ent_dec_b'][None, :],
        'wr': params['rel_dec_w'], 'br': params['rel_dec_b'][None, :],
        'wn': params['num_dec_w'], 'bn': params['num_dec_b'][None, :],
    }

    # fused decoder stack + ent/rel/num heads (ONE pallas_call, three outputs)
    ent_out, rel_out, num_out = pallas_decoder(
        dec_in_seq, dec_mask_add, params['dec_stack'], heads, num_head)
    return ent_out, rel_out, num_out


# ----------------------------------------------------------------------------
if __name__ == "__main__":
    num_ent, num_rel = 20, 10
    dim_model, num_head, dim_hid = 32, 4, 64
    num_enc_layer, num_dec_layer = 2, 2
    B, K = 2, 2                       # src length = 3 + 2*K = 7, enc seq = 1+K = 3

    key = jax.random.PRNGKey(0)
    kp, k_ent, k_rel = jax.random.split(key, 3)
    params = make_params(kp, num_ent, num_rel, dim_model, num_head, dim_hid,
                         num_enc_layer, num_dec_layer)

    src = jnp.zeros((B, 3 + 2 * K), jnp.int32)
    ent_cols = jax.random.randint(k_ent, (B, 2 + K), 0, num_ent)   # cols 0,2,4,6
    rel_cols = jax.random.randint(k_rel, (B, 1 + K), 0, num_rel)   # cols 1,3,5
    src = src.at[:, jnp.array([0, 2, 4, 6])].set(ent_cols)
    src = src.at[:, jnp.array([1, 3, 5])].set(rel_cols)

    num_values = jnp.array([[0.7, -1.0, 0.3],
                            [1.0, 0.5, -1.0]], jnp.float32)         # (B, 1+K)
    src_key_padding_mask = jnp.array([[False, False, True],
                                      [False, False, False]])       # (B, 1+K)
    mask_locs = jnp.array([[True, False, False],
                           [False, True, False]])                   # (B, 1+K)

    ent_out, rel_out, num_out = hynt_forward(
        params, src, num_values, src_key_padding_mask, mask_locs,
        dim_model=dim_model, num_head=num_head)
    jax.block_until_ready((ent_out, rel_out, num_out))

    assert ent_out.shape == (B, 4, num_ent)
    assert rel_out.shape == (B, 4, num_rel)
    assert num_out.shape == (B, 4, num_rel)
    assert jnp.all(jnp.isfinite(ent_out)) and jnp.all(jnp.isfinite(rel_out)) \
        and jnp.all(jnp.isfinite(num_out))
    print("KERNEL_OK")
</pallas_src>

<mosaic_0001>
module attributes {stable_mosaic.version = 11 : i64} {
  func.func @_encoder_fused_kernel(%arg0: i32, %arg1: memref<2x1x32xf32, #tpu.memory_space<vmem>>, %arg2: memref<2x1x32xf32, #tpu.memory_space<vmem>>, %arg3: memref<2x1x32xf32, #tpu.memory_space<vmem>>, %arg4: memref<2x2x32xf32, #tpu.memory_space<vmem>>, %arg5: memref<2x2x32xf32, #tpu.memory_space<vmem>>, %arg6: memref<32x32xf32, #tpu.memory_space<vmem>>, %arg7: memref<32x32xf32, #tpu.memory_space<vmem>>, %arg8: memref<32x32xf32, #tpu.memory_space<vmem>>, %arg9: memref<1x32xf32, #tpu.memory_space<vmem>>, %arg10: memref<32x32xf32, #tpu.memory_space<vmem>>, %arg11: memref<32x32xf32, #tpu.memory_space<vmem>>, %arg12: memref<1x32xf32, #tpu.memory_space<vmem>>, %arg13: memref<2x1x3xf32, #tpu.memory_space<vmem>>, %arg14: memref<1x4x8x32xf32, #tpu.memory_space<vmem>>, %arg15: memref<1x4x8x32xf32, #tpu.memory_space<vmem>>, %arg16: memref<1x4x8x32xf32, #tpu.memory_space<vmem>>, %arg17: memref<1x4x1x8xf32, #tpu.memory_space<vmem>>, %arg18: memref<1x4x1x8xf32, #tpu.memory_space<vmem>>, %arg19: memref<1x4x1x8xf32, #tpu.memory_space<vmem>>, %arg20: memref<1x4x32x8xf32, #tpu.memory_space<vmem>>, %arg21: memref<1x1x32xf32, #tpu.memory_space<vmem>>, %arg22: memref<1x1x32xf32, #tpu.memory_space<vmem>>, %arg23: memref<1x1x32xf32, #tpu.memory_space<vmem>>, %arg24: memref<1x64x32xf32, #tpu.memory_space<vmem>>, %arg25: memref<1x1x64xf32, #tpu.memory_space<vmem>>, %arg26: memref<1x32x64xf32, #tpu.memory_space<vmem>>, %arg27: memref<1x1x32xf32, #tpu.memory_space<vmem>>, %arg28: memref<1x1x32xf32, #tpu.memory_space<vmem>>, %arg29: memref<1x1x32xf32, #tpu.memory_space<vmem>>, %arg30: memref<2x3x32xf32, #tpu.memory_space<vmem>>) attributes {dimension_semantics = [#tpu.dimension_semantics<arbitrary>], iteration_bounds = array<i64: 2>, scalar_prefetch = 0 : i64, scratch_operands = 0 : i64, tpu.core_type = #tpu.core_type<tc>, window_params = [{pipeline_mode = #tpu.pipeline_mode<synchronous>, transform_indices = @transform_0, window_bounds = array<i64: 2, 1, 32>}, {pipeline_mode = #tpu.pipeline_mode<synchronous>, transform_indices = @transform_1, window_bounds = array<i64: 2, 1, 32>}, {pipeline_mode = #tpu.pipeline_mode<synchronous>, transform_indices = @transform_2, window_bounds = array<i64: 2, 1, 32>}, {pipeline_mode = #tpu.pipeline_mode<synchronous>, transform_indices = @transform_3, window_bounds = array<i64: 2, 2, 32>}, {pipeline_mode = #tpu.pipeline_mode<synchronous>, transform_indices = @transform_4, window_bounds = array<i64: 2, 2, 32>}, {pipeline_mode = #tpu.pipeline_mode<synchronous>, transform_indices = @transform_5, window_bounds = array<i64: 32, 32>}, {pipeline_mode = #tpu.pipeline_mode<synchronous>, transform_indices = @transform_6, window_bounds = array<i64: 32, 32>}, {pipeline_mode = #tpu.pipeline_mode<synchronous>, transform_indices = @transform_7, window_bounds = array<i64: 32, 32>}, {pipeline_mode = #tpu.pipeline_mode<synchronous>, transform_indices = @transform_8, window_bounds = array<i64: 1, 32>}, {pipeline_mode = #tpu.pipeline_mode<synchronous>, transform_indices = @transform_9, window_bounds = array<i64: 32, 32>}, {pipeline_mode = #tpu.pipeline_mode<synchronous>, transform_indices = @transform_10, window_bounds = array<i64: 32, 32>}, {pipeline_mode = #tpu.pipeline_mode<synchronous>, transform_indices = @transform_11, window_bounds = array<i64: 1, 32>}, {pipeline_mode = #tpu.pipeline_mode<synchronous>, transform_indices = @transform_12, window_bounds = array<i64: 2, 1, 3>}, {transform_indices = @transform_13, window_bounds = array<i64: 1, 4, 8, 32>}, {transform_indices = @transform_14, window_bounds = array<i64: 1, 4, 8, 32>}, {transform_indices = @transform_15, window_bounds = array<i64: 1, 4, 8, 32>}, {transform_indices = @transform_16, window_bounds = array<i64: 1, 4, 1, 8>}, {transform_indices = @transform_17, window_bounds = array<i64: 1, 4, 1, 8>}, {transform_indices = @transform_18, window_bounds = array<i64: 1, 4, 1, 8>}, {transform_indices = @transform_19, window_bounds = array<i64: 1, 4, 32, 8>}, {transform_indices = @transform_20, window_bounds = array<i64: 1, 1, 32>}, {transform_indices = @transform_21, window_bounds = array<i64: 1, 1, 32>}, {transform_indices = @transform_22, window_bounds = array<i64: 1, 1, 32>}, {transform_indices = @transform_23, window_bounds = array<i64: 1, 64, 32>}, {transform_indices = @transform_24, window_bounds = array<i64: 1, 1, 64>}, {transform_indices = @transform_25, window_bounds = array<i64: 1, 32, 64>}, {transform_indices = @transform_26, window_bounds = array<i64: 1, 1, 32>}, {transform_indices = @transform_27, window_bounds = array<i64: 1, 1, 32>}, {transform_indices = @transform_28, window_bounds = array<i64: 1, 1, 32>}, {pipeline_mode = #tpu.pipeline_mode<synchronous>, transform_indices = @transform_29, window_bounds = array<i64: 2, 3, 32>}]} {
    %c0_i32 = arith.constant 0 : i32
    %0 = arith.cmpi eq, %arg0, %c0_i32 : i32
    %1 = arith.extui %0 : i1 to i32
    %c0_i32_0 = arith.constant 0 : i32
    %2 = arith.cmpi ne, %1, %c0_i32_0 : i32
    scf.if %2 {
      %c0_190 = arith.constant 0 : index
      %c0_191 = arith.constant 0 : index
      %c0_192 = arith.constant 0 : index
      %256 = vector.load %arg1[%c0_190, %c0_191, %c0_192] : memref<2x1x32xf32, #tpu.memory_space<vmem>>, vector<2x1x32xf32>
      %c0_193 = arith.constant 0 : index
      %c0_194 = arith.constant 0 : index
      %257 = vector.load %arg6[%c0_193, %c0_194] : memref<32x32xf32, #tpu.memory_space<vmem>>, vector<32x32xf32>
      %cst_195 = arith.constant dense<0.000000e+00> : vector<2x1x32xf32>
      %258 = tpu.matmul %256, %257, %cst_195 {dimension_numbers = #tpu.dot_dimension_numbers<[2], [1], [0, 1], [0], [0, 0, 0, 1, 1, 0], [], []>} : vector<2x1x32xf32>, vector<32x32xf32>, vector<2x1x32xf32> -> vector<2x1x32xf32>
      %c0_196 = arith.constant 0 : index
      %c0_197 = arith.constant 0 : index
      %c0_198 = arith.constant 0 : index
      %259 = vector.load %arg2[%c0_196, %c0_197, %c0_198] : memref<2x1x32xf32, #tpu.memory_space<vmem>>, vector<2x1x32xf32>
      %c0_199 = arith.constant 0 : index
      %c0_200 = arith.constant 0 : index
      %260 = vector.load %arg7[%c0_199, %c0_200] : memref<32x32xf32, #tpu.memory_space<vmem>>, vector<32x32xf32>
      %cst_201 = arith.constant dense<0.000000e+00> : vector<2x1x32xf32>
      %261 = tpu.matmul %259, %260, %cst_201 {dimension_numbers = #tpu.dot_dimension_numbers<[2], [1], [0, 1], [0], [0, 0, 0, 1, 1, 0], [], []>} : vector<2x1x32xf32>, vector<32x32xf32>, vector<2x1x32xf32> -> vector<2x1x32xf32>
      %262 = arith.addf %258, %261 : vector<2x1x32xf32>
      %c0_202 = arith.constant 0 : index
      %c0_203 = arith.constant 0 : index
      %c0_204 = arith.constant 0 : index
      %263 = vector.load %arg3[%c0_202, %c0_203, %c0_204] : memref<2x1x32xf32, #tpu.memory_space<vmem>>, vector<2x1x32xf32>
      %c0_205 = arith.constant 0 : index
      %c0_206 = arith.constant 0 : index
      %264 = vector.load %arg8[%c0_205, %c0_206] : memref<32x32xf32, #tpu.memory_space<vmem>>, vector<32x32xf32>
      %cst_207 = arith.constant dense<0.000000e+00> : vector<2x1x32xf32>
      %265 = tpu.matmul %263, %264, %cst_207 {dimension_numbers = #tpu.dot_dimension_numbers<[2], [1], [0, 1], [0], [0, 0, 0, 1, 1, 0], [], []>} : vector<2x1x32xf32>, vector<32x32xf32>, vector<2x1x32xf32> -> vector<2x1x32xf32>
      %266 = arith.addf %262, %265 : vector<2x1x32xf32>
      %c0_208 = arith.constant 0 : index
      %c0_209 = arith.constant 0 : index
      %267 = vector.load %arg9[%c0_208, %c0_209] : memref<1x32xf32, #tpu.memory_space<vmem>>, vector<1x32xf32>
      %268 = vector.shape_cast %267 : vector<1x32xf32> to vector<1x1x32xf32>
      %269 = vector.broadcast %268 : vector<1x1x32xf32> to vector<2x1x32xf32>
      %270 = arith.addf %266, %269 : vector<2x1x32xf32>
      %c0_210 = arith.constant 0 : index
      %c0_211 = arith.constant 0 : index
      %c0_212 = arith.constant 0 : index
      %271 = vector.load %arg4[%c0_210, %c0_211, %c0_212] : memref<2x2x32xf32, #tpu.memory_space<vmem>>, vector<2x2x32xf32>
      %c0_213 = arith.constant 0 : index
      %c0_214 = arith.constant 0 : index
      %272 = vector.load %arg10[%c0_213, %c0_214] : memref<32x32xf32, #tpu.memory_space<vmem>>, vector<32x32xf32>
      %cst_215 = arith.constant dense<0.000000e+00> : vector<2x2x32xf32>
      %273 = tpu.matmul %271, %272, %cst_215 {dimension_numbers = #tpu.dot_dimension_numbers<[2], [1], [0, 1], [0], [0, 0, 0, 1, 1, 0], [], []>} : vector<2x2x32xf32>, vector<32x32xf32>, vector<2x2x32xf32> -> vector<2x2x32xf32>
      %c0_216 = arith.constant 0 : index
      %c0_217 = arith.constant 0 : index
      %c0_218 = arith.constant 0 : index
      %274 = vector.load %arg5[%c0_216, %c0_217, %c0_218] : memref<2x2x32xf32, #tpu.memory_space<vmem>>, vector<2x2x32xf32>
      %c0_219 = arith.constant 0 : index
      %c0_220 = arith.constant 0 : index
      %275 = vector.load %arg11[%c0_219, %c0_220] : memref<32x32xf32, #tpu.memory_space<vmem>>, vector<32x32xf32>
      %cst_221 = arith.constant dense<0.000000e+00> : vector<2x2x32xf32>
      %276 = tpu.matmul %274, %275, %cst_221 {dimension_numbers = #tpu.dot_dimension_numbers<[2], [1], [0, 1], [0], [0, 0, 0, 1, 1, 0], [], []>} : vector<2x2x32xf32>, vector<32x32xf32>, vector<2x2x32xf32> -> vector<2x2x32xf32>
      %277 = arith.addf %273, %276 : vector<2x2x32xf32>
      %c0_222 = arith.constant 0 : index
      %c0_223 = arith.constant 0 : index
      %278 = vector.load %arg12[%c0_222, %c0_223] : memref<1x32xf32, #tpu.memory_space<vmem>>, vector<1x32xf32>
      %279 = vector.shape_cast %278 : vector<1x32xf32> to vector<1x1x32xf32>
      %280 = vector.broadcast %279 : vector<1x1x32xf32> to vector<2x2x32xf32>
      %281 = arith.addf %277, %280 : vector<2x2x32xf32>
      %c0_224 = arith.constant 0 : index
      %c0_225 = arith.constant 0 : index
      %c0_226 = arith.constant 0 : index
      %282 = vector.load %arg30[%c0_224, %c0_225, %c0_226] : memref<2x3x32xf32, #tpu.memory_space<vmem>>, vector<2x1x32xf32>
      tpu.vector_store %arg30[%c0_224, %c0_225, %c0_226], %270 {strides = array<i32>} : memref<2x3x32xf32, #tpu.memory_space<vmem>>, vector<2x1x32xf32>,
      %c0_227 = arith.constant 0 : index
      %c1_228 = arith.constant 1 : index
      %c0_229 = arith.constant 0 : index
      %283 = vector.load %arg30[%c0_227, %c1_228, %c0_229] : memref<2x3x32xf32, #tpu.memory_space<vmem>>, vector<2x2x32xf32>
      tpu.vector_store %arg30[%c0_227, %c1_228, %c0_229], %281 {strides = array<i32>} : memref<2x3x32xf32, #tpu.memory_space<vmem>>, vector<2x2x32xf32>,
    } else {
    }
    %c0 = arith.constant 0 : index
    %c0_1 = arith.constant 0 : index
    %c0_2 = arith.constant 0 : index
    %3 = vector.load %arg30[%c0, %c0_1, %c0_2] : memref<2x3x32xf32, #tpu.memory_space<vmem>>, vector<2x3x32xf32>
    %c0_3 = arith.constant 0 : index
    %c0_4 = arith.constant 0 : index
    %c0_5 = arith.constant 0 : index
    %4 = vector.load %arg13[%c0_3, %c0_4, %c0_5] : memref<2x1x3xf32, #tpu.memory_space<vmem>>, vector<2x1x3xf32>
    %cst = arith.constant 0.000000e+00 : f32
    %5 = vector.broadcast %cst : f32 to vector<2x3x32xf32>
    %c0_6 = arith.constant 0 : index
    %c0_7 = arith.constant 0 : index
    %c0_8 = arith.constant 0 : index
    %c0_9 = arith.constant 0 : index
    %6 = vector.load %arg14[%c0_6, %c0_7, %c0_8, %c0_9] : memref<1x4x8x32xf32, #tpu.memory_space<vmem>>, vector<1x1x8x32xf32>
    %7 = vector.shape_cast %6 : vector<1x1x8x32xf32> to vector<8x32xf32>
    %cst_10 = arith.constant dense<0.000000e+00> : vector<2x3x8xf32>
    %8 = tpu.matmul %3, %7, %cst_10 {dimension_numbers = #tpu.dot_dimension_numbers<[2], [1], [0, 1], [0], [0, 0, 0, 1, 1, 0], [], []>} : vector<2x3x32xf32>, vector<8x32xf32>, vector<2x3x8xf32> -> vector<2x3x8xf32>
    %c0_11 = arith.constant 0 : index
    %c0_12 = arith.constant 0 : index
    %c0_13 = arith.constant 0 : index
    %c0_14 = arith.constant 0 : index
    %9 = vector.load %arg17[%c0_11, %c0_12, %c0_13, %c0_14] : memref<1x4x1x8xf32, #tpu.memory_space<vmem>>, vector<1x1x1x8xf32>
    %10 = vector.shape_cast %9 : vector<1x1x1x8xf32> to vector<1x8xf32>
    %11 = vector.shape_cast %10 : vector<1x8xf32> to vector<1x1x8xf32>
    %12 = vector.broadcast %11 : vector<1x1x8xf32> to vector<2x3x8xf32>
    %13 = arith.addf %8, %12 : vector<2x3x8xf32>
    %c0_15 = arith.constant 0 : index
    %c0_16 = arith.constant 0 : index
    %c0_17 = arith.constant 0 : index
    %c0_18 = arith.constant 0 : index
    %14 = vector.load %arg15[%c0_15, %c0_16, %c0_17, %c0_18] : memref<1x4x8x32xf32, #tpu.memory_space<vmem>>, vector<1x1x8x32xf32>
    %15 = vector.shape_cast %14 : vector<1x1x8x32xf32> to vector<8x32xf32>
    %cst_19 = arith.constant dense<0.000000e+00> : vector<2x3x8xf32>
    %16 = tpu.matmul %3, %15, %cst_19 {dimension_numbers = #tpu.dot_dimension_numbers<[2], [1], [0, 1], [0], [0, 0, 0, 1, 1, 0], [], []>} : vector<2x3x32xf32>, vector<8x32xf32>, vector<2x3x8xf32> -> vector<2x3x8xf32>
    %c0_20 = arith.constant 0 : index
    %c0_21 = arith.constant 0 : index
    %c0_22 = arith.constant 0 : index
    %c0_23 = arith.constant 0 : index
    %17 = vector.load %arg18[%c0_20, %c0_21, %c0_22, %c0_23] : memref<1x4x1x8xf32, #tpu.memory_space<vmem>>, vector<1x1x1x8xf32>
    %18 = vector.shape_cast %17 : vector<1x1x1x8xf32> to vector<1x8xf32>
    %19 = vector.shape_cast %18 : vector<1x8xf32> to vector<1x1x8xf32>
    %20 = vector.broadcast %19 : vector<1x1x8xf32> to vector<2x3x8xf32>
    %21 = arith.addf %16, %20 : vector<2x3x8xf32>
    %c0_24 = arith.constant 0 : index
    %c0_25 = arith.constant 0 : index
    %c0_26 = arith.constant 0 : index
    %c0_27 = arith.constant 0 : index
    %22 = vector.load %arg16[%c0_24, %c0_25, %c0_26, %c0_27] : memref<1x4x8x32xf32, #tpu.memory_space<vmem>>, vector<1x1x8x32xf32>
    %23 = vector.shape_cast %22 : vector<1x1x8x32xf32> to vector<8x32xf32>
    %cst_28 = arith.constant dense<0.000000e+00> : vector<2x3x8xf32>
    %24 = tpu.matmul %3, %23, %cst_28 {dimension_numbers = #tpu.dot_dimension_numbers<[2], [1], [0, 1], [0], [0, 0, 0, 1, 1, 0], [], []>} : vector<2x3x32xf32>, vector<8x32xf32>, vector<2x3x8xf32> -> vector<2x3x8xf32>
    %c0_29 = arith.constant 0 : index
    %c0_30 = arith.constant 0 : index
    %c0_31 = arith.constant 0 : index
    %c0_32 = arith.constant 0 : index
    %25 = vector.load %arg19[%c0_29, %c0_30, %c0_31, %c0_32] : memref<1x4x1x8xf32, #tpu.memory_space<vmem>>, vector<1x1x1x8xf32>
    %26 = vector.shape_cast %25 : vector<1x1x1x8xf32> to vector<1x8xf32>
    %27 = vector.shape_cast %26 : vector<1x8xf32> to vector<1x1x8xf32>
    %28 = vector.broadcast %27 : vector<1x1x8xf32> to vector<2x3x8xf32>
    %29 = arith.addf %24, %28 : vector<2x3x8xf32>
    "tpu.trace_start"() <{level = 10 : i32, message = "bqd,bkd->bqk"}> : () -> ()
    %cst_33 = arith.constant dense<0.000000e+00> : vector<2x3x3xf32>
    %30 = tpu.matmul %13, %21, %cst_33 {dimension_numbers = #tpu.dot_dimension_numbers<[2], [2], [1], [1], [0, 0, 0, 1, 1, 1], [0], [0]>} : vector<2x3x8xf32>, vector<2x3x8xf32>, vector<2x3x3xf32> -> vector<2x3x3xf32>
    "tpu.trace_stop"() : () -> ()
    %31 = vector.broadcast %4 : vector<2x1x3xf32> to vector<2x3x3xf32>
    %32 = arith.addf %30, %31 : vector<2x3x3xf32>
    %cst_34 = arith.constant dense<0xFF800000> : vector<2x3xf32>
    %33 = vector.multi_reduction <maximumf>, %32, %cst_34 [2] : vector<2x3x3xf32> to vector<2x3xf32>
    %34 = vector.shape_cast %33 : vector<2x3xf32> to vector<2x3x1xf32>
    %35 = vector.broadcast %34 : vector<2x3x1xf32> to vector<2x3x3xf32>
    %36 = arith.subf %32, %35 : vector<2x3x3xf32>
    %37 = math.exp %36 : vector<2x3x3xf32>
    %cst_35 = arith.constant dense<0.000000e+00> : vector<2x3xf32>
    %38 = vector.multi_reduction <add>, %37, %cst_35 [2] : vector<2x3x3xf32> to vector<2x3xf32>
    %39 = vector.shape_cast %38 : vector<2x3xf32> to vector<2x3x1xf32>
    %40 = tpu.reciprocal %39 {approx = true} : vector<2x3x1xf32> -> vector<2x3x1xf32>
    %41 = vector.broadcast %40 : vector<2x3x1xf32> to vector<2x3x3xf32>
    %42 = arith.mulf %37, %41 : vector<2x3x3xf32>
    "tpu.trace_start"() <{level = 10 : i32, message = "bqk,bkd->bqd"}> : () -> ()
    %cst_36 = arith.constant dense<0.000000e+00> : vector<2x3x8xf32>
    %43 = tpu.matmul %42, %29, %cst_36 {dimension_numbers = #tpu.dot_dimension_numbers<[2], [1], [1], [2], [0, 0, 0, 1, 1, 2], [0], [0]>} : vector<2x3x3xf32>, vector<2x3x8xf32>, vector<2x3x8xf32> -> vector<2x3x8xf32>
    "tpu.trace_stop"() : () -> ()
    %c0_37 = arith.constant 0 : index
    %c0_38 = arith.constant 0 : index
    %c0_39 = arith.constant 0 : index
    %c0_40 = arith.constant 0 : index
    %44 = vector.load %arg20[%c0_37, %c0_38, %c0_39, %c0_40] : memref<1x4x32x8xf32, #tpu.memory_space<vmem>>, vector<1x1x32x8xf32>
    %45 = vector.shape_cast %44 : vector<1x1x32x8xf32> to vector<32x8xf32>
    %cst_41 = arith.constant dense<0.000000e+00> : vector<2x3x32xf32>
    %46 = tpu.matmul %43, %45, %cst_41 {dimension_numbers = #tpu.dot_dimension_numbers<[2], [1], [0, 1], [0], [0, 0, 0, 1, 1, 0], [], []>} : vector<2x3x8xf32>, vector<32x8xf32>, vector<2x3x32xf32> -> vector<2x3x32xf32>
    %47 = arith.addf %5, %46 : vector<2x3x32xf32>
    %c0_42 = arith.constant 0 : index
    %c1 = arith.constant 1 : index
    %c0_43 = arith.constant 0 : index
    %c0_44 = arith.constant 0 : index
    %48 = vector.load %arg14[%c0_42, %c1, %c0_43, %c0_44] : memref<1x4x8x32xf32, #tpu.memory_space<vmem>>, vector<1x1x8x32xf32>
    %49 = vector.shape_cast %48 : vector<1x1x8x32xf32> to vector<8x32xf32>
    %cst_45 = arith.constant dense<0.000000e+00> : vector<2x3x8xf32>
    %50 = tpu.matmul %3, %49, %cst_45 {dimension_numbers = #tpu.dot_dimension_numbers<[2], [1], [0, 1], [0], [0, 0, 0, 1, 1, 0], [], []>} : vector<2x3x32xf32>, vector<8x32xf32>, vector<2x3x8xf32> -> vector<2x3x8xf32>
    %c0_46 = arith.constant 0 : index
    %c1_47 = arith.constant 1 : index
    %c0_48 = arith.constant 0 : index
    %c0_49 = arith.constant 0 : index
    %51 = vector.load %arg17[%c0_46, %c1_47, %c0_48, %c0_49] : memref<1x4x1x8xf32, #tpu.memory_space<vmem>>, vector<1x1x1x8xf32>
    %52 = vector.shape_cast %51 : vector<1x1x1x8xf32> to vector<1x8xf32>
    %53 = vector.shape_cast %52 : vector<1x8xf32> to vector<1x1x8xf32>
    %54 = vector.broadcast %53 : vector<1x1x8xf32> to vector<2x3x8xf32>
    %55 = arith.addf %50, %54 : vector<2x3x8xf32>
    %c0_50 = arith.constant 0 : index
    %c1_51 = arith.constant 1 : index
    %c0_52 = arith.constant 0 : index
    %c0_53 = arith.constant 0 : index
    %56 = vector.load %arg15[%c0_50, %c1_51, %c0_52, %c0_53] : memref<1x4x8x32xf32, #tpu.memory_space<vmem>>, vector<1x1x8x32xf32>
    %57 = vector.shape_cast %56 : vector<1x1x8x32xf32> to vector<8x32xf32>
    %cst_54 = arith.constant dense<0.000000e+00> : vector<2x3x8xf32>
    %58 = tpu.matmul %3, %57, %cst_54 {dimension_numbers = #tpu.dot_dimension_numbers<[2], [1], [0, 1], [0], [0, 0, 0, 1, 1, 0], [], []>} : vector<2x3x32xf32>, vector<8x32xf32>, vector<2x3x8xf32> -> vector<2x3x8xf32>
    %c0_55 = arith.constant 0 : index
    %c1_56 = arith.constant 1 : index
    %c0_57 = arith.constant 0 : index
    %c0_58 = arith.constant 0 : index
    %59 = vector.load %arg18[%c0_55, %c1_56, %c0_57, %c0_58] : memref<1x4x1x8xf32, #tpu.memory_space<vmem>>, vector<1x1x1x8xf32>
    %60 = vector.shape_cast %59 : vector<1x1x1x8xf32> to vector<1x8xf32>
    %61 = vector.shape_cast %60 : vector<1x8xf32> to vector<1x1x8xf32>
    %62 = vector.broadcast %61 : vector<1x1x8xf32> to vector<2x3x8xf32>
    %63 = arith.addf %58, %62 : vector<2x3x8xf32>
    %c0_59 = arith.constant 0 : index
    %c1_60 = arith.constant 1 : index
    %c0_61 = arith.constant 0 : index
    %c0_62 = arith.constant 0 : index
    %64 = vector.load %arg16[%c0_59, %c1_60, %c0_61, %c0_62] : memref<1x4x8x32xf32, #tpu.memory_space<vmem>>, vector<1x1x8x32xf32>
    %65 = vector.shape_cast %64 : vector<1x1x8x32xf32> to vector<8x32xf32>
    %cst_63 = arith.constant dense<0.000000e+00> : vector<2x3x8xf32>
    %66 = tpu.matmul %3, %65, %cst_63 {dimension_numbers = #tpu.dot_dimension_numbers<[2], [1], [0, 1], [0], [0, 0, 0, 1, 1, 0], [], []>} : vector<2x3x32xf32>, vector<8x32xf32>, vector<2x3x8xf32> -> vector<2x3x8xf32>
    %c0_64 = arith.constant 0 : index
    %c1_65 = arith.constant 1 : index
    %c0_66 = arith.constant 0 : index
    %c0_67 = arith.constant 0 : index
    %67 = vector.load %arg19[%c0_64, %c1_65, %c0_66, %c0_67] : memref<1x4x1x8xf32, #tpu.memory_space<vmem>>, vector<1x1x1x8xf32>
    %68 = vector.shape_cast %67 : vector<1x1x1x8xf32> to vector<1x8xf32>
    %69 = vector.shape_cast %68 : vector<1x8xf32> to vector<1x1x8xf32>
    %70 = vector.broadcast %69 : vector<1x1x8xf32> to vector<2x3x8xf32>
    %71 = arith.addf %66, %70 : vector<2x3x8xf32>
    "tpu.trace_start"() <{level = 10 : i32, message = "bqd,bkd->bqk"}> : () -> ()
    %cst_68 = arith.constant dense<0.000000e+00> : vector<2x3x3xf32>
    %72 = tpu.matmul %55, %63, %cst_68 {dimension_numbers = #tpu.dot_dimension_numbers<[2], [2], [1], [1], [0, 0, 0, 1, 1, 1], [0], [0]>} : vector<2x3x8xf32>, vector<2x3x8xf32>, vector<2x3x3xf32> -> vector<2x3x3xf32>
    "tpu.trace_stop"() : () -> ()
    %73 = vector.broadcast %4 : vector<2x1x3xf32> to vector<2x3x3xf32>
    %74 = arith.addf %72, %73 : vector<2x3x3xf32>
    %cst_69 = arith.constant dense<0xFF800000> : vector<2x3xf32>
    %75 = vector.multi_reduction <maximumf>, %74, %cst_69 [2] : vector<2x3x3xf32> to vector<2x3xf32>
    %76 = vector.shape_cast %75 : vector<2x3xf32> to vector<2x3x1xf32>
    %77 = vector.broadcast %76 : vector<2x3x1xf32> to vector<2x3x3xf32>
    %78 = arith.subf %74, %77 : vector<2x3x3xf32>
    %79 = math.exp %78 : vector<2x3x3xf32>
    %cst_70 = arith.constant dense<0.000000e+00> : vector<2x3xf32>
    %80 = vector.multi_reduction <add>, %79, %cst_70 [2] : vector<2x3x3xf32> to vector<2x3xf32>
    %81 = vector.shape_cast %80 : vector<2x3xf32> to vector<2x3x1xf32>
    %82 = tpu.reciprocal %81 {approx = true} : vector<2x3x1xf32> -> vector<2x3x1xf32>
    %83 = vector.broadcast %82 : vector<2x3x1xf32> to vector<2x3x3xf32>
    %84 = arith.mulf %79, %83 : vector<2x3x3xf32>
    "tpu.trace_start"() <{level = 10 : i32, message = "bqk,bkd->bqd"}> : () -> ()
    %cst_71 = arith.constant dense<0.000000e+00> : vector<2x3x8xf32>
    %85 = tpu.matmul %84, %71, %cst_71 {dimension_numbers = #tpu.dot_dimension_numbers<[2], [1], [1], [2], [0, 0, 0, 1, 1, 2], [0], [0]>} : vector<2x3x3xf32>, vector<2x3x8xf32>, vector<2x3x8xf32> -> vector<2x3x8xf32>
    "tpu.trace_stop"() : () -> ()
    %c0_72 = arith.constant 0 : index
    %c1_73 = arith.constant 1 : index
    %c0_74 = arith.constant 0 : index
    %c0_75 = arith.constant 0 : index
    %86 = vector.load %arg20[%c0_72, %c1_73, %c0_74, %c0_75] : memref<1x4x32x8xf32, #tpu.memory_space<vmem>>, vector<1x1x32x8xf32>
    %87 = vector.shape_cast %86 : vector<1x1x32x8xf32> to vector<32x8xf32>
    %cst_76 = arith.constant dense<0.000000e+00> : vector<2x3x32xf32>
    %88 = tpu.matmul %85, %87, %cst_76 {dimension_numbers = #tpu.dot_dimension_numbers<[2], [1], [0, 1], [0], [0, 0, 0, 1, 1, 0], [], []>} : vector<2x3x8xf32>, vector<32x8xf32>, vector<2x3x32xf32> -> vector<2x3x32xf32>
    %89 = arith.addf %47, %88 : vector<2x3x32xf32>
    %c0_77 = arith.constant 0 : index
    %c2 = arith.constant 2 : index
    %c0_78 = arith.constant 0 : index
    %c0_79 = arith.constant 0 : index
    %90 = vector.load %arg14[%c0_77, %c2, %c0_78, %c0_79] : memref<1x4x8x32xf32, #tpu.memory_space<vmem>>, vector<1x1x8x32xf32>
    %91 = vector.shape_cast %90 : vector<1x1x8x32xf32> to vector<8x32xf32>
    %cst_80 = arith.constant dense<0.000000e+00> : vector<2x3x8xf32>
    %92 = tpu.matmul %3, %91, %cst_80 {dimension_numbers = #tpu.dot_dimension_numbers<[2], [1], [0, 1], [0], [0, 0, 0, 1, 1, 0], [], []>} : vector<2x3x32xf32>, vector<8x32xf32>, vector<2x3x8xf32> -> vector<2x3x8xf32>
    %c0_81 = arith.constant 0 : index
    %c2_82 = arith.constant 2 : index
    %c0_83 = arith.constant 0 : index
    %c0_84 = arith.constant 0 : index
    %93 = vector.load %arg17[%c0_81, %c2_82, %c0_83, %c0_84] : memref<1x4x1x8xf32, #tpu.memory_space<vmem>>, vector<1x1x1x8xf32>
    %94 = vector.shape_cast %93 : vector<1x1x1x8xf32> to vector<1x8xf32>
    %95 = vector.shape_cast %94 : vector<1x8xf32> to vector<1x1x8xf32>
    %96 = vector.broadcast %95 : vector<1x1x8xf32> to vector<2x3x8xf32>
    %97 = arith.addf %92, %96 : vector<2x3x8xf32>
    %c0_85 = arith.constant 0 : index
    %c2_86 = arith.constant 2 : index
    %c0_87 = arith.constant 0 : index
    %c0_88 = arith.constant 0 : index
    %98 = vector.load %arg15[%c0_85, %c2_86, %c0_87, %c0_88] : memref<1x4x8x32xf32, #tpu.memory_space<vmem>>, vector<1x1x8x32xf32>
    %99 = vector.shape_cast %98 : vector<1x1x8x32xf32> to vector<8x32xf32>
    %cst_89 = arith.constant dense<0.000000e+00> : vector<2x3x8xf32>
    %100 = tpu.matmul %3, %99, %cst_89 {dimension_numbers = #tpu.dot_dimension_numbers<[2], [1], [0, 1], [0], [0, 0, 0, 1, 1, 0], [], []>} : vector<2x3x32xf32>, vector<8x32xf32>, vector<2x3x8xf32> -> vector<2x3x8xf32>
    %c0_90 = arith.constant 0 : index
    %c2_91 = arith.constant 2 : index
    %c0_92 = arith.constant 0 : index
    %c0_93 = arith.constant 0 : index
    %101 = vector.load %arg18[%c0_90, %c2_91, %c0_92, %c0_93] : memref<1x4x1x8xf32, #tpu.memory_space<vmem>>, vector<1x1x1x8xf32>
    %102 = vector.shape_cast %101 : vector<1x1x1x8xf32> to vector<1x8xf32>
    %103 = vector.shape_cast %102 : vector<1x8xf32> to vector<1x1x8xf32>
    %104 = vector.broadcast %103 : vector<1x1x8xf32> to vector<2x3x8xf32>
    %105 = arith.addf %100, %104 : vector<2x3x8xf32>
    %c0_94 = arith.constant 0 : index
    %c2_95 = arith.constant 2 : index
    %c0_96 = arith.constant 0 : index
    %c0_97 = arith.constant 0 : index
    %106 = vector.load %arg16[%c0_94, %c2_95, %c0_96, %c0_97] : memref<1x4x8x32xf32, #tpu.memory_space<vmem>>, vector<1x1x8x32xf32>
    %107 = vector.shape_cast %106 : vector<1x1x8x32xf32> to vector<8x32xf32>
    %cst_98 = arith.constant dense<0.000000e+00> : vector<2x3x8xf32>
    %108 = tpu.matmul %3, %107, %cst_98 {dimension_numbers = #tpu.dot_dimension_numbers<[2], [1], [0, 1], [0], [0, 0, 0, 1, 1, 0], [], []>} : vector<2x3x32xf32>, vector<8x32xf32>, vector<2x3x8xf32> -> vector<2x3x8xf32>
    %c0_99 = arith.constant 0 : index
    %c2_100 = arith.constant 2 : index
    %c0_101 = arith.constant 0 : index
    %c0_102 = arith.constant 0 : index
    %109 = vector.load %arg19[%c0_99, %c2_100, %c0_101, %c0_102] : memref<1x4x1x8xf32, #tpu.memory_space<vmem>>, vector<1x1x1x8xf32>
    %110 = vector.shape_cast %109 : vector<1x1x1x8xf32> to vector<1x8xf32>
    %111 = vector.shape_cast %110 : vector<1x8xf32> to vector<1x1x8xf32>
    %112 = vector.broadcast %111 : vector<1x1x8xf32> to vector<2x3x8xf32>
    %113 = arith.addf %108, %112 : vector<2x3x8xf32>
    "tpu.trace_start"() <{level = 10 : i32, message = "bqd,bkd->bqk"}> : () -> ()
    %cst_103 = arith.constant dense<0.000000e+00> : vector<2x3x3xf32>
    %114 = tpu.matmul %97, %105, %cst_103 {dimension_numbers = #tpu.dot_dimension_numbers<[2], [2], [1], [1], [0, 0, 0, 1, 1, 1], [0], [0]>} : vector<2x3x8xf32>, vector<2x3x8xf32>, vector<2x3x3xf32> -> vector<2x3x3xf32>
    "tpu.trace_stop"() : () -> ()
    %115 = vector.broadcast %4 : vector<2x1x3xf32> to vector<2x3x3xf32>
    %116 = arith.addf %114, %115 : vector<2x3x3xf32>
    %cst_104 = arith.constant dense<0xFF800000> : vector<2x3xf32>
    %117 = vector.multi_reduction <maximumf>, %116, %cst_104 [2] : vector<2x3x3xf32> to vector<2x3xf32>
    %118 = vector.shape_cast %117 : vector<2x3xf32> to vector<2x3x1xf32>
    %119 = vector.broadcast %118 : vector<2x3x1xf32> to vector<2x3x3xf32>
    %120 = arith.subf %116, %119 : vector<2x3x3xf32>
    %121 = math.exp %120 : vector<2x3x3xf32>
    %cst_105 = arith.constant dense<0.000000e+00> : vector<2x3xf32>
    %122 = vector.multi_reduction <add>, %121, %cst_105 [2] : vector<2x3x3xf32> to vector<2x3xf32>
    %123 = vector.shape_cast %122 : vector<2x3xf32> to vector<2x3x1xf32>
    %124 = tpu.reciprocal %123 {approx = true} : vector<2x3x1xf32> -> vector<2x3x1xf32>
    %125 = vector.broadcast %124 : vector<2x3x1xf32> to vector<2x3x3xf32>
    %126 = arith.mulf %121, %125 : vector<2x3x3xf32>
    "tpu.trace_start"() <{level = 10 : i32, message = "bqk,bkd->bqd"}> : () -> ()
    %cst_106 = arith.constant dense<0.000000e+00> : vector<2x3x8xf32>
    %127 = tpu.matmul %126, %113, %cst_106 {dimension_numbers = #tpu.dot_dimension_numbers<[2], [1], [1], [2], [0, 0, 0, 1, 1, 2], [0], [0]>} : vector<2x3x3xf32>, vector<2x3x8xf32>, vector<2x3x8xf32> -> vector<2x3x8xf32>
    "tpu.trace_stop"() : () -> ()
    %c0_107 = arith.constant 0 : index
    %c2_108 = arith.constant 2 : index
    %c0_109 = arith.constant 0 : index
    %c0_110 = arith.constant 0 : index
    %128 = vector.load %arg20[%c0_107, %c2_108, %c0_109, %c0_110] : memref<1x4x32x8xf32, #tpu.memory_space<vmem>>, vector<1x1x32x8xf32>
    %129 = vector.shape_cast %128 : vector<1x1x32x8xf32> to vector<32x8xf32>
    %cst_111 = arith.constant dense<0.000000e+00> : vector<2x3x32xf32>
    %130 = tpu.matmul %127, %129, %cst_111 {dimension_numbers = #tpu.dot_dimension_numbers<[2], [1], [0, 1], [0], [0, 0, 0, 1, 1, 0], [], []>} : vector<2x3x8xf32>, vector<32x8xf32>, vector<2x3x32xf32> -> vector<2x3x32xf32>
    %131 = arith.addf %89, %130 : vector<2x3x32xf32>
    %c0_112 = arith.constant 0 : index
    %c3 = arith.constant 3 : index
    %c0_113 = arith.constant 0 : index
    %c0_114 = arith.constant 0 : index
    %132 = vector.load %arg14[%c0_112, %c3, %c0_113, %c0_114] : memref<1x4x8x32xf32, #tpu.memory_space<vmem>>, vector<1x1x8x32xf32>
    %133 = vector.shape_cast %132 : vector<1x1x8x32xf32> to vector<8x32xf32>
    %cst_115 = arith.constant dense<0.000000e+00> : vector<2x3x8xf32>
    %134 = tpu.matmul %3, %133, %cst_115 {dimension_numbers = #tpu.dot_dimension_numbers<[2], [1], [0, 1], [0], [0, 0, 0, 1, 1, 0], [], []>} : vector<2x3x32xf32>, vector<8x32xf32>, vector<2x3x8xf32> -> vector<2x3x8xf32>
    %c0_116 = arith.constant 0 : index
    %c3_117 = arith.constant 3 : index
    %c0_118 = arith.constant 0 : index
    %c0_119 = arith.constant 0 : index
    %135 = vector.load %arg17[%c0_116, %c3_117, %c0_118, %c0_119] : memref<1x4x1x8xf32, #tpu.memory_space<vmem>>, vector<1x1x1x8xf32>
    %136 = vector.shape_cast %135 : vector<1x1x1x8xf32> to vector<1x8xf32>
    %137 = vector.shape_cast %136 : vector<1x8xf32> to vector<1x1x8xf32>
    %138 = vector.broadcast %137 : vector<1x1x8xf32> to vector<2x3x8xf32>
    %139 = arith.addf %134, %138 : vector<2x3x8xf32>
    %c0_120 = arith.constant 0 : index
    %c3_121 = arith.constant 3 : index
    %c0_122 = arith.constant 0 : index
    %c0_123 = arith.constant 0 : index
    %140 = vector.load %arg15[%c0_120, %c3_121, %c0_122, %c0_123] : memref<1x4x8x32xf32, #tpu.memory_space<vmem>>, vector<1x1x8x32xf32>
    %141 = vector.shape_cast %140 : vector<1x1x8x32xf32> to vector<8x32xf32>
    %cst_124 = arith.constant dense<0.000000e+00> : vector<2x3x8xf32>
    %142 = tpu.matmul %3, %141, %cst_124 {dimension_numbers = #tpu.dot_dimension_numbers<[2], [1], [0, 1], [0], [0, 0, 0, 1, 1, 0], [], []>} : vector<2x3x32xf32>, vector<8x32xf32>, vector<2x3x8xf32> -> vector<2x3x8xf32>
    %c0_125 = arith.constant 0 : index
    %c3_126 = arith.constant 3 : index
    %c0_127 = arith.constant 0 : index
    %c0_128 = arith.constant 0 : index
    %143 = vector.load %arg18[%c0_125, %c3_126, %c0_127, %c0_128] : memref<1x4x1x8xf32, #tpu.memory_space<vmem>>, vector<1x1x1x8xf32>
    %144 = vector.shape_cast %143 : vector<1x1x1x8xf32> to vector<1x8xf32>
    %145 = vector.shape_cast %144 : vector<1x8xf32> to vector<1x1x8xf32>
    %146 = vector.broadcast %145 : vector<1x1x8xf32> to vector<2x3x8xf32>
    %147 = arith.addf %142, %146 : vector<2x3x8xf32>
    %c0_129 = arith.constant 0 : index
    %c3_130 = arith.constant 3 : index
    %c0_131 = arith.constant 0 : index
    %c0_132 = arith.constant 0 : index
    %148 = vector.load %arg16[%c0_129, %c3_130, %c0_131, %c0_132] : memref<1x4x8x32xf32, #tpu.memory_space<vmem>>, vector<1x1x8x32xf32>
    %149 = vector.shape_cast %148 : vector<1x1x8x32xf32> to vector<8x32xf32>
    %cst_133 = arith.constant dense<0.000000e+00> : vector<2x3x8xf32>
    %150 = tpu.matmul %3, %149, %cst_133 {dimension_numbers = #tpu.dot_dimension_numbers<[2], [1], [0, 1], [0], [0, 0, 0, 1, 1, 0], [], []>} : vector<2x3x32xf32>, vector<8x32xf32>, vector<2x3x8xf32> -> vector<2x3x8xf32>
    %c0_134 = arith.constant 0 : index
    %c3_135 = arith.constant 3 : index
    %c0_136 = arith.constant 0 : index
    %c0_137 = arith.constant 0 : index
    %151 = vector.load %arg19[%c0_134, %c3_135, %c0_136, %c0_137] : memref<1x4x1x8xf32, #tpu.memory_space<vmem>>, vector<1x1x1x8xf32>
    %152 = vector.shape_cast %151 : vector<1x1x1x8xf32> to vector<1x8xf32>
    %153 = vector.shape_cast %152 : vector<1x8xf32> to vector<1x1x8xf32>
    %154 = vector.broadcast %153 : vector<1x1x8xf32> to vector<2x3x8xf32>
    %155 = arith.addf %150, %154 : vector<2x3x8xf32>
    "tpu.trace_start"() <{level = 10 : i32, message = "bqd,bkd->bqk"}> : () -> ()
    %cst_138 = arith.constant dense<0.000000e+00> : vector<2x3x3xf32>
    %156 = tpu.matmul %139, %147, %cst_138 {dimension_numbers = #tpu.dot_dimension_numbers<[2], [2], [1], [1], [0, 0, 0, 1, 1, 1], [0], [0]>} : vector<2x3x8xf32>, vector<2x3x8xf32>, vector<2x3x3xf32> -> vector<2x3x3xf32>
    "tpu.trace_stop"() : () -> ()
    %157 = vector.broadcast %4 : vector<2x1x3xf32> to vector<2x3x3xf32>
    %158 = arith.addf %156, %157 : vector<2x3x3xf32>
    %cst_139 = arith.constant dense<0xFF800000> : vector<2x3xf32>
    %159 = vector.multi_reduction <maximumf>, %158, %cst_139 [2] : vector<2x3x3xf32> to vector<2x3xf32>
    %160 = vector.shape_cast %159 : vector<2x3xf32> to vector<2x3x1xf32>
    %161 = vector.broadcast %160 : vector<2x3x1xf32> to vector<2x3x3xf32>
    %162 = arith.subf %158, %161 : vector<2x3x3xf32>
    %163 = math.exp %162 : vector<2x3x3xf32>
    %cst_140 = arith.constant dense<0.000000e+00> : vector<2x3xf32>
    %164 = vector.multi_reduction <add>, %163, %cst_140 [2] : vector<2x3x3xf32> to vector<2x3xf32>
    %165 = vector.shape_cast %164 : vector<2x3xf32> to vector<2x3x1xf32>
    %166 = tpu.reciprocal %165 {approx = true} : vector<2x3x1xf32> -> vector<2x3x1xf32>
    %167 = vector.broadcast %166 : vector<2x3x1xf32> to vector<2x3x3xf32>
    %168 = arith.mulf %163, %167 : vector<2x3x3xf32>
    "tpu.trace_start"() <{level = 10 : i32, message = "bqk,bkd->bqd"}> : () -> ()
    %cst_141 = arith.constant dense<0.000000e+00> : vector<2x3x8xf32>
    %169 = tpu.matmul %168, %155, %cst_141 {dimension_numbers = #tpu.dot_dimension_numbers<[2], [1], [1], [2], [0, 0, 0, 1, 1, 2], [0], [0]>} : vector<2x3x3xf32>, vector<2x3x8xf32>, vector<2x3x8xf32> -> vector<2x3x8xf32>
    "tpu.trace_stop"() : () -> ()
    %c0_142 = arith.constant 0 : index
    %c3_143 = arith.constant 3 : index
    %c0_144 = arith.constant 0 : index
    %c0_145 = arith.constant 0 : index
    %170 = vector.load %arg20[%c0_142, %c3_143, %c0_144, %c0_145] : memref<1x4x32x8xf32, #tpu.memory_space<vmem>>, vector<1x1x32x8xf32>
    %171 = vector.shape_cast %170 : vector<1x1x32x8xf32> to vector<32x8xf32>
    %cst_146 = arith.constant dense<0.000000e+00> : vector<2x3x32xf32>
    %172 = tpu.matmul %169, %171, %cst_146 {dimension_numbers = #tpu.dot_dimension_numbers<[2], [1], [0, 1], [0], [0, 0, 0, 1, 1, 0], [], []>} : vector<2x3x8xf32>, vector<32x8xf32>, vector<2x3x32xf32> -> vector<2x3x32xf32>
    %173 = arith.addf %131, %172 : vector<2x3x32xf32>
    %c0_147 = arith.constant 0 : index
    %c0_148 = arith.constant 0 : index
    %c0_149 = arith.constant 0 : index
    %174 = vector.load %arg21[%c0_147, %c0_148, %c0_149] : memref<1x1x32xf32, #tpu.memory_space<vmem>>, vector<1x1x32xf32>
    %175 = vector.shape_cast %174 : vector<1x1x32xf32> to vector<1x32xf32>
    %176 = vector.shape_cast %175 : vector<1x32xf32> to vector<1x1x32xf32>
    %177 = vector.broadcast %176 : vector<1x1x32xf32> to vector<2x3x32xf32>
    %178 = arith.addf %173, %177 : vector<2x3x32xf32>
    %179 = arith.addf %3, %178 : vector<2x3x32xf32>
    %c0_150 = arith.constant 0 : index
    %c0_151 = arith.constant 0 : index
    %c0_152 = arith.constant 0 : index
    %180 = vector.load %arg22[%c0_150, %c0_151, %c0_152] : memref<1x1x32xf32, #tpu.memory_space<vmem>>, vector<1x1x32xf32>
    %181 = vector.shape_cast %180 : vector<1x1x32xf32> to vector<1x32xf32>
    %c0_153 = arith.constant 0 : index
    %c0_154 = arith.constant 0 : index
    %c0_155 = arith.constant 0 : index
    %182 = vector.load %arg23[%c0_153, %c0_154, %c0_155] : memref<1x1x32xf32, #tpu.memory_space<vmem>>, vector<1x1x32xf32>
    %183 = vector.shape_cast %182 : vector<1x1x32xf32> to vector<1x32xf32>
    %cst_156 = arith.constant dense<0.000000e+00> : vector<2x3xf32>
    %184 = vector.multi_reduction <add>, %179, %cst_156 [2] : vector<2x3x32xf32> to vector<2x3xf32>
    %185 = vector.shape_cast %184 : vector<2x3xf32> to vector<2x3x1xf32>
    %cst_157 = arith.constant 3.200000e+01 : f32
    %186 = vector.broadcast %cst_157 : f32 to vector<2x3x1xf32>
    %187 = arith.divf %185, %186 : vector<2x3x1xf32>
    %188 = vector.broadcast %187 : vector<2x3x1xf32> to vector<2x3x32xf32>
    %189 = arith.subf %179, %188 : vector<2x3x32xf32>
    %190 = arith.mulf %189, %189 : vector<2x3x32xf32>
    %cst_158 = arith.constant dense<0.000000e+00> : vector<2x3xf32>
    %191 = vector.multi_reduction <add>, %190, %cst_158 [2] : vector<2x3x32xf32> to vector<2x3xf32>
    %192 = vector.shape_cast %191 : vector<2x3xf32> to vector<2x3x1xf32>
    %cst_159 = arith.constant 3.200000e+01 : f32
    %193 = vector.broadcast %cst_159 : f32 to vector<2x3x1xf32>
    %194 = arith.divf %192, %193 : vector<2x3x1xf32>
    %195 = vector.broadcast %187 : vector<2x3x1xf32> to vector<2x3x32xf32>
    %196 = arith.subf %179, %195 : vector<2x3x32xf32>
    %cst_160 = arith.constant 9.99999974E-6 : f32
    %197 = vector.broadcast %cst_160 : f32 to vector<2x3x1xf32>
    %198 = arith.addf %194, %197 : vector<2x3x1xf32>
    %199 = math.rsqrt %198 : vector<2x3x1xf32>
    %200 = vector.broadcast %199 : vector<2x3x1xf32> to vector<2x3x32xf32>
    %201 = arith.mulf %196, %200 : vector<2x3x32xf32>
    %202 = vector.shape_cast %181 : vector<1x32xf32> to vector<1x1x32xf32>
    %203 = vector.broadcast %202 : vector<1x1x32xf32> to vector<2x3x32xf32>
    %204 = arith.mulf %201, %203 : vector<2x3x32xf32>
    %205 = vector.shape_cast %183 : vector<1x32xf32> to vector<1x1x32xf32>
    %206 = vector.broadcast %205 : vector<1x1x32xf32> to vector<2x3x32xf32>
    %207 = arith.addf %204, %206 : vector<2x3x32xf32>
    %c0_161 = arith.constant 0 : index
    %c0_162 = arith.constant 0 : index
    %c0_163 = arith.constant 0 : index
    %208 = vector.load %arg24[%c0_161, %c0_162, %c0_163] : memref<1x64x32xf32, #tpu.memory_space<vmem>>, vector<1x64x32xf32>
    %209 = vector.shape_cast %208 : vector<1x64x32xf32> to vector<64x32xf32>
    %cst_164 = arith.constant dense<0.000000e+00> : vector<2x3x64xf32>
    %210 = tpu.matmul %207, %209, %cst_164 {dimension_numbers = #tpu.dot_dimension_numbers<[2], [1], [0, 1], [0], [0, 0, 0, 1, 1, 0], [], []>} : vector<2x3x32xf32>, vector<64x32xf32>, vector<2x3x64xf32> -> vector<2x3x64xf32>
    %c0_165 = arith.constant 0 : index
    %c0_166 = arith.constant 0 : index
    %c0_167 = arith.constant 0 : index
    %211 = vector.load %arg25[%c0_165, %c0_166, %c0_167] : memref<1x1x64xf32, #tpu.memory_space<vmem>>, vector<1x1x64xf32>
    %212 = vector.shape_cast %211 : vector<1x1x64xf32> to vector<1x64xf32>
    %213 = vector.shape_cast %212 : vector<1x64xf32> to vector<1x1x64xf32>
    %214 = vector.broadcast %213 : vector<1x1x64xf32> to vector<2x3x64xf32>
    %215 = arith.addf %210, %214 : vector<2x3x64xf32>
    %cst_168 = arith.constant 0.000000e+00 : f32
    %216 = vector.broadcast %cst_168 : f32 to vector<2x3x64xf32>
    %217 = arith.maximumf %215, %216 : vector<2x3x64xf32>
    %c0_169 = arith.constant 0 : index
    %c0_170 = arith.constant 0 : index
    %c0_171 = arith.constant 0 : index
    %218 = vector.load %arg26[%c0_169, %c0_170, %c0_171] : memref<1x32x64xf32, #tpu.memory_space<vmem>>, vector<1x32x64xf32>
    %219 = vector.shape_cast %218 : vector<1x32x64xf32> to vector<32x64xf32>
    %cst_172 = arith.constant dense<0.000000e+00> : vector<2x3x32xf32>
    %220 = tpu.matmul %217, %219, %cst_172 {dimension_numbers = #tpu.dot_dimension_numbers<[2], [1], [0, 1], [0], [0, 0, 0, 1, 1, 0], [], []>} : vector<2x3x64xf32>, vector<32x64xf32>, vector<2x3x32xf32> -> vector<2x3x32xf32>
    %c0_173 = arith.constant 0 : index
    %c0_174 = arith.constant 0 : index
    %c0_175 = arith.constant 0 : index
    %221 = vector.load %arg27[%c0_173, %c0_174, %c0_175] : memref<1x1x32xf32, #tpu.memory_space<vmem>>, vector<1x1x32xf32>
    %222 = vector.shape_cast %221 : vector<1x1x32xf32> to vector<1x32xf32>
    %223 = vector.shape_cast %222 : vector<1x32xf32> to vector<1x1x32xf32>
    %224 = vector.broadcast %223 : vector<1x1x32xf32> to vector<2x3x32xf32>
    %225 = arith.addf %220, %224 : vector<2x3x32xf32>
    %226 = arith.addf %207, %225 : vector<2x3x32xf32>
    %c0_176 = arith.constant 0 : index
    %c0_177 = arith.constant 0 : index
    %c0_178 = arith.constant 0 : index
    %227 = vector.load %arg28[%c0_176, %c0_177, %c0_178] : memref<1x1x32xf32, #tpu.memory_space<vmem>>, vector<1x1x32xf32>
    %228 = vector.shape_cast %227 : vector<1x1x32xf32> to vector<1x32xf32>
    %c0_179 = arith.constant 0 : index
    %c0_180 = arith.constant 0 : index
    %c0_181 = arith.constant 0 : index
    %229 = vector.load %arg29[%c0_179, %c0_180, %c0_181] : memref<1x1x32xf32, #tpu.memory_space<vmem>>, vector<1x1x32xf32>
    %230 = vector.shape_cast %229 : vector<1x1x32xf32> to vector<1x32xf32>
    %cst_182 = arith.constant dense<0.000000e+00> : vector<2x3xf32>
    %231 = vector.multi_reduction <add>, %226, %cst_182 [2] : vector<2x3x32xf32> to vector<2x3xf32>
    %232 = vector.shape_cast %231 : vector<2x3xf32> to vector<2x3x1xf32>
    %cst_183 = arith.constant 3.200000e+01 : f32
    %233 = vector.broadcast %cst_183 : f32 to vector<2x3x1xf32>
    %234 = arith.divf %232, %233 : vector<2x3x1xf32>
    %235 = vector.broadcast %234 : vector<2x3x1xf32> to vector<2x3x32xf32>
    %236 = arith.subf %226, %235 : vector<2x3x32xf32>
    %237 = arith.mulf %236, %236 : vector<2x3x32xf32>
    %cst_184 = arith.constant dense<0.000000e+00> : vector<2x3xf32>
    %238 = vector.multi_reduction <add>, %237, %cst_184 [2] : vector<2x3x32xf32> to vector<2x3xf32>
    %239 = vector.shape_cast %238 : vector<2x3xf32> to vector<2x3x1xf32>
    %cst_185 = arith.constant 3.200000e+01 : f32
    %240 = vector.broadcast %cst_185 : f32 to vector<2x3x1xf32>
    %241 = arith.divf %239, %240 : vector<2x3x1xf32>
    %242 = vector.broadcast %234 : vector<2x3x1xf32> to vector<2x3x32xf32>
    %243 = arith.subf %226, %242 : vector<2x3x32xf32>
    %cst_186 = arith.constant 9.99999974E-6 : f32
    %244 = vector.broadcast %cst_186 : f32 to vector<2x3x1xf32>
    %245 = arith.addf %241, %244 : vector<2x3x1xf32>
    %246 = math.rsqrt %245 : vector<2x3x1xf32>
    %247 = vector.broadcast %246 : vector<2x3x1xf32> to vector<2x3x32xf32>
    %248 = arith.mulf %243, %247 : vector<2x3x32xf32>
    %249 = vector.shape_cast %228 : vector<1x32xf32> to vector<1x1x32xf32>
    %250 = vector.broadcast %249 : vector<1x1x32xf32> to vector<2x3x32xf32>
    %251 = arith.mulf %248, %250 : vector<2x3x32xf32>
    %252 = vector.shape_cast %230 : vector<1x32xf32> to vector<1x1x32xf32>
    %253 = vector.broadcast %252 : vector<1x1x32xf32> to vector<2x3x32xf32>
    %254 = arith.addf %251, %253 : vector<2x3x32xf32>
    %c0_187 = arith.constant 0 : index
    %c0_188 = arith.constant 0 : index
    %c0_189 = arith.constant 0 : index
    %255 = vector.load %arg30[%c0_187, %c0_188, %c0_189] : memref<2x3x32xf32, #tpu.memory_space<vmem>>, vector<2x3x32xf32>
    tpu.vector_store %arg30[%c0_187, %c0_188, %c0_189], %254 {strides = array<i32>} : memref<2x3x32xf32, #tpu.memory_space<vmem>>, vector<2x3x32xf32>,
    return
  }
  func.func @transform_0(%arg0: i32) -> (i32, i32, i32) {
    %c0_i32 = arith.constant 0 : i32
    %c0_i32_0 = arith.constant 0 : i32
    %c0_i32_1 = arith.constant 0 : i32
    %c0_i32_2 = arith.constant 0 : i32
    return %c0_i32, %c0_i32_0, %c0_i32_1 : i32, i32, i32
  }
  func.func @transform_1(%arg0: i32) -> (i32, i32, i32) {
    %c0_i32 = arith.constant 0 : i32
    %c0_i32_0 = arith.constant 0 : i32
    %c0_i32_1 = arith.constant 0 : i32
    %c0_i32_2 = arith.constant 0 : i32
    return %c0_i32, %c0_i32_0, %c0_i32_1 : i32, i32, i32
  }
  func.func @transform_2(%arg0: i32) -> (i32, i32, i32) {
    %c0_i32 = arith.constant 0 : i32
    %c0_i32_0 = arith.constant 0 : i32
    %c0_i32_1 = arith.constant 0 : i32
    %c0_i32_2 = arith.constant 0 : i32
    return %c0_i32, %c0_i32_0, %c0_i32_1 : i32, i32, i32
  }
  func.func @transform_3(%arg0: i32) -> (i32, i32, i32) {
    %c0_i32 = arith.constant 0 : i32
    %c0_i32_0 = arith.constant 0 : i32
    %c0_i32_1 = arith.constant 0 : i32
    %c0_i32_2 = arith.constant 0 : i32
    return %c0_i32, %c0_i32_0, %c0_i32_1 : i32, i32, i32
  }
  func.func @transform_4(%arg0: i32) -> (i32, i32, i32) {
    %c0_i32 = arith.constant 0 : i32
    %c0_i32_0 = arith.constant 0 : i32
    %c0_i32_1 = arith.constant 0 : i32
    %c0_i32_2 = arith.constant 0 : i32
    return %c0_i32, %c0_i32_0, %c0_i32_1 : i32, i32, i32
  }
  func.func @transform_5(%arg0: i32) -> (i32, i32) {
    %c0_i32 = arith.constant 0 : i32
    %c0_i32_0 = arith.constant 0 : i32
    %c0_i32_1 = arith.constant 0 : i32
    return %c0_i32, %c0_i32_0 : i32, i32
  }
  func.func @transform_6(%arg0: i32) -> (i32, i32) {
    %c0_i32 = arith.constant 0 : i32
    %c0_i32_0 = arith.constant 0 : i32
    %c0_i32_1 = arith.constant 0 : i32
    return %c0_i32, %c0_i32_0 : i32, i32
  }
  func.func @transform_7(%arg0: i32) -> (i32, i32) {
    %c0_i32 = arith.constant 0 : i32
    %c0_i32_0 = arith.constant 0 : i32
    %c0_i32_1 = arith.constant 0 : i32
    return %c0_i32, %c0_i32_0 : i32, i32
  }
  func.func @transform_8(%arg0: i32) -> (i32, i32) {
    %c0_i32 = arith.constant 0 : i32
    %c0_i32_0 = arith.constant 0 : i32
    %c0_i32_1 = arith.constant 0 : i32
    return %c0_i32, %c0_i32_0 : i32, i32
  }
  func.func @transform_9(%arg0: i32) -> (i32, i32) {
    %c0_i32 = arith.constant 0 : i32
    %c0_i32_0 = arith.constant 0 : i32
    %c0_i32_1 = arith.constant 0 : i32
    return %c0_i32, %c0_i32_0 : i32, i32
  }
  func.func @transform_10(%arg0: i32) -> (i32, i32) {
    %c0_i32 = arith.constant 0 : i32
    %c0_i32_0 = arith.constant 0 : i32
    %c0_i32_1 = arith.constant 0 : i32
    return %c0_i32, %c0_i32_0 : i32, i32
  }
  func.func @transform_11(%arg0: i32) -> (i32, i32) {
    %c0_i32 = arith.constant 0 : i32
    %c0_i32_0 = arith.constant 0 : i32
    %c0_i32_1 = arith.constant 0 : i32
    return %c0_i32, %c0_i32_0 : i32, i32
  }
  func.func @transform_12(%arg0: i32) -> (i32, i32, i32) {
    %c0_i32 = arith.constant 0 : i32
    %c0_i32_0 = arith.constant 0 : i32
    %c0_i32_1 = arith.constant 0 : i32
    %c0_i32_2 = arith.constant 0 : i32
    return %c0_i32, %c0_i32_0, %c0_i32_1 : i32, i32, i32
  }
  func.func @transform_13(%arg0: i32) -> (i32, i32, i32, i32) {
    %c0_i32 = arith.constant 0 : i32
    %c0_i32_0 = arith.constant 0 : i32
    %c0_i32_1 = arith.constant 0 : i32
    %c0_i32_2 = arith.constant 0 : i32
    return %arg0, %c0_i32, %c0_i32_0, %c0_i32_1 : i32, i32, i32, i32
  }
  func.func @transform_14(%arg0: i32) -> (i32, i32, i32, i32) {
    %c0_i32 = arith.constant 0 : i32
    %c0_i32_0 = arith.constant 0 : i32
    %c0_i32_1 = arith.constant 0 : i32
    %c0_i32_2 = arith.constant 0 : i32
    return %arg0, %c0_i32, %c0_i32_0, %c0_i32_1 : i32, i32, i32, i32
  }
  func.func @transform_15(%arg0: i32) -> (i32, i32, i32, i32) {
    %c0_i32 = arith.constant 0 : i32
    %c0_i32_0 = arith.constant 0 : i32
    %c0_i32_1 = arith.constant 0 : i32
    %c0_i32_2 = arith.constant 0 : i32
    return %arg0, %c0_i32, %c0_i32_0, %c0_i32_1 : i32, i32, i32, i32
  }
  func.func @transform_16(%arg0: i32) -> (i32, i32, i32, i32) {
    %c0_i32 = arith.constant 0 : i32
    %c0_i32_0 = arith.constant 0 : i32
    %c0_i32_1 = arith.constant 0 : i32
    %c0_i32_2 = arith.constant 0 : i32
    return %arg0, %c0_i32, %c0_i32_0, %c0_i32_1 : i32, i32, i32, i32
  }
  func.func @transform_17(%arg0: i32) -> (i32, i32, i32, i32) {
    %c0_i32 = arith.constant 0 : i32
    %c0_i32_0 = arith.constant 0 : i32
    %c0_i32_1 = arith.constant 0 : i32
    %c0_i32_2 = arith.constant 0 : i32
    return %arg0, %c0_i32, %c0_i32_0, %c0_i32_1 : i32, i32, i32, i32
  }
  func.func @transform_18(%arg0: i32) -> (i32, i32, i32, i32) {
    %c0_i32 = arith.constant 0 : i32
    %c0_i32_0 = arith.constant 0 : i32
    %c0_i32_1 = arith.constant 0 : i32
    %c0_i32_2 = arith.constant 0 : i32
    return %arg0, %c0_i32, %c0_i32_0, %c0_i32_1 : i32, i32, i32, i32
  }
  func.func @transform_19(%arg0: i32) -> (i32, i32, i32, i32) {
    %c0_i32 = arith.constant 0 : i32
    %c0_i32_0 = arith.constant 0 : i32
    %c0_i32_1 = arith.constant 0 : i32
    %c0_i32_2 = arith.constant 0 : i32
    return %arg0, %c0_i32, %c0_i32_0, %c0_i32_1 : i32, i32, i32, i32
  }
  func.func @transform_20(%arg0: i32) -> (i32, i32, i32) {
    %c0_i32 = arith.constant 0 : i32
    %c0_i32_0 = arith.constant 0 : i32
    %c0_i32_1 = arith.constant 0 : i32
    return %arg0, %c0_i32, %c0_i32_0 : i32, i32, i32
  }
  func.func @transform_21(%arg0: i32) -> (i32, i32, i32) {
    %c0_i32 = arith.constant 0 : i32
    %c0_i32_0 = arith.constant 0 : i32
    %c0_i32_1 = arith.constant 0 : i32
    return %arg0, %c0_i32, %c0_i32_0 : i32, i32, i32
  }
  func.func @transform_22(%arg0: i32) -> (i32, i32, i32) {
    %c0_i32 = arith.constant 0 : i32
    %c0_i32_0 = arith.constant 0 : i32
    %c0_i32_1 = arith.constant 0 : i32
    return %arg0, %c0_i32, %c0_i32_0 : i32, i32, i32
  }
  func.func @transform_23(%arg0: i32) -> (i32, i32, i32) {
    %c0_i32 = arith.constant 0 : i32
    %c0_i32_0 = arith.constant 0 : i32
    %c0_i32_1 = arith.constant 0 : i32
    return %arg0, %c0_i32, %c0_i32_0 : i32, i32, i32
  }
  func.func @transform_24(%arg0: i32) -> (i32, i32, i32) {
    %c0_i32 = arith.constant 0 : i32
    %c0_i32_0 = arith.constant 0 : i32
    %c0_i32_1 = arith.constant 0 : i32
    return %arg0, %c0_i32, %c0_i32_0 : i32, i32, i32
  }
  func.func @transform_25(%arg0: i32) -> (i32, i32, i32) {
    %c0_i32 = arith.constant 0 : i32
    %c0_i32_0 = arith.constant 0 : i32
    %c0_i32_1 = arith.constant 0 : i32
    return %arg0, %c0_i32, %c0_i32_0 : i32, i32, i32
  }
  func.func @transform_26(%arg0: i32) -> (i32, i32, i32) {
    %c0_i32 = arith.constant 0 : i32
    %c0_i32_0 = arith.constant 0 : i32
    %c0_i32_1 = arith.constant 0 : i32
    return %arg0, %c0_i32, %c0_i32_0 : i32, i32, i32
  }
  func.func @transform_27(%arg0: i32) -> (i32, i32, i32) {
    %c0_i32 = arith.constant 0 : i32
    %c0_i32_0 = arith.constant 0 : i32
    %c0_i32_1 = arith.constant 0 : i32
    return %arg0, %c0_i32, %c0_i32_0 : i32, i32, i32
  }
  func.func @transform_28(%arg0: i32) -> (i32, i32, i32) {
    %c0_i32 = arith.constant 0 : i32
    %c0_i32_0 = arith.constant 0 : i32
    %c0_i32_1 = arith.constant 0 : i32
    return %arg0, %c0_i32, %c0_i32_0 : i32, i32, i32
  }
  func.func @transform_29(%arg0: i32) -> (i32, i32, i32) {
    %c0_i32 = arith.constant 0 : i32
    %c0_i32_0 = arith.constant 0 : i32
    %c0_i32_1 = arith.constant 0 : i32
    %c0_i32_2 = arith.constant 0 : i32
    return %c0_i32, %c0_i32_0, %c0_i32_1 : i32, i32, i32
  }
}

module attributes {stable_mosaic.version = 11 : i64} {
  func.func @_decoder_fused_kernel(%arg0: i32, %arg1: memref<2x4x32xf32, #tpu.memory_space<vmem>>, %arg2: memref<2x1x4xf32, #tpu.memory_space<vmem>>, %arg3: memref<1x4x8x32xf32, #tpu.memory_space<vmem>>, %arg4: memref<1x4x8x32xf32, #tpu.memory_space<vmem>>, %arg5: memref<1x4x8x32xf32, #tpu.memory_space<vmem>>, %arg6: memref<1x4x1x8xf32, #tpu.memory_space<vmem>>, %arg7: memref<1x4x1x8xf32, #tpu.memory_space<vmem>>, %arg8: memref<1x4x1x8xf32, #tpu.memory_space<vmem>>, %arg9: memref<1x4x32x8xf32, #tpu.memory_space<vmem>>, %arg10: memref<1x1x32xf32, #tpu.memory_space<vmem>>, %arg11: memref<1x1x32xf32, #tpu.memory_space<vmem>>, %arg12: memref<1x1x32xf32, #tpu.memory_space<vmem>>, %arg13: memref<1x64x32xf32, #tpu.memory_space<vmem>>, %arg14: memref<1x1x64xf32, #tpu.memory_space<vmem>>, %arg15: memref<1x32x64xf32, #tpu.memory_space<vmem>>, %arg16: memref<1x1x32xf32, #tpu.memory_space<vmem>>, %arg17: memref<1x1x32xf32, #tpu.memory_space<vmem>>, %arg18: memref<1x1x32xf32, #tpu.memory_space<vmem>>, %arg19: memref<20x32xf32, #tpu.memory_space<vmem>>, %arg20: memref<1x20xf32, #tpu.memory_space<vmem>>, %arg21: memref<10x32xf32, #tpu.memory_space<vmem>>, %arg22: memref<1x10xf32, #tpu.memory_space<vmem>>, %arg23: memref<10x32xf32, #tpu.memory_space<vmem>>, %arg24: memref<1x10xf32, #tpu.memory_space<vmem>>, %arg25: memref<2x4x20xf32, #tpu.memory_space<vmem>>, %arg26: memref<2x4x10xf32, #tpu.memory_space<vmem>>, %arg27: memref<2x4x10xf32, #tpu.memory_space<vmem>>, %arg28: memref<2x4x32xf32, #tpu.memory_space<vmem>>) attributes {dimension_semantics = [#tpu.dimension_semantics<arbitrary>], iteration_bounds = array<i64: 2>, scalar_prefetch = 0 : i64, scratch_operands = 1 : i64, tpu.core_type = #tpu.core_type<tc>, window_params = [{pipeline_mode = #tpu.pipeline_mode<synchronous>, transform_indices = @transform_0, window_bounds = array<i64: 2, 4, 32>}, {pipeline_mode = #tpu.pipeline_mode<synchronous>, transform_indices = @transform_1, window_bounds = array<i64: 2, 1, 4>}, {transform_indices = @transform_2, window_bounds = array<i64: 1, 4, 8, 32>}, {transform_indices = @transform_3, window_bounds = array<i64: 1, 4, 8, 32>}, {transform_indices = @transform_4, window_bounds = array<i64: 1, 4, 8, 32>}, {transform_indices = @transform_5, window_bounds = array<i64: 1, 4, 1, 8>}, {transform_indices = @transform_6, window_bounds = array<i64: 1, 4, 1, 8>}, {transform_indices = @transform_7, window_bounds = array<i64: 1, 4, 1, 8>}, {transform_indices = @transform_8, window_bounds = array<i64: 1, 4, 32, 8>}, {transform_indices = @transform_9, window_bounds = array<i64: 1, 1, 32>}, {transform_indices = @transform_10, window_bounds = array<i64: 1, 1, 32>}, {transform_indices = @transform_11, window_bounds = array<i64: 1, 1, 32>}, {transform_indices = @transform_12, window_bounds = array<i64: 1, 64, 32>}, {transform_indices = @transform_13, window_bounds = array<i64: 1, 1, 64>}, {transform_indices = @transform_14, window_bounds = array<i64: 1, 32, 64>}, {transform_indices = @transform_15, window_bounds = array<i64: 1, 1, 32>}, {transform_indices = @transform_16, window_bounds = array<i64: 1, 1, 32>}, {transform_indices = @transform_17, window_bounds = array<i64: 1, 1, 32>}, {pipeline_mode = #tpu.pipeline_mode<synchronous>, transform_indices = @transform_18, window_bounds = array<i64: 20, 32>}, {pipeline_mode = #tpu.pipeline_mode<synchronous>, transform_indices = @transform_19, window_bounds = array<i64: 1, 20>}, {pipeline_mode = #tpu.pipeline_mode<synchronous>, transform_indices = @transform_20, window_bounds = array<i64: 10, 32>}, {pipeline_mode = #tpu.pipeline_mode<synchronous>, transform_indices = @transform_21, window_bounds = array<i64: 1, 10>}, {pipeline_mode = #tpu.pipeline_mode<synchronous>, transform_indices = @transform_22, window_bounds = array<i64: 10, 32>}, {pipeline_mode = #tpu.pipeline_mode<synchronous>, transform_indices = @transform_23, window_bounds = array<i64: 1, 10>}, {pipeline_mode = #tpu.pipeline_mode<synchronous>, transform_indices = @transform_24, window_bounds = array<i64: 2, 4, 20>}, {pipeline_mode = #tpu.pipeline_mode<synchronous>, transform_indices = @transform_25, window_bounds = array<i64: 2, 4, 10>}, {pipeline_mode = #tpu.pipeline_mode<synchronous>, transform_indices = @transform_26, window_bounds = array<i64: 2, 4, 10>}]} {
    %c0_i32 = arith.constant 0 : i32
    %0 = arith.cmpi eq, %arg0, %c0_i32 : i32
    %1 = arith.extui %0 : i1 to i32
    %c0_i32_0 = arith.constant 0 : i32
    %2 = arith.cmpi ne, %1, %c0_i32_0 : i32
    scf.if %2 {
      %c0_191 = arith.constant 0 : index
      %c0_192 = arith.constant 0 : index
      %c0_193 = arith.constant 0 : index
      %259 = vector.load %arg1[%c0_191, %c0_192, %c0_193] : memref<2x4x32xf32, #tpu.memory_space<vmem>>, vector<2x4x32xf32>
      %c0_194 = arith.constant 0 : index
      %c0_195 = arith.constant 0 : index
      %c0_196 = arith.constant 0 : index
      %260 = vector.load %arg28[%c0_194, %c0_195, %c0_196] : memref<2x4x32xf32, #tpu.memory_space<vmem>>, vector<2x4x32xf32>
      tpu.vector_store %arg28[%c0_194, %c0_195, %c0_196], %259 {strides = array<i32>} : memref<2x4x32xf32, #tpu.memory_space<vmem>>, vector<2x4x32xf32>,
    } else {
    }
    %c0 = arith.constant 0 : index
    %c0_1 = arith.constant 0 : index
    %c0_2 = arith.constant 0 : index
    %3 = vector.load %arg28[%c0, %c0_1, %c0_2] : memref<2x4x32xf32, #tpu.memory_space<vmem>>, vector<2x4x32xf32>
    %c0_3 = arith.constant 0 : index
    %c0_4 = arith.constant 0 : index
    %c0_5 = arith.constant 0 : index
    %4 = vector.load %arg2[%c0_3, %c0_4, %c0_5] : memref<2x1x4xf32, #tpu.memory_space<vmem>>, vector<2x1x4xf32>
    %cst = arith.constant 0.000000e+00 : f32
    %5 = vector.broadcast %cst : f32 to vector<2x4x32xf32>
    %c0_6 = arith.constant 0 : index
    %c0_7 = arith.constant 0 : index
    %c0_8 = arith.constant 0 : index
    %c0_9 = arith.constant 0 : index
    %6 = vector.load %arg3[%c0_6, %c0_7, %c0_8, %c0_9] : memref<1x4x8x32xf32, #tpu.memory_space<vmem>>, vector<1x1x8x32xf32>
    %7 = vector.shape_cast %6 : vector<1x1x8x32xf32> to vector<8x32xf32>
    %cst_10 = arith.constant dense<0.000000e+00> : vector<2x4x8xf32>
    %8 = tpu.matmul %3, %7, %cst_10 {dimension_numbers = #tpu.dot_dimension_numbers<[2], [1], [0, 1], [0], [0, 0, 0, 1, 1, 0], [], []>} : vector<2x4x32xf32>, vector<8x32xf32>, vector<2x4x8xf32> -> vector<2x4x8xf32>
    %c0_11 = arith.constant 0 : index
    %c0_12 = arith.constant 0 : index
    %c0_13 = arith.constant 0 : index
    %c0_14 = arith.constant 0 : index
    %9 = vector.load %arg6[%c0_11, %c0_12, %c0_13, %c0_14] : memref<1x4x1x8xf32, #tpu.memory_space<vmem>>, vector<1x1x1x8xf32>
    %10 = vector.shape_cast %9 : vector<1x1x1x8xf32> to vector<1x8xf32>
    %11 = vector.shape_cast %10 : vector<1x8xf32> to vector<1x1x8xf32>
    %12 = vector.broadcast %11 : vector<1x1x8xf32> to vector<2x4x8xf32>
    %13 = arith.addf %8, %12 : vector<2x4x8xf32>
    %c0_15 = arith.constant 0 : index
    %c0_16 = arith.constant 0 : index
    %c0_17 = arith.constant 0 : index
    %c0_18 = arith.constant 0 : index
    %14 = vector.load %arg4[%c0_15, %c0_16, %c0_17, %c0_18] : memref<1x4x8x32xf32, #tpu.memory_space<vmem>>, vector<1x1x8x32xf32>
    %15 = vector.shape_cast %14 : vector<1x1x8x32xf32> to vector<8x32xf32>
    %cst_19 = arith.constant dense<0.000000e+00> : vector<2x4x8xf32>
    %16 = tpu.matmul %3, %15, %cst_19 {dimension_numbers = #tpu.dot_dimension_numbers<[2], [1], [0, 1], [0], [0, 0, 0, 1, 1, 0], [], []>} : vector<2x4x32xf32>, vector<8x32xf32>, vector<2x4x8xf32> -> vector<2x4x8xf32>
    %c0_20 = arith.constant 0 : index
    %c0_21 = arith.constant 0 : index
    %c0_22 = arith.constant 0 : index
    %c0_23 = arith.constant 0 : index
    %17 = vector.load %arg7[%c0_20, %c0_21, %c0_22, %c0_23] : memref<1x4x1x8xf32, #tpu.memory_space<vmem>>, vector<1x1x1x8xf32>
    %18 = vector.shape_cast %17 : vector<1x1x1x8xf32> to vector<1x8xf32>
    %19 = vector.shape_cast %18 : vector<1x8xf32> to vector<1x1x8xf32>
    %20 = vector.broadcast %19 : vector<1x1x8xf32> to vector<2x4x8xf32>
    %21 = arith.addf %16, %20 : vector<2x4x8xf32>
    %c0_24 = arith.constant 0 : index
    %c0_25 = arith.constant 0 : index
    %c0_26 = arith.constant 0 : index
    %c0_27 = arith.constant 0 : index
    %22 = vector.load %arg5[%c0_24, %c0_25, %c0_26, %c0_27] : memref<1x4x8x32xf32, #tpu.memory_space<vmem>>, vector<1x1x8x32xf32>
    %23 = vector.shape_cast %22 : vector<1x1x8x32xf32> to vector<8x32xf32>
    %cst_28 = arith.constant dense<0.000000e+00> : vector<2x4x8xf32>
    %24 = tpu.matmul %3, %23, %cst_28 {dimension_numbers = #tpu.dot_dimension_numbers<[2], [1], [0, 1], [0], [0, 0, 0, 1, 1, 0], [], []>} : vector<2x4x32xf32>, vector<8x32xf32>, vector<2x4x8xf32> -> vector<2x4x8xf32>
    %c0_29 = arith.constant 0 : index
    %c0_30 = arith.constant 0 : index
    %c0_31 = arith.constant 0 : index
    %c0_32 = arith.constant 0 : index
    %25 = vector.load %arg8[%c0_29, %c0_30, %c0_31, %c0_32] : memref<1x4x1x8xf32, #tpu.memory_space<vmem>>, vector<1x1x1x8xf32>
    %26 = vector.shape_cast %25 : vector<1x1x1x8xf32> to vector<1x8xf32>
    %27 = vector.shape_cast %26 : vector<1x8xf32> to vector<1x1x8xf32>
    %28 = vector.broadcast %27 : vector<1x1x8xf32> to vector<2x4x8xf32>
    %29 = arith.addf %24, %28 : vector<2x4x8xf32>
    "tpu.trace_start"() <{level = 10 : i32, message = "bqd,bkd->bqk"}> : () -> ()
    %cst_33 = arith.constant dense<0.000000e+00> : vector<2x4x4xf32>
    %30 = tpu.matmul %13, %21, %cst_33 {dimension_numbers = #tpu.dot_dimension_numbers<[2], [2], [1], [1], [0, 0, 0, 1, 1, 1], [0], [0]>} : vector<2x4x8xf32>, vector<2x4x8xf32>, vector<2x4x4xf32> -> vector<2x4x4xf32>
    "tpu.trace_stop"() : () -> ()
    %31 = vector.broadcast %4 : vector<2x1x4xf32> to vector<2x4x4xf32>
    %32 = arith.addf %30, %31 : vector<2x4x4xf32>
    %cst_34 = arith.constant dense<0xFF800000> : vector<2x4xf32>
    %33 = vector.multi_reduction <maximumf>, %32, %cst_34 [2] : vector<2x4x4xf32> to vector<2x4xf32>
    %34 = vector.shape_cast %33 : vector<2x4xf32> to vector<2x4x1xf32>
    %35 = vector.broadcast %34 : vector<2x4x1xf32> to vector<2x4x4xf32>
    %36 = arith.subf %32, %35 : vector<2x4x4xf32>
    %37 = math.exp %36 : vector<2x4x4xf32>
    %cst_35 = arith.constant dense<0.000000e+00> : vector<2x4xf32>
    %38 = vector.multi_reduction <add>, %37, %cst_35 [2] : vector<2x4x4xf32> to vector<2x4xf32>
    %39 = vector.shape_cast %38 : vector<2x4xf32> to vector<2x4x1xf32>
    %40 = tpu.reciprocal %39 {approx = true} : vector<2x4x1xf32> -> vector<2x4x1xf32>
    %41 = vector.broadcast %40 : vector<2x4x1xf32> to vector<2x4x4xf32>
    %42 = arith.mulf %37, %41 : vector<2x4x4xf32>
    "tpu.trace_start"() <{level = 10 : i32, message = "bqk,bkd->bqd"}> : () -> ()
    %cst_36 = arith.constant dense<0.000000e+00> : vector<2x4x8xf32>
    %43 = tpu.matmul %42, %29, %cst_36 {dimension_numbers = #tpu.dot_dimension_numbers<[2], [1], [1], [2], [0, 0, 0, 1, 1, 2], [0], [0]>} : vector<2x4x4xf32>, vector<2x4x8xf32>, vector<2x4x8xf32> -> vector<2x4x8xf32>
    "tpu.trace_stop"() : () -> ()
    %c0_37 = arith.constant 0 : index
    %c0_38 = arith.constant 0 : index
    %c0_39 = arith.constant 0 : index
    %c0_40 = arith.constant 0 : index
    %44 = vector.load %arg9[%c0_37, %c0_38, %c0_39, %c0_40] : memref<1x4x32x8xf32, #tpu.memory_space<vmem>>, vector<1x1x32x8xf32>
    %45 = vector.shape_cast %44 : vector<1x1x32x8xf32> to vector<32x8xf32>
    %cst_41 = arith.constant dense<0.000000e+00> : vector<2x4x32xf32>
    %46 = tpu.matmul %43, %45, %cst_41 {dimension_numbers = #tpu.dot_dimension_numbers<[2], [1], [0, 1], [0], [0, 0, 0, 1, 1, 0], [], []>} : vector<2x4x8xf32>, vector<32x8xf32>, vector<2x4x32xf32> -> vector<2x4x32xf32>
    %47 = arith.addf %5, %46 : vector<2x4x32xf32>
    %c0_42 = arith.constant 0 : index
    %c1 = arith.constant 1 : index
    %c0_43 = arith.constant 0 : index
    %c0_44 = arith.constant 0 : index
    %48 = vector.load %arg3[%c0_42, %c1, %c0_43, %c0_44] : memref<1x4x8x32xf32, #tpu.memory_space<vmem>>, vector<1x1x8x32xf32>
    %49 = vector.shape_cast %48 : vector<1x1x8x32xf32> to vector<8x32xf32>
    %cst_45 = arith.constant dense<0.000000e+00> : vector<2x4x8xf32>
    %50 = tpu.matmul %3, %49, %cst_45 {dimension_numbers = #tpu.dot_dimension_numbers<[2], [1], [0, 1], [0], [0, 0, 0, 1, 1, 0], [], []>} : vector<2x4x32xf32>, vector<8x32xf32>, vector<2x4x8xf32> -> vector<2x4x8xf32>
    %c0_46 = arith.constant 0 : index
    %c1_47 = arith.constant 1 : index
    %c0_48 = arith.constant 0 : index
    %c0_49 = arith.constant 0 : index
    %51 = vector.load %arg6[%c0_46, %c1_47, %c0_48, %c0_49] : memref<1x4x1x8xf32, #tpu.memory_space<vmem>>, vector<1x1x1x8xf32>
    %52 = vector.shape_cast %51 : vector<1x1x1x8xf32> to vector<1x8xf32>
    %53 = vector.shape_cast %52 : vector<1x8xf32> to vector<1x1x8xf32>
    %54 = vector.broadcast %53 : vector<1x1x8xf32> to vector<2x4x8xf32>
    %55 = arith.addf %50, %54 : vector<2x4x8xf32>
    %c0_50 = arith.constant 0 : index
    %c1_51 = arith.constant 1 : index
    %c0_52 = arith.constant 0 : index
    %c0_53 = arith.constant 0 : index
    %56 = vector.load %arg4[%c0_50, %c1_51, %c0_52, %c0_53] : memref<1x4x8x32xf32, #tpu.memory_space<vmem>>, vector<1x1x8x32xf32>
    %57 = vector.shape_cast %56 : vector<1x1x8x32xf32> to vector<8x32xf32>
    %cst_54 = arith.constant dense<0.000000e+00> : vector<2x4x8xf32>
    %58 = tpu.matmul %3, %57, %cst_54 {dimension_numbers = #tpu.dot_dimension_numbers<[2], [1], [0, 1], [0], [0, 0, 0, 1, 1, 0], [], []>} : vector<2x4x32xf32>, vector<8x32xf32>, vector<2x4x8xf32> -> vector<2x4x8xf32>
    %c0_55 = arith.constant 0 : index
    %c1_56 = arith.constant 1 : index
    %c0_57 = arith.constant 0 : index
    %c0_58 = arith.constant 0 : index
    %59 = vector.load %arg7[%c0_55, %c1_56, %c0_57, %c0_58] : memref<1x4x1x8xf32, #tpu.memory_space<vmem>>, vector<1x1x1x8xf32>
    %60 = vector.shape_cast %59 : vector<1x1x1x8xf32> to vector<1x8xf32>
    %61 = vector.shape_cast %60 : vector<1x8xf32> to vector<1x1x8xf32>
    %62 = vector.broadcast %61 : vector<1x1x8xf32> to vector<2x4x8xf32>
    %63 = arith.addf %58, %62 : vector<2x4x8xf32>
    %c0_59 = arith.constant 0 : index
    %c1_60 = arith.constant 1 : index
    %c0_61 = arith.constant 0 : index
    %c0_62 = arith.constant 0 : index
    %64 = vector.load %arg5[%c0_59, %c1_60, %c0_61, %c0_62] : memref<1x4x8x32xf32, #tpu.memory_space<vmem>>, vector<1x1x8x32xf32>
    %65 = vector.shape_cast %64 : vector<1x1x8x32xf32> to vector<8x32xf32>
    %cst_63 = arith.constant dense<0.000000e+00> : vector<2x4x8xf32>
    %66 = tpu.matmul %3, %65, %cst_63 {dimension_numbers = #tpu.dot_dimension_numbers<[2], [1], [0, 1], [0], [0, 0, 0, 1, 1, 0], [], []>} : vector<2x4x32xf32>, vector<8x32xf32>, vector<2x4x8xf32> -> vector<2x4x8xf32>
    %c0_64 = arith.constant 0 : index
    %c1_65 = arith.constant 1 : index
    %c0_66 = arith.constant 0 : index
    %c0_67 = arith.constant 0 : index
    %67 = vector.load %arg8[%c0_64, %c1_65, %c0_66, %c0_67] : memref<1x4x1x8xf32, #tpu.memory_space<vmem>>, vector<1x1x1x8xf32>
    %68 = vector.shape_cast %67 : vector<1x1x1x8xf32> to vector<1x8xf32>
    %69 = vector.shape_cast %68 : vector<1x8xf32> to vector<1x1x8xf32>
    %70 = vector.broadcast %69 : vector<1x1x8xf32> to vector<2x4x8xf32>
    %71 = arith.addf %66, %70 : vector<2x4x8xf32>
    "tpu.trace_start"() <{level = 10 : i32, message = "bqd,bkd->bqk"}> : () -> ()
    %cst_68 = arith.constant dense<0.000000e+00> : vector<2x4x4xf32>
    %72 = tpu.matmul %55, %63, %cst_68 {dimension_numbers = #tpu.dot_dimension_numbers<[2], [2], [1], [1], [0, 0, 0, 1, 1, 1], [0], [0]>} : vector<2x4x8xf32>, vector<2x4x8xf32>, vector<2x4x4xf32> -> vector<2x4x4xf32>
    "tpu.trace_stop"() : () -> ()
    %73 = vector.broadcast %4 : vector<2x1x4xf32> to vector<2x4x4xf32>
    %74 = arith.addf %72, %73 : vector<2x4x4xf32>
    %cst_69 = arith.constant dense<0xFF800000> : vector<2x4xf32>
    %75 = vector.multi_reduction <maximumf>, %74, %cst_69 [2] : vector<2x4x4xf32> to vector<2x4xf32>
    %76 = vector.shape_cast %75 : vector<2x4xf32> to vector<2x4x1xf32>
    %77 = vector.broadcast %76 : vector<2x4x1xf32> to vector<2x4x4xf32>
    %78 = arith.subf %74, %77 : vector<2x4x4xf32>
    %79 = math.exp %78 : vector<2x4x4xf32>
    %cst_70 = arith.constant dense<0.000000e+00> : vector<2x4xf32>
    %80 = vector.multi_reduction <add>, %79, %cst_70 [2] : vector<2x4x4xf32> to vector<2x4xf32>
    %81 = vector.shape_cast %80 : vector<2x4xf32> to vector<2x4x1xf32>
    %82 = tpu.reciprocal %81 {approx = true} : vector<2x4x1xf32> -> vector<2x4x1xf32>
    %83 = vector.broadcast %82 : vector<2x4x1xf32> to vector<2x4x4xf32>
    %84 = arith.mulf %79, %83 : vector<2x4x4xf32>
    "tpu.trace_start"() <{level = 10 : i32, message = "bqk,bkd->bqd"}> : () -> ()
    %cst_71 = arith.constant dense<0.000000e+00> : vector<2x4x8xf32>
    %85 = tpu.matmul %84, %71, %cst_71 {dimension_numbers = #tpu.dot_dimension_numbers<[2], [1], [1], [2], [0, 0, 0, 1, 1, 2], [0], [0]>} : vector<2x4x4xf32>, vector<2x4x8xf32>, vector<2x4x8xf32> -> vector<2x4x8xf32>
    "tpu.trace_stop"() : () -> ()
    %c0_72 = arith.constant 0 : index
    %c1_73 = arith.constant 1 : index
    %c0_74 = arith.constant 0 : index
    %c0_75 = arith.constant 0 : index
    %86 = vector.load %arg9[%c0_72, %c1_73, %c0_74, %c0_75] : memref<1x4x32x8xf32, #tpu.memory_space<vmem>>, vector<1x1x32x8xf32>
    %87 = vector.shape_cast %86 : vector<1x1x32x8xf32> to vector<32x8xf32>
    %cst_76 = arith.constant dense<0.000000e+00> : vector<2x4x32xf32>
    %88 = tpu.matmul %85, %87, %cst_76 {dimension_numbers = #tpu.dot_dimension_numbers<[2], [1], [0, 1], [0], [0, 0, 0, 1, 1, 0], [], []>} : vector<2x4x8xf32>, vector<32x8xf32>, vector<2x4x32xf32> -> vector<2x4x32xf32>
    %89 = arith.addf %47, %88 : vector<2x4x32xf32>
    %c0_77 = arith.constant 0 : index
    %c2 = arith.constant 2 : index
    %c0_78 = arith.constant 0 : index
    %c0_79 = arith.constant 0 : index
    %90 = vector.load %arg3[%c0_77, %c2, %c0_78, %c0_79] : memref<1x4x8x32xf32, #tpu.memory_space<vmem>>, vector<1x1x8x32xf32>
    %91 = vector.shape_cast %90 : vector<1x1x8x32xf32> to vector<8x32xf32>
    %cst_80 = arith.constant dense<0.000000e+00> : vector<2x4x8xf32>
    %92 = tpu.matmul %3, %91, %cst_80 {dimension_numbers = #tpu.dot_dimension_numbers<[2], [1], [0, 1], [0], [0, 0, 0, 1, 1, 0], [], []>} : vector<2x4x32xf32>, vector<8x32xf32>, vector<2x4x8xf32> -> vector<2x4x8xf32>
    %c0_81 = arith.constant 0 : index
    %c2_82 = arith.constant 2 : index
    %c0_83 = arith.constant 0 : index
    %c0_84 = arith.constant 0 : index
    %93 = vector.load %arg6[%c0_81, %c2_82, %c0_83, %c0_84] : memref<1x4x1x8xf32, #tpu.memory_space<vmem>>, vector<1x1x1x8xf32>
    %94 = vector.shape_cast %93 : vector<1x1x1x8xf32> to vector<1x8xf32>
    %95 = vector.shape_cast %94 : vector<1x8xf32> to vector<1x1x8xf32>
    %96 = vector.broadcast %95 : vector<1x1x8xf32> to vector<2x4x8xf32>
    %97 = arith.addf %92, %96 : vector<2x4x8xf32>
    %c0_85 = arith.constant 0 : index
    %c2_86 = arith.constant 2 : index
    %c0_87 = arith.constant 0 : index
    %c0_88 = arith.constant 0 : index
    %98 = vector.load %arg4[%c0_85, %c2_86, %c0_87, %c0_88] : memref<1x4x8x32xf32, #tpu.memory_space<vmem>>, vector<1x1x8x32xf32>
    %99 = vector.shape_cast %98 : vector<1x1x8x32xf32> to vector<8x32xf32>
    %cst_89 = arith.constant dense<0.000000e+00> : vector<2x4x8xf32>
    %100 = tpu.matmul %3, %99, %cst_89 {dimension_numbers = #tpu.dot_dimension_numbers<[2], [1], [0, 1], [0], [0, 0, 0, 1, 1, 0], [], []>} : vector<2x4x32xf32>, vector<8x32xf32>, vector<2x4x8xf32> -> vector<2x4x8xf32>
    %c0_90 = arith.constant 0 : index
    %c2_91 = arith.constant 2 : index
    %c0_92 = arith.constant 0 : index
    %c0_93 = arith.constant 0 : index
    %101 = vector.load %arg7[%c0_90, %c2_91, %c0_92, %c0_93] : memref<1x4x1x8xf32, #tpu.memory_space<vmem>>, vector<1x1x1x8xf32>
    %102 = vector.shape_cast %101 : vector<1x1x1x8xf32> to vector<1x8xf32>
    %103 = vector.shape_cast %102 : vector<1x8xf32> to vector<1x1x8xf32>
    %104 = vector.broadcast %103 : vector<1x1x8xf32> to vector<2x4x8xf32>
    %105 = arith.addf %100, %104 : vector<2x4x8xf32>
    %c0_94 = arith.constant 0 : index
    %c2_95 = arith.constant 2 : index
    %c0_96 = arith.constant 0 : index
    %c0_97 = arith.constant 0 : index
    %106 = vector.load %arg5[%c0_94, %c2_95, %c0_96, %c0_97] : memref<1x4x8x32xf32, #tpu.memory_space<vmem>>, vector<1x1x8x32xf32>
    %107 = vector.shape_cast %106 : vector<1x1x8x32xf32> to vector<8x32xf32>
    %cst_98 = arith.constant dense<0.000000e+00> : vector<2x4x8xf32>
    %108 = tpu.matmul %3, %107, %cst_98 {dimension_numbers = #tpu.dot_dimension_numbers<[2], [1], [0, 1], [0], [0, 0, 0, 1, 1, 0], [], []>} : vector<2x4x32xf32>, vector<8x32xf32>, vector<2x4x8xf32> -> vector<2x4x8xf32>
    %c0_99 = arith.constant 0 : index
    %c2_100 = arith.constant 2 : index
    %c0_101 = arith.constant 0 : index
    %c0_102 = arith.constant 0 : index
    %109 = vector.load %arg8[%c0_99, %c2_100, %c0_101, %c0_102] : memref<1x4x1x8xf32, #tpu.memory_space<vmem>>, vector<1x1x1x8xf32>
    %110 = vector.shape_cast %109 : vector<1x1x1x8xf32> to vector<1x8xf32>
    %111 = vector.shape_cast %110 : vector<1x8xf32> to vector<1x1x8xf32>
    %112 = vector.broadcast %111 : vector<1x1x8xf32> to vector<2x4x8xf32>
    %113 = arith.addf %108, %112 : vector<2x4x8xf32>
    "tpu.trace_start"() <{level = 10 : i32, message = "bqd,bkd->bqk"}> : () -> ()
    %cst_103 = arith.constant dense<0.000000e+00> : vector<2x4x4xf32>
    %114 = tpu.matmul %97, %105, %cst_103 {dimension_numbers = #tpu.dot_dimension_numbers<[2], [2], [1], [1], [0, 0, 0, 1, 1, 1], [0], [0]>} : vector<2x4x8xf32>, vector<2x4x8xf32>, vector<2x4x4xf32> -> vector<2x4x4xf32>
    "tpu.trace_stop"() : () -> ()
    %115 = vector.broadcast %4 : vector<2x1x4xf32> to vector<2x4x4xf32>
    %116 = arith.addf %114, %115 : vector<2x4x4xf32>
    %cst_104 = arith.constant dense<0xFF800000> : vector<2x4xf32>
    %117 = vector.multi_reduction <maximumf>, %116, %cst_104 [2] : vector<2x4x4xf32> to vector<2x4xf32>
    %118 = vector.shape_cast %117 : vector<2x4xf32> to vector<2x4x1xf32>
    %119 = vector.broadcast %118 : vector<2x4x1xf32> to vector<2x4x4xf32>
    %120 = arith.subf %116, %119 : vector<2x4x4xf32>
    %121 = math.exp %120 : vector<2x4x4xf32>
    %cst_105 = arith.constant dense<0.000000e+00> : vector<2x4xf32>
    %122 = vector.multi_reduction <add>, %121, %cst_105 [2] : vector<2x4x4xf32> to vector<2x4xf32>
    %123 = vector.shape_cast %122 : vector<2x4xf32> to vector<2x4x1xf32>
    %124 = tpu.reciprocal %123 {approx = true} : vector<2x4x1xf32> -> vector<2x4x1xf32>
    %125 = vector.broadcast %124 : vector<2x4x1xf32> to vector<2x4x4xf32>
    %126 = arith.mulf %121, %125 : vector<2x4x4xf32>
    "tpu.trace_start"() <{level = 10 : i32, message = "bqk,bkd->bqd"}> : () -> ()
    %cst_106 = arith.constant dense<0.000000e+00> : vector<2x4x8xf32>
    %127 = tpu.matmul %126, %113, %cst_106 {dimension_numbers = #tpu.dot_dimension_numbers<[2], [1], [1], [2], [0, 0, 0, 1, 1, 2], [0], [0]>} : vector<2x4x4xf32>, vector<2x4x8xf32>, vector<2x4x8xf32> -> vector<2x4x8xf32>
    "tpu.trace_stop"() : () -> ()
    %c0_107 = arith.constant 0 : index
    %c2_108 = arith.constant 2 : index
    %c0_109 = arith.constant 0 : index
    %c0_110 = arith.constant 0 : index
    %128 = vector.load %arg9[%c0_107, %c2_108, %c0_109, %c0_110] : memref<1x4x32x8xf32, #tpu.memory_space<vmem>>, vector<1x1x32x8xf32>
    %129 = vector.shape_cast %128 : vector<1x1x32x8xf32> to vector<32x8xf32>
    %cst_111 = arith.constant dense<0.000000e+00> : vector<2x4x32xf32>
    %130 = tpu.matmul %127, %129, %cst_111 {dimension_numbers = #tpu.dot_dimension_numbers<[2], [1], [0, 1], [0], [0, 0, 0, 1, 1, 0], [], []>} : vector<2x4x8xf32>, vector<32x8xf32>, vector<2x4x32xf32> -> vector<2x4x32xf32>
    %131 = arith.addf %89, %130 : vector<2x4x32xf32>
    %c0_112 = arith.constant 0 : index
    %c3 = arith.constant 3 : index
    %c0_113 = arith.constant 0 : index
    %c0_114 = arith.constant 0 : index
    %132 = vector.load %arg3[%c0_112, %c3, %c0_113, %c0_114] : memref<1x4x8x32xf32, #tpu.memory_space<vmem>>, vector<1x1x8x32xf32>
    %133 = vector.shape_cast %132 : vector<1x1x8x32xf32> to vector<8x32xf32>
    %cst_115 = arith.constant dense<0.000000e+00> : vector<2x4x8xf32>
    %134 = tpu.matmul %3, %133, %cst_115 {dimension_numbers = #tpu.dot_dimension_numbers<[2], [1], [0, 1], [0], [0, 0, 0, 1, 1, 0], [], []>} : vector<2x4x32xf32>, vector<8x32xf32>, vector<2x4x8xf32> -> vector<2x4x8xf32>
    %c0_116 = arith.constant 0 : index
    %c3_117 = arith.constant 3 : index
    %c0_118 = arith.constant 0 : index
    %c0_119 = arith.constant 0 : index
    %135 = vector.load %arg6[%c0_116, %c3_117, %c0_118, %c0_119] : memref<1x4x1x8xf32, #tpu.memory_space<vmem>>, vector<1x1x1x8xf32>
    %136 = vector.shape_cast %135 : vector<1x1x1x8xf32> to vector<1x8xf32>
    %137 = vector.shape_cast %136 : vector<1x8xf32> to vector<1x1x8xf32>
    %138 = vector.broadcast %137 : vector<1x1x8xf32> to vector<2x4x8xf32>
    %139 = arith.addf %134, %138 : vector<2x4x8xf32>
    %c0_120 = arith.constant 0 : index
    %c3_121 = arith.constant 3 : index
    %c0_122 = arith.constant 0 : index
    %c0_123 = arith.constant 0 : index
    %140 = vector.load %arg4[%c0_120, %c3_121, %c0_122, %c0_123] : memref<1x4x8x32xf32, #tpu.memory_space<vmem>>, vector<1x1x8x32xf32>
    %141 = vector.shape_cast %140 : vector<1x1x8x32xf32> to vector<8x32xf32>
    %cst_124 = arith.constant dense<0.000000e+00> : vector<2x4x8xf32>
    %142 = tpu.matmul %3, %141, %cst_124 {dimension_numbers = #tpu.dot_dimension_numbers<[2], [1], [0, 1], [0], [0, 0, 0, 1, 1, 0], [], []>} : vector<2x4x32xf32>, vector<8x32xf32>, vector<2x4x8xf32> -> vector<2x4x8xf32>
    %c0_125 = arith.constant 0 : index
    %c3_126 = arith.constant 3 : index
    %c0_127 = arith.constant 0 : index
    %c0_128 = arith.constant 0 : index
    %143 = vector.load %arg7[%c0_125, %c3_126, %c0_127, %c0_128] : memref<1x4x1x8xf32, #tpu.memory_space<vmem>>, vector<1x1x1x8xf32>
    %144 = vector.shape_cast %143 : vector<1x1x1x8xf32> to vector<1x8xf32>
    %145 = vector.shape_cast %144 : vector<1x8xf32> to vector<1x1x8xf32>
    %146 = vector.broadcast %145 : vector<1x1x8xf32> to vector<2x4x8xf32>
    %147 = arith.addf %142, %146 : vector<2x4x8xf32>
    %c0_129 = arith.constant 0 : index
    %c3_130 = arith.constant 3 : index
    %c0_131 = arith.constant 0 : index
    %c0_132 = arith.constant 0 : index
    %148 = vector.load %arg5[%c0_129, %c3_130, %c0_131, %c0_132] : memref<1x4x8x32xf32, #tpu.memory_space<vmem>>, vector<1x1x8x32xf32>
    %149 = vector.shape_cast %148 : vector<1x1x8x32xf32> to vector<8x32xf32>
    %cst_133 = arith.constant dense<0.000000e+00> : vector<2x4x8xf32>
    %150 = tpu.matmul %3, %149, %cst_133 {dimension_numbers = #tpu.dot_dimension_numbers<[2], [1], [0, 1], [0], [0, 0, 0, 1, 1, 0], [], []>} : vector<2x4x32xf32>, vector<8x32xf32>, vector<2x4x8xf32> -> vector<2x4x8xf32>
    %c0_134 = arith.constant 0 : index
    %c3_135 = arith.constant 3 : index
    %c0_136 = arith.constant 0 : index
    %c0_137 = arith.constant 0 : index
    %151 = vector.load %arg8[%c0_134, %c3_135, %c0_136, %c0_137] : memref<1x4x1x8xf32, #tpu.memory_space<vmem>>, vector<1x1x1x8xf32>
    %152 = vector.shape_cast %151 : vector<1x1x1x8xf32> to vector<1x8xf32>
    %153 = vector.shape_cast %152 : vector<1x8xf32> to vector<1x1x8xf32>
    %154 = vector.broadcast %153 : vector<1x1x8xf32> to vector<2x4x8xf32>
    %155 = arith.addf %150, %154 : vector<2x4x8xf32>
    "tpu.trace_start"() <{level = 10 : i32, message = "bqd,bkd->bqk"}> : () -> ()
    %cst_138 = arith.constant dense<0.000000e+00> : vector<2x4x4xf32>
    %156 = tpu.matmul %139, %147, %cst_138 {dimension_numbers = #tpu.dot_dimension_numbers<[2], [2], [1], [1], [0, 0, 0, 1, 1, 1], [0], [0]>} : vector<2x4x8xf32>, vector<2x4x8xf32>, vector<2x4x4xf32> -> vector<2x4x4xf32>
    "tpu.trace_stop"() : () -> ()
    %157 = vector.broadcast %4 : vector<2x1x4xf32> to vector<2x4x4xf32>
    %158 = arith.addf %156, %157 : vector<2x4x4xf32>
    %cst_139 = arith.constant dense<0xFF800000> : vector<2x4xf32>
    %159 = vector.multi_reduction <maximumf>, %158, %cst_139 [2] : vector<2x4x4xf32> to vector<2x4xf32>
    %160 = vector.shape_cast %159 : vector<2x4xf32> to vector<2x4x1xf32>
    %161 = vector.broadcast %160 : vector<2x4x1xf32> to vector<2x4x4xf32>
    %162 = arith.subf %158, %161 : vector<2x4x4xf32>
    %163 = math.exp %162 : vector<2x4x4xf32>
    %cst_140 = arith.constant dense<0.000000e+00> : vector<2x4xf32>
    %164 = vector.multi_reduction <add>, %163, %cst_140 [2] : vector<2x4x4xf32> to vector<2x4xf32>
    %165 = vector.shape_cast %164 : vector<2x4xf32> to vector<2x4x1xf32>
    %166 = tpu.reciprocal %165 {approx = true} : vector<2x4x1xf32> -> vector<2x4x1xf32>
    %167 = vector.broadcast %166 : vector<2x4x1xf32> to vector<2x4x4xf32>
    %168 = arith.mulf %163, %167 : vector<2x4x4xf32>
    "tpu.trace_start"() <{level = 10 : i32, message = "bqk,bkd->bqd"}> : () -> ()
    %cst_141 = arith.constant dense<0.000000e+00> : vector<2x4x8xf32>
    %169 = tpu.matmul %168, %155, %cst_141 {dimension_numbers = #tpu.dot_dimension_numbers<[2], [1], [1], [2], [0, 0, 0, 1, 1, 2], [0], [0]>} : vector<2x4x4xf32>, vector<2x4x8xf32>, vector<2x4x8xf32> -> vector<2x4x8xf32>
    "tpu.trace_stop"() : () -> ()
    %c0_142 = arith.constant 0 : index
    %c3_143 = arith.constant 3 : index
    %c0_144 = arith.constant 0 : index
    %c0_145 = arith.constant 0 : index
    %170 = vector.load %arg9[%c0_142, %c3_143, %c0_144, %c0_145] : memref<1x4x32x8xf32, #tpu.memory_space<vmem>>, vector<1x1x32x8xf32>
    %171 = vector.shape_cast %170 : vector<1x1x32x8xf32> to vector<32x8xf32>
    %cst_146 = arith.constant dense<0.000000e+00> : vector<2x4x32xf32>
    %172 = tpu.matmul %169, %171, %cst_146 {dimension_numbers = #tpu.dot_dimension_numbers<[2], [1], [0, 1], [0], [0, 0, 0, 1, 1, 0], [], []>} : vector<2x4x8xf32>, vector<32x8xf32>, vector<2x4x32xf32> -> vector<2x4x32xf32>
    %173 = arith.addf %131, %172 : vector<2x4x32xf32>
    %c0_147 = arith.constant 0 : index
    %c0_148 = arith.constant 0 : index
    %c0_149 = arith.constant 0 : index
    %174 = vector.load %arg10[%c0_147, %c0_148, %c0_149] : memref<1x1x32xf32, #tpu.memory_space<vmem>>, vector<1x1x32xf32>
    %175 = vector.shape_cast %174 : vector<1x1x32xf32> to vector<1x32xf32>
    %176 = vector.shape_cast %175 : vector<1x32xf32> to vector<1x1x32xf32>
    %177 = vector.broadcast %176 : vector<1x1x32xf32> to vector<2x4x32xf32>
    %178 = arith.addf %173, %177 : vector<2x4x32xf32>
    %179 = arith.addf %3, %178 : vector<2x4x32xf32>
    %c0_150 = arith.constant 0 : index
    %c0_151 = arith.constant 0 : index
    %c0_152 = arith.constant 0 : index
    %180 = vector.load %arg11[%c0_150, %c0_151, %c0_152] : memref<1x1x32xf32, #tpu.memory_space<vmem>>, vector<1x1x32xf32>
    %181 = vector.shape_cast %180 : vector<1x1x32xf32> to vector<1x32xf32>
    %c0_153 = arith.constant 0 : index
    %c0_154 = arith.constant 0 : index
    %c0_155 = arith.constant 0 : index
    %182 = vector.load %arg12[%c0_153, %c0_154, %c0_155] : memref<1x1x32xf32, #tpu.memory_space<vmem>>, vector<1x1x32xf32>
    %183 = vector.shape_cast %182 : vector<1x1x32xf32> to vector<1x32xf32>
    %cst_156 = arith.constant dense<0.000000e+00> : vector<2x4xf32>
    %184 = vector.multi_reduction <add>, %179, %cst_156 [2] : vector<2x4x32xf32> to vector<2x4xf32>
    %185 = vector.shape_cast %184 : vector<2x4xf32> to vector<2x4x1xf32>
    %cst_157 = arith.constant 3.200000e+01 : f32
    %186 = vector.broadcast %cst_157 : f32 to vector<2x4x1xf32>
    %187 = arith.divf %185, %186 : vector<2x4x1xf32>
    %188 = vector.broadcast %187 : vector<2x4x1xf32> to vector<2x4x32xf32>
    %189 = arith.subf %179, %188 : vector<2x4x32xf32>
    %190 = arith.mulf %189, %189 : vector<2x4x32xf32>
    %cst_158 = arith.constant dense<0.000000e+00> : vector<2x4xf32>
    %191 = vector.multi_reduction <add>, %190, %cst_158 [2] : vector<2x4x32xf32> to vector<2x4xf32>
    %192 = vector.shape_cast %191 : vector<2x4xf32> to vector<2x4x1xf32>
    %cst_159 = arith.constant 3.200000e+01 : f32
    %193 = vector.broadcast %cst_159 : f32 to vector<2x4x1xf32>
    %194 = arith.divf %192, %193 : vector<2x4x1xf32>
    %195 = vector.broadcast %187 : vector<2x4x1xf32> to vector<2x4x32xf32>
    %196 = arith.subf %179, %195 : vector<2x4x32xf32>
    %cst_160 = arith.constant 9.99999974E-6 : f32
    %197 = vector.broadcast %cst_160 : f32 to vector<2x4x1xf32>
    %198 = arith.addf %194, %197 : vector<2x4x1xf32>
    %199 = math.rsqrt %198 : vector<2x4x1xf32>
    %200 = vector.broadcast %199 : vector<2x4x1xf32> to vector<2x4x32xf32>
    %201 = arith.mulf %196, %200 : vector<2x4x32xf32>
    %202 = vector.shape_cast %181 : vector<1x32xf32> to vector<1x1x32xf32>
    %203 = vector.broadcast %202 : vector<1x1x32xf32> to vector<2x4x32xf32>
    %204 = arith.mulf %201, %203 : vector<2x4x32xf32>
    %205 = vector.shape_cast %183 : vector<1x32xf32> to vector<1x1x32xf32>
    %206 = vector.broadcast %205 : vector<1x1x32xf32> to vector<2x4x32xf32>
    %207 = arith.addf %204, %206 : vector<2x4x32xf32>
    %c0_161 = arith.constant 0 : index
    %c0_162 = arith.constant 0 : index
    %c0_163 = arith.constant 0 : index
    %208 = vector.load %arg13[%c0_161, %c0_162, %c0_163] : memref<1x64x32xf32, #tpu.memory_space<vmem>>, vector<1x64x32xf32>
    %209 = vector.shape_cast %208 : vector<1x64x32xf32> to vector<64x32xf32>
    %cst_164 = arith.constant dense<0.000000e+00> : vector<2x4x64xf32>
    %210 = tpu.matmul %207, %209, %cst_164 {dimension_numbers = #tpu.dot_dimension_numbers<[2], [1], [0, 1], [0], [0, 0, 0, 1, 1, 0], [], []>} : vector<2x4x32xf32>, vector<64x32xf32>, vector<2x4x64xf32> -> vector<2x4x64xf32>
    %c0_165 = arith.constant 0 : index
    %c0_166 = arith.constant 0 : index
    %c0_167 = arith.constant 0 : index
    %211 = vector.load %arg14[%c0_165, %c0_166, %c0_167] : memref<1x1x64xf32, #tpu.memory_space<vmem>>, vector<1x1x64xf32>
    %212 = vector.shape_cast %211 : vector<1x1x64xf32> to vector<1x64xf32>
    %213 = vector.shape_cast %212 : vector<1x64xf32> to vector<1x1x64xf32>
    %214 = vector.broadcast %213 : vector<1x1x64xf32> to vector<2x4x64xf32>
    %215 = arith.addf %210, %214 : vector<2x4x64xf32>
    %cst_168 = arith.constant 0.000000e+00 : f32
    %216 = vector.broadcast %cst_168 : f32 to vector<2x4x64xf32>
    %217 = arith.maximumf %215, %216 : vector<2x4x64xf32>
    %c0_169 = arith.constant 0 : index
    %c0_170 = arith.constant 0 : index
    %c0_171 = arith.constant 0 : index
    %218 = vector.load %arg15[%c0_169, %c0_170, %c0_171] : memref<1x32x64xf32, #tpu.memory_space<vmem>>, vector<1x32x64xf32>
    %219 = vector.shape_cast %218 : vector<1x32x64xf32> to vector<32x64xf32>
    %cst_172 = arith.constant dense<0.000000e+00> : vector<2x4x32xf32>
    %220 = tpu.matmul %217, %219, %cst_172 {dimension_numbers = #tpu.dot_dimension_numbers<[2], [1], [0, 1], [0], [0, 0, 0, 1, 1, 0], [], []>} : vector<2x4x64xf32>, vector<32x64xf32>, vector<2x4x32xf32> -> vector<2x4x32xf32>
    %c0_173 = arith.constant 0 : index
    %c0_174 = arith.constant 0 : index
    %c0_175 = arith.constant 0 : index
    %221 = vector.load %arg16[%c0_173, %c0_174, %c0_175] : memref<1x1x32xf32, #tpu.memory_space<vmem>>, vector<1x1x32xf32>
    %222 = vector.shape_cast %221 : vector<1x1x32xf32> to vector<1x32xf32>
    %223 = vector.shape_cast %222 : vector<1x32xf32> to vector<1x1x32xf32>
    %224 = vector.broadcast %223 : vector<1x1x32xf32> to vector<2x4x32xf32>
    %225 = arith.addf %220, %224 : vector<2x4x32xf32>
    %226 = arith.addf %207, %225 : vector<2x4x32xf32>
    %c0_176 = arith.constant 0 : index
    %c0_177 = arith.constant 0 : index
    %c0_178 = arith.constant 0 : index
    %227 = vector.load %arg17[%c0_176, %c0_177, %c0_178] : memref<1x1x32xf32, #tpu.memory_space<vmem>>, vector<1x1x32xf32>
    %228 = vector.shape_cast %227 : vector<1x1x32xf32> to vector<1x32xf32>
    %c0_179 = arith.constant 0 : index
    %c0_180 = arith.constant 0 : index
    %c0_181 = arith.constant 0 : index
    %229 = vector.load %arg18[%c0_179, %c0_180, %c0_181] : memref<1x1x32xf32, #tpu.memory_space<vmem>>, vector<1x1x32xf32>
    %230 = vector.shape_cast %229 : vector<1x1x32xf32> to vector<1x32xf32>
    %cst_182 = arith.constant dense<0.000000e+00> : vector<2x4xf32>
    %231 = vector.multi_reduction <add>, %226, %cst_182 [2] : vector<2x4x32xf32> to vector<2x4xf32>
    %232 = vector.shape_cast %231 : vector<2x4xf32> to vector<2x4x1xf32>
    %cst_183 = arith.constant 3.200000e+01 : f32
    %233 = vector.broadcast %cst_183 : f32 to vector<2x4x1xf32>
    %234 = arith.divf %232, %233 : vector<2x4x1xf32>
    %235 = vector.broadcast %234 : vector<2x4x1xf32> to vector<2x4x32xf32>
    %236 = arith.subf %226, %235 : vector<2x4x32xf32>
    %237 = arith.mulf %236, %236 : vector<2x4x32xf32>
    %cst_184 = arith.constant dense<0.000000e+00> : vector<2x4xf32>
    %238 = vector.multi_reduction <add>, %237, %cst_184 [2] : vector<2x4x32xf32> to vector<2x4xf32>
    %239 = vector.shape_cast %238 : vector<2x4xf32> to vector<2x4x1xf32>
    %cst_185 = arith.constant 3.200000e+01 : f32
    %240 = vector.broadcast %cst_185 : f32 to vector<2x4x1xf32>
    %241 = arith.divf %239, %240 : vector<2x4x1xf32>
    %242 = vector.broadcast %234 : vector<2x4x1xf32> to vector<2x4x32xf32>
    %243 = arith.subf %226, %242 : vector<2x4x32xf32>
    %cst_186 = arith.constant 9.99999974E-6 : f32
    %244 = vector.broadcast %cst_186 : f32 to vector<2x4x1xf32>
    %245 = arith.addf %241, %244 : vector<2x4x1xf32>
    %246 = math.rsqrt %245 : vector<2x4x1xf32>
    %247 = vector.broadcast %246 : vector<2x4x1xf32> to vector<2x4x32xf32>
    %248 = arith.mulf %243, %247 : vector<2x4x32xf32>
    %249 = vector.shape_cast %228 : vector<1x32xf32> to vector<1x1x32xf32>
    %250 = vector.broadcast %249 : vector<1x1x32xf32> to vector<2x4x32xf32>
    %251 = arith.mulf %248, %250 : vector<2x4x32xf32>
    %252 = vector.shape_cast %230 : vector<1x32xf32> to vector<1x1x32xf32>
    %253 = vector.broadcast %252 : vector<1x1x32xf32> to vector<2x4x32xf32>
    %254 = arith.addf %251, %253 : vector<2x4x32xf32>
    %c0_187 = arith.constant 0 : index
    %c0_188 = arith.constant 0 : index
    %c0_189 = arith.constant 0 : index
    %255 = vector.load %arg28[%c0_187, %c0_188, %c0_189] : memref<2x4x32xf32, #tpu.memory_space<vmem>>, vector<2x4x32xf32>
    tpu.vector_store %arg28[%c0_187, %c0_188, %c0_189], %254 {strides = array<i32>} : memref<2x4x32xf32, #tpu.memory_space<vmem>>, vector<2x4x32xf32>,
    %c1_i32 = arith.constant 1 : i32
    %256 = arith.cmpi eq, %arg0, %c1_i32 : i32
    %257 = arith.extui %256 : i1 to i32
    %c0_i32_190 = arith.constant 0 : i32
    %258 = arith.cmpi ne, %257, %c0_i32_190 : i32
    scf.if %258 {
      %c0_191 = arith.constant 0 : index
      %c0_192 = arith.constant 0 : index
      %259 = vector.load %arg19[%c0_191, %c0_192] : memref<20x32xf32, #tpu.memory_space<vmem>>, vector<20x32xf32>
      %cst_193 = arith.constant dense<0.000000e+00> : vector<2x4x20xf32>
      %260 = tpu.matmul %254, %259, %cst_193 {dimension_numbers = #tpu.dot_dimension_numbers<[2], [1], [0, 1], [0], [0, 0, 0, 1, 1, 0], [], []>} : vector<2x4x32xf32>, vector<20x32xf32>, vector<2x4x20xf32> -> vector<2x4x20xf32>
      %c0_194 = arith.constant 0 : index
      %c0_195 = arith.constant 0 : index
      %261 = vector.load %arg20[%c0_194, %c0_195] : memref<1x20xf32, #tpu.memory_space<vmem>>, vector<1x20xf32>
      %262 = vector.shape_cast %261 : vector<1x20xf32> to vector<1x1x20xf32>
      %263 = vector.broadcast %262 : vector<1x1x20xf32> to vector<2x4x20xf32>
      %264 = arith.addf %260, %263 : vector<2x4x20xf32>
      %c0_196 = arith.constant 0 : index
      %c0_197 = arith.constant 0 : index
      %c0_198 = arith.constant 0 : index
      %265 = vector.load %arg25[%c0_196, %c0_197, %c0_198] : memref<2x4x20xf32, #tpu.memory_space<vmem>>, vector<2x4x20xf32>
      tpu.vector_store %arg25[%c0_196, %c0_197, %c0_198], %264 {strides = array<i32>} : memref<2x4x20xf32, #tpu.memory_space<vmem>>, vector<2x4x20xf32>,
      %c0_199 = arith.constant 0 : index
      %c0_200 = arith.constant 0 : index
      %266 = vector.load %arg21[%c0_199, %c0_200] : memref<10x32xf32, #tpu.memory_space<vmem>>, vector<10x32xf32>
      %cst_201 = arith.constant dense<0.000000e+00> : vector<2x4x10xf32>
      %267 = tpu.matmul %254, %266, %cst_201 {dimension_numbers = #tpu.dot_dimension_numbers<[2], [1], [0, 1], [0], [0, 0, 0, 1, 1, 0], [], []>} : vector<2x4x32xf32>, vector<10x32xf32>, vector<2x4x10xf32> -> vector<2x4x10xf32>
      %c0_202 = arith.constant 0 : index
      %c0_203 = arith.constant 0 : index
      %268 = vector.load %arg22[%c0_202, %c0_203] : memref<1x10xf32, #tpu.memory_space<vmem>>, vector<1x10xf32>
      %269 = vector.shape_cast %268 : vector<1x10xf32> to vector<1x1x10xf32>
      %270 = vector.broadcast %269 : vector<1x1x10xf32> to vector<2x4x10xf32>
      %271 = arith.addf %267, %270 : vector<2x4x10xf32>
      %c0_204 = arith.constant 0 : index
      %c0_205 = arith.constant 0 : index
      %c0_206 = arith.constant 0 : index
      %272 = vector.load %arg26[%c0_204, %c0_205, %c0_206] : memref<2x4x10xf32, #tpu.memory_space<vmem>>, vector<2x4x10xf32>
      tpu.vector_store %arg26[%c0_204, %c0_205, %c0_206], %271 {strides = array<i32>} : memref<2x4x10xf32, #tpu.memory_space<vmem>>, vector<2x4x10xf32>,
      %c0_207 = arith.constant 0 : index
      %c0_208 = arith.constant 0 : index
      %273 = vector.load %arg23[%c0_207, %c0_208] : memref<10x32xf32, #tpu.memory_space<vmem>>, vector<10x32xf32>
      %cst_209 = arith.constant dense<0.000000e+00> : vector<2x4x10xf32>
      %274 = tpu.matmul %254, %273, %cst_209 {dimension_numbers = #tpu.dot_dimension_numbers<[2], [1], [0, 1], [0], [0, 0, 0, 1, 1, 0], [], []>} : vector<2x4x32xf32>, vector<10x32xf32>, vector<2x4x10xf32> -> vector<2x4x10xf32>
      %c0_210 = arith.constant 0 : index
      %c0_211 = arith.constant 0 : index
      %275 = vector.load %arg24[%c0_210, %c0_211] : memref<1x10xf32, #tpu.memory_space<vmem>>, vector<1x10xf32>
      %276 = vector.shape_cast %275 : vector<1x10xf32> to vector<1x1x10xf32>
      %277 = vector.broadcast %276 : vector<1x1x10xf32> to vector<2x4x10xf32>
      %278 = arith.addf %274, %277 : vector<2x4x10xf32>
      %c0_212 = arith.constant 0 : index
      %c0_213 = arith.constant 0 : index
      %c0_214 = arith.constant 0 : index
      %279 = vector.load %arg27[%c0_212, %c0_213, %c0_214] : memref<2x4x10xf32, #tpu.memory_space<vmem>>, vector<2x4x10xf32>
      tpu.vector_store %arg27[%c0_212, %c0_213, %c0_214], %278 {strides = array<i32>} : memref<2x4x10xf32, #tpu.memory_space<vmem>>, vector<2x4x10xf32>,
    } else {
    }
    return
  }
  func.func @transform_0(%arg0: i32) -> (i32, i32, i32) {
    %c0_i32 = arith.constant 0 : i32
    %c0_i32_0 = arith.constant 0 : i32
    %c0_i32_1 = arith.constant 0 : i32
    %c0_i32_2 = arith.constant 0 : i32
    return %c0_i32, %c0_i32_0, %c0_i32_1 : i32, i32, i32
  }
  func.func @transform_1(%arg0: i32) -> (i32, i32, i32) {
    %c0_i32 = arith.constant 0 : i32
    %c0_i32_0 = arith.constant 0 : i32
    %c0_i32_1 = arith.constant 0 : i32
    %c0_i32_2 = arith.constant 0 : i32
    return %c0_i32, %c0_i32_0, %c0_i32_1 : i32, i32, i32
  }
  func.func @transform_2(%arg0: i32) -> (i32, i32, i32, i32) {
    %c0_i32 = arith.constant 0 : i32
    %c0_i32_0 = arith.constant 0 : i32
    %c0_i32_1 = arith.constant 0 : i32
    %c0_i32_2 = arith.constant 0 : i32
    return %arg0, %c0_i32, %c0_i32_0, %c0_i32_1 : i32, i32, i32, i32
  }
  func.func @transform_3(%arg0: i32) -> (i32, i32, i32, i32) {
    %c0_i32 = arith.constant 0 : i32
    %c0_i32_0 = arith.constant 0 : i32
    %c0_i32_1 = arith.constant 0 : i32
    %c0_i32_2 = arith.constant 0 : i32
    return %arg0, %c0_i32, %c0_i32_0, %c0_i32_1 : i32, i32, i32, i32
  }
  func.func @transform_4(%arg0: i32) -> (i32, i32, i32, i32) {
    %c0_i32 = arith.constant 0 : i32
    %c0_i32_0 = arith.constant 0 : i32
    %c0_i32_1 = arith.constant 0 : i32
    %c0_i32_2 = arith.constant 0 : i32
    return %arg0, %c0_i32, %c0_i32_0, %c0_i32_1 : i32, i32, i32, i32
  }
  func.func @transform_5(%arg0: i32) -> (i32, i32, i32, i32) {
    %c0_i32 = arith.constant 0 : i32
    %c0_i32_0 = arith.constant 0 : i32
    %c0_i32_1 = arith.constant 0 : i32
    %c0_i32_2 = arith.constant 0 : i32
    return %arg0, %c0_i32, %c0_i32_0, %c0_i32_1 : i32, i32, i32, i32
  }
  func.func @transform_6(%arg0: i32) -> (i32, i32, i32, i32) {
    %c0_i32 = arith.constant 0 : i32
    %c0_i32_0 = arith.constant 0 : i32
    %c0_i32_1 = arith.constant 0 : i32
    %c0_i32_2 = arith.constant 0 : i32
    return %arg0, %c0_i32, %c0_i32_0, %c0_i32_1 : i32, i32, i32, i32
  }
  func.func @transform_7(%arg0: i32) -> (i32, i32, i32, i32) {
    %c0_i32 = arith.constant 0 : i32
    %c0_i32_0 = arith.constant 0 : i32
    %c0_i32_1 = arith.constant 0 : i32
    %c0_i32_2 = arith.constant 0 : i32
    return %arg0, %c0_i32, %c0_i32_0, %c0_i32_1 : i32, i32, i32, i32
  }
  func.func @transform_8(%arg0: i32) -> (i32, i32, i32, i32) {
    %c0_i32 = arith.constant 0 : i32
    %c0_i32_0 = arith.constant 0 : i32
    %c0_i32_1 = arith.constant 0 : i32
    %c0_i32_2 = arith.constant 0 : i32
    return %arg0, %c0_i32, %c0_i32_0, %c0_i32_1 : i32, i32, i32, i32
  }
  func.func @transform_9(%arg0: i32) -> (i32, i32, i32) {
    %c0_i32 = arith.constant 0 : i32
    %c0_i32_0 = arith.constant 0 : i32
    %c0_i32_1 = arith.constant 0 : i32
    return %arg0, %c0_i32, %c0_i32_0 : i32, i32, i32
  }
  func.func @transform_10(%arg0: i32) -> (i32, i32, i32) {
    %c0_i32 = arith.constant 0 : i32
    %c0_i32_0 = arith.constant 0 : i32
    %c0_i32_1 = arith.constant 0 : i32
    return %arg0, %c0_i32, %c0_i32_0 : i32, i32, i32
  }
  func.func @transform_11(%arg0: i32) -> (i32, i32, i32) {
    %c0_i32 = arith.constant 0 : i32
    %c0_i32_0 = arith.constant 0 : i32
    %c0_i32_1 = arith.constant 0 : i32
    return %arg0, %c0_i32, %c0_i32_0 : i32, i32, i32
  }
  func.func @transform_12(%arg0: i32) -> (i32, i32, i32) {
    %c0_i32 = arith.constant 0 : i32
    %c0_i32_0 = arith.constant 0 : i32
    %c0_i32_1 = arith.constant 0 : i32
    return %arg0, %c0_i32, %c0_i32_0 : i32, i32, i32
  }
  func.func @transform_13(%arg0: i32) -> (i32, i32, i32) {
    %c0_i32 = arith.constant 0 : i32
    %c0_i32_0 = arith.constant 0 : i32
    %c0_i32_1 = arith.constant 0 : i32
    return %arg0, %c0_i32, %c0_i32_0 : i32, i32, i32
  }
  func.func @transform_14(%arg0: i32) -> (i32, i32, i32) {
    %c0_i32 = arith.constant 0 : i32
    %c0_i32_0 = arith.constant 0 : i32
    %c0_i32_1 = arith.constant 0 : i32
    return %arg0, %c0_i32, %c0_i32_0 : i32, i32, i32
  }
  func.func @transform_15(%arg0: i32) -> (i32, i32, i32) {
    %c0_i32 = arith.constant 0 : i32
    %c0_i32_0 = arith.constant 0 : i32
    %c0_i32_1 = arith.constant 0 : i32
    return %arg0, %c0_i32, %c0_i32_0 : i32, i32, i32
  }
  func.func @transform_16(%arg0: i32) -> (i32, i32, i32) {
    %c0_i32 = arith.constant 0 : i32
    %c0_i32_0 = arith.constant 0 : i32
    %c0_i32_1 = arith.constant 0 : i32
    return %arg0, %c0_i32, %c0_i32_0 : i32, i32, i32
  }
  func.func @transform_17(%arg0: i32) -> (i32, i32, i32) {
    %c0_i32 = arith.constant 0 : i32
    %c0_i32_0 = arith.constant 0 : i32
    %c0_i32_1 = arith.constant 0 : i32
    return %arg0, %c0_i32, %c0_i32_0 : i32, i32, i32
  }
  func.func @transform_18(%arg0: i32) -> (i32, i32) {
    %c0_i32 = arith.constant 0 : i32
    %c0_i32_0 = arith.constant 0 : i32
    %c0_i32_1 = arith.constant 0 : i32
    return %c0_i32, %c0_i32_0 : i32, i32
  }
  func.func @transform_19(%arg0: i32) -> (i32, i32) {
    %c0_i32 = arith.constant 0 : i32
    %c0_i32_0 = arith.constant 0 : i32
    %c0_i32_1 = arith.constant 0 : i32
    return %c0_i32, %c0_i32_0 : i32, i32
  }
  func.func @transform_20(%arg0: i32) -> (i32, i32) {
    %c0_i32 = arith.constant 0 : i32
    %c0_i32_0 = arith.constant 0 : i32
    %c0_i32_1 = arith.constant 0 : i32
    return %c0_i32, %c0_i32_0 : i32, i32
  }
  func.func @transform_21(%arg0: i32) -> (i32, i32) {
    %c0_i32 = arith.constant 0 : i32
    %c0_i32_0 = arith.constant 0 : i32
    %c0_i32_1 = arith.constant 0 : i32
    return %c0_i32, %c0_i32_0 : i32, i32
  }
  func.func @transform_22(%arg0: i32) -> (i32, i32) {
    %c0_i32 = arith.constant 0 : i32
    %c0_i32_0 = arith.constant 0 : i32
    %c0_i32_1 = arith.constant 0 : i32
    return %c0_i32, %c0_i32_0 : i32, i32
  }
  func.func @transform_23(%arg0: i32) -> (i32, i32) {
    %c0_i32 = arith.constant 0 : i32
    %c0_i32_0 = arith.constant 0 : i32
    %c0_i32_1 = arith.constant 0 : i32
    return %c0_i32, %c0_i32_0 : i32, i32
  }
  func.func @transform_24(%arg0: i32) -> (i32, i32, i32) {
    %c0_i32 = arith.constant 0 : i32
    %c0_i32_0 = arith.constant 0 : i32
    %c0_i32_1 = arith.constant 0 : i32
    %c0_i32_2 = arith.constant 0 : i32
    return %c0_i32, %c0_i32_0, %c0_i32_1 : i32, i32, i32
  }
  func.func @transform_25(%arg0: i32) -> (i32, i32, i32) {
    %c0_i32 = arith.constant 0 : i32
    %c0_i32_0 = arith.constant 0 : i32
    %c0_i32_1 = arith.constant 0 : i32
    %c0_i32_2 = arith.constant 0 : i32
    return %c0_i32, %c0_i32_0, %c0_i32_1 : i32, i32, i32
  }
  func.func @transform_26(%arg0: i32) -> (i32, i32, i32) {
    %c0_i32 = arith.constant 0 : i32
    %c0_i32_0 = arith.constant 0 : i32
    %c0_i32_1 = arith.constant 0 : i32
    %c0_i32_2 = arith.constant 0 : i32
    return %c0_i32, %c0_i32_0, %c0_i32_1 : i32, i32, i32
  }
}

</mosaic_0001>

<bundles_post_ra>
// kernel: mul.27
= control target key start
LH: loop header
LB: loop body
LE: loop exit
PB: predicated region body
PF: predicated region fallthrough
CT: control target
= control target key end

     0   :  { %s56_s0 = inlined_call_operand.vmem [shape: f32[2,1,32], index: 0, kind: input, shape index: {}]   ;;  %s57_s1 = inlined_call_operand.vmem [shape: f32[2,1,32], index: 1, kind: input, shape index: {}]   ;;  %s58_s2 = inlined_call_operand.vmem [shape: f32[2,1,32], index: 2, kind: output, shape index: {}]  }
   0x1   :  { %v3_v0 = vld [vmem:[%s56_s0] sm:$0x1]  ;;  %v20_v2 = vld [vmem:[%s56_s0 + $0x1] sm:$0x1] }
   0x2   :  { %v4_v1 = vld [vmem:[%s57_s1] sm:$0x1]  ;;  %v21_v4 = vld [vmem:[%s57_s1 + $0x1] sm:$0x1] }
   0x3   :  { %v7_v3 = vmul.f32 %v4_v1, %v3_v0  ;;  %v16_v5 = vmul.f32 %v21_v4, %v20_v2 }
   0x5   :  { %9 = vst [vmem:[%s58_s2] sm:$0x1] %v7_v3  ;;  %22 = vst [vmem:[%s58_s2 + $0x1] sm:$0x1] %v16_v5 }

// kernel: hynt_forward.3
= control target key start
LH: loop header
LB: loop body
LE: loop exit
PB: predicated region body
PF: predicated region fallthrough
CT: control target
= control target key end

     0   :  { %s6146_s0 = inlined_call_operand.vmem [shape: f32[2,4,32], index: 0, kind: input, shape index: {}]   ;;  %s6147_s1 = inlined_call_operand.vmem [shape: f32[2,1,4], index: 1, kind: input, shape index: {}]   ;;  %s6148_s2 = inlined_call_operand.vmem [shape: f32[2,4,8,32], index: 2, kind: input, shape index: {}]   ;;  %s6149_s3 = inlined_call_operand.vmem [shape: f32[2,4,8,32], index: 3, kind: input, shape index: {}]   ;;  %s6150_s4 = inlined_call_operand.vmem [shape: f32[2,4,8,32], index: 4, kind: input, shape index: {}]   ;;  %s6151_s5 = inlined_call_operand.vmem [shape: f32[2,4,1,8], index: 5, kind: input, shape index: {}]   ;;  %s6152_s6 = inlined_call_operand.vmem [shape: f32[2,4,1,8], index: 6, kind: input, shape index: {}]   ;;  %s6153_s7 = inlined_call_operand.vmem [shape: f32[2,4,1,8], index: 7, kind: input, shape index: {}]   ;;  %s6154_s8 = inlined_call_operand.vmem [shape: f32[2,4,32,8], index: 8, kind: input, shape index: {}]   ;;  %s6155_s9 = inlined_call_operand.vmem [shape: f32[2,1,32], index: 9, kind: input, shape index: {}]   ;;  %s6156_s10 = inlined_call_operand.vmem [shape: f32[2,1,32], index: 10, kind: input, shape index: {}]   ;;  %s6157_s11 = inlined_call_operand.vmem [shape: f32[2,1,32], index: 11, kind: input, shape index: {}]   ;;  %s6158_s12 = inlined_call_operand.vmem [shape: f32[2,64,32], index: 12, kind: input, shape index: {}]   ;;  %s6159_s13 = inlined_call_operand.vmem [shape: f32[2,1,64], index: 13, kind: input, shape index: {}]   ;;  %s6160_s14 = inlined_call_operand.vmem [shape: f32[2,32,64], index: 14, kind: input, shape index: {}]   ;;  %s6161_s15 = inlined_call_operand.vmem [shape: f32[2,1,32], index: 15, kind: input, shape index: {}]   ;;  %s6162_s16 = inlined_call_operand.vmem [shape: f32[2,1,32], index: 16, kind: input, shape index: {}]   ;;  %s6163_s17 = inlined_call_operand.vmem [shape: f32[2,1,32], index: 17, kind: input, shape index: {}]   ;;  %s6164_s18 = inlined_call_operand.vmem [shape: f32[20,32], index: 18, kind: input, shape index: {}]   ;;  %s6165_s19 = inlined_call_operand.vmem [shape: f32[1,20], index: 19, kind: input, shape index: {}]   ;;  %s6166_s20 = inlined_call_operand.vmem [shape: f32[10,32], index: 20, kind: input, shape index: {}]   ;;  %s6167_s21 = inlined_call_operand.vmem [shape: f32[1,10], index: 21, kind: input, shape index: {}]   ;;  %s6168_s22 = inlined_call_operand.vmem [shape: f32[10,32], index: 22, kind: input, shape index: {}]   ;;  %s6169_s23 = inlined_call_operand.vmem [shape: f32[1,10], index: 23, kind: input, shape index: {}]   ;;  %s6170_s24 = inlined_call_operand.hbm [shape: f32[2,4,20], index: 24, kind: output, shape index: {0}]   ;;  %s6171_s25 = inlined_call_operand.hbm [shape: f32[2,4,10], index: 25, kind: output, shape index: {1}]   ;;  %s6172_s26 = inlined_call_operand.hbm [shape: f32[2,4,10], index: 26, kind: output, shape index: {2}]  }
   0x1   :  { %6187 = sst [smem:[#allocation16_spill]] %s6146_s0 }
   0x2   :  { %6188 = sst [smem:[#allocation17_spill]] %s6147_s1 }
   0x3   :  { %6189 = sst [smem:[#allocation18_spill]] %s6148_s2 }
   0x4   :  { %6190 = sst [smem:[#allocation19_spill]] %s6149_s3 }
   0x5   :  { %6191 = sst [smem:[#allocation20_spill]] %s6150_s4 }
   0x6   :  { %6192 = sst [smem:[#allocation21_spill]] %s6151_s5 }
   0x7   :  { %6193 = sst [smem:[#allocation22_spill]] %s6152_s6 }
   0x8   :  { %6194 = sst [smem:[#allocation23_spill]] %s6153_s7 }
   0x9   :  { %6195 = sst [smem:[#allocation24_spill]] %s6154_s8 }
   0xa   :  { %6196 = sst [smem:[#allocation25_spill]] %s6155_s9 }
   0xb   :  { %6197 = sst [smem:[#allocation26_spill]] %s6156_s10 }
   0xc   :  { %6198 = sst [smem:[#allocation27_spill]] %s6164_s18 }
   0xd   :  { %6199 = sst [smem:[#allocation28_spill]] %s6165_s19 }
   0xe   :  { %6200 = sst [smem:[#allocation29_spill]] %s6166_s20 }
   0xf   :  { %6201 = sst [smem:[#allocation30_spill]] %s6167_s21 }
  0x10   :  { %6202 = sst [smem:[#allocation31_spill]] %s6168_s22 }
  0x11   :  { %6203 = sst [smem:[#allocation32_spill]] %s6169_s23 }
  0x12   :  { %6204 = sst [smem:[#allocation33_spill]] %s6170_s24 }
  0x13   :  { %6205 = sst [smem:[#allocation34_spill]] %s6171_s25 }
  0x14   :  { %6206 = sst [smem:[#allocation35_spill]] %s6172_s26 }
  0x15   :  { %32 = vsyncpa [#allocation4], 0 }
  0x16   :  { %33 = vsyncpa [#allocation6], 0  ;;  %s5528_s27 = smov 0  }
  0x17 LB: > { %6207 = sst [smem:[#allocation10_spill]] %s5380_s27  ;;  %s5534_s3 = sadd.s32 4294967295, %s5380_s27   ;;  %s5380_s27 = sphi %s5528_s27, %s39_s27  }
  0x18   : > { %p4617_p0 = scmp.ge.s32.totalorder %s5380_s27, 1  ;;  %p837_p1 = scmp.lt.s32.totalorder %s5380_s27, 3 }
  0x1a   : > { %p838_p2 = pnand %p4617_p0, %p837_p1 }
  0x1c   : > { %841 = sbr.rel (%p838_p2) target bundleno = 4891 (0x131b), region = 116 }
  0x23   : > { %p960_p3 = scmp.lt.s32.totalorder %s5534_s3, 1  ;;  %s6208_s0 = sld [smem:[#allocation18_spill]] }
  0x24   : > { %s6210_s5 = sld [smem:[#allocation19_spill]]  ;;  %s6211_s27 = sld [smem:[#allocation20_spill]] }
  0x25   : > { %s5540_s7 = scalar_select %p960_p3, %s5534_s3, 1 }
  0x26   : > { %s6213_s23 = sld [smem:[#allocation21_spill]]  ;;  %s6220_s24 = sld [smem:[#allocation24_spill]] }
  0x27   : > { %s4797_s28 = sshll.u32 %s5540_s7, 5  ;;  %s4624_s8 = sshll.u32 %s5540_s7, 2 }
  0x28   : > { %s4800_s18 = sshll.u32 %s5540_s7, 7  ;;  %s6221_s4 = sld [smem:[#allocation26_spill]] }
  0x29   : > { %s5547_s9 = scalar_lea.vmem %s6208_s0, %s4797_s28  ;;  %s6215_s0 = sld [smem:[#allocation22_spill]] }
  0x2a   : > { %6209 = sst [smem:[#allocation11_spill]] %s5547_s9  ;;  %s5552_s10 = scalar_lea.vmem %s6210_s5, %s4797_s28 }
  0x2b   : > { %s5557_s26 = scalar_lea.vmem %s6211_s27, %s4797_s28  ;;  %s6217_s5 = sld [smem:[#allocation23_spill]] }
  0x2c   : > { %6212 = sst [smem:[#allocation12_spill]] %s5557_s26  ;;  %s5562_s19 = scalar_lea.vmem %s6213_s23, %s4624_s8 }
  0x2d   : > { %6214 = sst [smem:[#allocation13_spill]] %s5562_s19  ;;  %s6219_s27 = sld [smem:[#allocation25_spill]] }
  0x2e   : > { %s5582_s23 = scalar_lea.vmem %s6220_s24, %s4800_s18  ;;  %s997_s29 = scalar_lea.vmem %s6221_s4, %s5540_s7 }
  0x2f   : > { %s5567_s21 = scalar_lea.vmem %s6215_s0, %s4624_s8  ;;  %s1000_s30 = scalar_lea.vmem %s6157_s11, %s5540_s7 }
  0x30   : > { %6216 = sst [smem:[#allocation14_spill]] %s5567_s21  ;;  %s1008_s26 = scalar_lea.vmem %s6159_s13, %s5540_s7 }
  0x31   : > { %s5572_s22 = scalar_lea.vmem %s6217_s5, %s4624_s8  ;;  %s4801_s8 = sshll.u32 %s5540_s7, 6 }
  0x32   : > { %6218 = sst [smem:[#allocation15_spill]] %s5572_s22  ;;  %s5596_s22 = scalar_lea.vmem %s6158_s12, %s4801_s8 }
  0x33   : > { %s994_s20 = scalar_lea.vmem %s6219_s27, %s5540_s7  ;;  %s5605_s27 = scalar_lea.vmem %s6160_s14, %s4797_s28 }
  0x34   : > { %s1016_s21 = scalar_lea.vmem %s6161_s15, %s5540_s7  ;;  %s1019_s0 = scalar_lea.vmem %s6162_s16, %s5540_s7 }
  0x35   : > { %s1022_s5 = scalar_lea.vmem %s6163_s17, %s5540_s7  ;;  %p4633_p4 = scmp.ne.s32.totalorder %s5534_s3, 0 }
  0x36   : > { %s6222_s18 = sld [smem:[#allocation16_spill]] (!%p4633_p4)  ;;  %vm1029_vm0 = vcmask (!%p4633_p4), 257024  }
  0x37   : > { %1026 = sbr.rel (%p4633_p4) target bundleno = 62 (0x3e), region = 120 }
  0x3c   : > { %v1027_v0 = vld [vmem:[%s6222_s18] sm:$0xf] (!%p4633_p4)  ;;  %v1028_v1 = vld [vmem:[%s6222_s18 + $0x4] sm:$0xf] (!%p4633_p4) }
  0x3d   : > { %1030 = vst.msk [vmem:[#allocation2] sm:$0xf] (!%p4633_p4), %vm1029_vm0, %v1027_v0  ;;  %1031 = vst.msk [vmem:[#allocation2 + $0x4] sm:$0xf] (!%p4633_p4), %vm1029_vm0, %v1028_v1 }
  0x3e PF: > { %vm1048_vm1 = vcmask 261120   ;;  %s6223_s19 = sld [smem:[#allocation11_spill]]  ;;  %v1126_v2 = vld [vmem:[%s5552_s10] sm:$0xff]  ;;  %v5382_v4 = vmov 0.0   ;;  %s6224_s24 = sld [smem:[#allocation12_spill]]  ;;  %vm5383_vm2 = vmmov 0  }
  0x3f   : > { %4908 = vmatprep.subr.mxu1 %v5382_v4  ;;  %4903 = vmatprep.subr.mxu0 %v5382_v4  ;;  %s6225_s25 = sld [smem:[#allocation14_spill]]  ;;  %s6226_s4 = sld [smem:[#allocation13_spill]]  ;;  %vm1306_vm3 = vcmask 64512   ;;  %vm1482_vm4 = vcmask 1043456   ;;  %vm1455_vm5 = vcmask 27648   ;;  %vm1478_vm6 = vcmask 31744   ;;  %vm5950_vm9 = vmpackc.low %vm1048_vm1, %vm1048_vm1 }
  0x40   : > { %4909 = vmatpush3.xpose.msk.msra.mxu1 %vm1048_vm1, %v1126_v2  ;;  %4910 = vmatprep.mubr.msk.f32.mxu1 %vm5383_vm2, %v5382_v4  ;;  %s6227_s2 = sld [smem:[#allocation15_spill]]  ;;  %v4658_v51 = vld [vmem:[%s5552_s10 + $0x8] sm:$0xff]  ;;  %vm5761_vm7 = vmpackc.low %vm1306_vm3, %vm1306_vm3  ;;  %vm3757_vm8 = vcmask 257024   ;;  %vm3936_vm10 = vcmask 523264   ;;  %p4775_p5 = scmp.ne.s32.totalorder %s5534_s3, 1 }
  0x41   : > { %4905 = vmatprep.mubr.msk.f32.mxu0 %vm5383_vm2, %v5382_v4  ;;  %4918 = vmatprep.subr.mxu1 %v5382_v4  ;;  %s6228_s1 = sld [smem:[#allocation17_spill]]  ;;  %vm5977_vm11 = vmpackc.low %vm3936_vm10, %vm3936_vm10  ;;  %s6237_s9 = sld [smem:[#allocation29_spill]] (!%p4775_p5)  ;;  %vm5386_vm12 = vmmov (!%p4775_p5), 0   ;;  %vm4266_vm13 = vcmask (!%p4775_p5), 76800   ;;  %vm4174_vm14 = vcmask (!%p4775_p5), 158720  }
  0x42   : > { %s6240_s8 = sld [smem:[#allocation30_spill]] (!%p4775_p5)  ;;  %s6241_s28 = sld [smem:[#allocation28_spill]] (!%p4775_p5) }
  0x43   : > { %s6242_s7 = sld [smem:[#allocation32_spill]] (!%p4775_p5) }
  0x44   : > { %v1036_v3 = vld [vmem:[%s6223_s19] sm:$0xff]  ;;  %v4653_v54 = vld [vmem:[%s6223_s19 + $0x8] sm:$0xff] }
  0x45   : > { %v5630_v5 = vld [vmem:[#allocation2] sm:$0xf]  ;;  %v5632_v6 = vld [vmem:[#allocation2 + $0x4] sm:$0xf]  ;;  %4904 = vmatpush3.xpose.msk.msra.mxu0 %vm1048_vm1, %v1036_v3  ;;  %v4663_v55 = vld [vmem:[%s6224_s24 + $0x8] sm:$0xff] }
  0x46   : > { %v5638_v7 = vcombine.low %v5630_v5, %v5632_v6  ;;  %4913 = vmatprep.subr.mxu0 %v5382_v4  ;;  %v1210_v8 = vld [vmem:[%s6224_s24] sm:$0xff] }
  0x47   : > { %v4637_v9 = vld [vmem:[%s6225_s25] ss:$0 sm:$0xff]  ;;  %v5681_v28 = vld [vmem:[%s6228_s1 + $0x1] ss:$0 sm:$0xff] }
  0x48   : > { %4911 = vmatmul.mubr.msk.f32.vlgmr.msra.gmra.mrb[0].mxu1 %vm1048_vm1, %v5638_v7  ;;  %4906 = vmatmul.mubr.msk.f32.vlgmr.msra.gmra.mrb[0].mxu0 %vm1048_vm1, %v5638_v7  ;;  %v4634_v10 = vld [vmem:[%s6226_s4] ss:$0 sm:$0xff]  ;;  %v1133_v11 = vcombine.low %v4637_v9, %v4637_v9  ;;  %v4660_v56 = vld [vmem:[%s6225_s25 + $0x1] ss:$0 sm:$0xff] }
  0x49   : > { %4915 = vmatprep.mubr.msk.f32.mxu0 %vm5383_vm2, %v5382_v4  ;;  %4920 = vmatprep.mubr.msk.f32.mxu1 %vm5383_vm2, %v5382_v4  ;;  %v1046_v12 = vcombine.low %v4634_v10, %v4634_v10  ;;  %v4640_v21 = vld [vmem:[%s6227_s2] ss:$0 sm:$0xff]  ;;  %v1729_v59 = vcombine.low %v4660_v56, %v4660_v56  ;;  %v4655_v60 = vld [vmem:[%s6226_s4 + $0x1] ss:$0 sm:$0xff] }
  0x4a   : > { %4914 = vmatpush3.xpose.msk.msra.mxu0 %vm1048_vm1, %v1210_v8  ;;  %v1217_v22 = vcombine.low %v4640_v21, %v4640_v21  ;;  %v5686_v30 = vld [vmem:[%s6228_s1] ss:$0 sm:$0xff]  ;;  %v1643_v3 = vcombine.low %v4655_v60, %v4655_v60  ;;  %v1631_v60 = vld [vmem:[%s5582_s23 + $0x8] sm:$0xff] }
  0x4b   : > { %4923 = vmatprep.subr.mxu0 %v5382_v4 }
  0x4d   : > { %4916 = vmatmul.mubr.msk.f32.vlgmr.msra.gmra.mrb[2].mxu0 %vm1048_vm1, %v5638_v7 }
  0x4e   : > { %4925 = vmatprep.mubr.msk.f32.mxu0 %vm5383_vm2, %v5382_v4 }
 0x11b   : > { %v1204_v13 = vpop.f32.mrb[0].mxu1  ;;  %v1120_v14 = vpop.f32.mrb[0].mxu0 }
 0x11c   : > { %v1205_v15 = vadd.f32 %v1204_v13, %v1133_v11  ;;  %v4912_v16 = vpop.f32.mrb[1].mxu1  ;;  %v1121_v17 = vadd.f32 %v1120_v14, %v1046_v12  ;;  %v4907_v18 = vpop.f32.mrb[1].mxu0  ;;  %v4665_v13 = vld [vmem:[%s6227_s2 + $0x1] ss:$0 sm:$0xff] }
 0x11d   : > { %v1815_v14 = vcombine.low %v4665_v13, %v4665_v13 }
 0x11e   : > { %v1209_v19 = vcombine.high %v1205_v15, %v1205_v15  ;;  %4919 = vmatpush3.xpose.msk.msra.mxu1 %vm1306_vm3, %v1205_v15  ;;  %v1125_v20 = vcombine.high %v1121_v17, %v1121_v17 }
 0x11f   : > { %4928 = vmatprep.subr.mxu1 %v5382_v4 }
 0x120   : > { %4924 = vmatpush3.xpose.msk.msra.mxu0 %vm1306_vm3, %v1209_v19  ;;  %v1288_v23 = vpop.f32.mrb[2].mxu0 }
 0x121   : > { %4921 = vmatmul.mubr.msk.f32.vlgmr.msra.gmra.mrb[2].mxu1 %vm1306_vm3, %v1121_v17  ;;  %4933 = vmatprep.subr.mxu0 %v5382_v4  ;;  %v1289_v24 = vadd.f32 %v1288_v23, %v1217_v22  ;;  %v4917_v25 = vpop.f32.mrb[3].mxu0 }
 0x122   : > { %4930 = vmatprep.mubr.msk.f32.mxu1 %vm5383_vm2, %v5382_v4 }
 0x123   : > { %4926 = vmatmul.mubr.msk.f32.vlgmr.msra.gmra.mrb[4].mxu0 %vm1306_vm3, %v1125_v20  ;;  %v1293_v26 = vcombine.high %v1289_v24, %v1289_v24  ;;  %4929 = vmatpush3.msk.msra.mxu1 %vm1482_vm4, %v1289_v24 }
 0x124   : > { %4935 = vmatprep.mubr.msk.f32.mxu0 %vm5383_vm2, %v5382_v4  ;;  %4938 = vmatprep.subr.mxu1 %v5382_v4 }
 0x125   : > { %4934 = vmatpush3.msk.msra.mxu0 %vm1482_vm4, %v1293_v26 }
 0x126   : > { %4943 = vmatprep.subr.mxu0 %v5382_v4 }
 0x1f4   : > { %v1377_v27 = vpop.f32.mrb[2].mxu1 }
 0x1f5   : > { %v4922_v29 = vpop.f32.mrb[3].mxu1  ;;  %v1378_v34 = vadd.f32 %v5686_v30, %v1377_v27 }
 0x1f6   : > { %v1451_v31 = vpop.f32.mrb[4].mxu0 }
 0x1f7   : > { %v1452_v32 = vadd.f32 %v5681_v28, %v1451_v31  ;;  %v4927_v33 = vpop.f32.mrb[5].mxu0  ;;  %v1456_v36 = vsel %vm1455_vm5, %v1378_v34, -inf }
 0x1f9   : > { %v1459_v35 = vsel %vm1455_vm5, %v1452_v32, -inf }
 0x1fa   : > { %1460 = vmax.xlane.f32.xlu0 %v1459_v35 }
 0x1fe   : > { %1457 = vmax.xlane.f32.xlu0 %v1456_v36 }
 0x287   : > { %v1461_v37 = vpop.xlane.xlu0 %1460 }
 0x288   : > { %v1463_v38 = vsub.f32 %v1452_v32, %v1461_v37 }
 0x28a   : > { %v1466_v39 = vmul.f32 1.442695, %v1463_v38 }
 0x28b   : > { %v1458_v40 = vpop.xlane.xlu0 %1457 }
 0x28c   : > { %5248 = vpow2.f32 %v1466_v39  ;;  %v1462_v41 = vsub.f32 %v1378_v34, %v1458_v40  ;;  %v5384_v39 = vmov 0.0|0.0  }
 0x28e   : > { %v1464_v42 = vmul.f32 1.442695, %v1462_v41 }
 0x290   : > { %5250 = vpow2.f32 %v1464_v42 }
 0x296   : > { %v5249_v43 = vpop.eup %5248 }
 0x297   : > { %v1471_v44 = vsel %vm1455_vm5, %v5249_v43, 0.0 }
 0x298   : > { %1472 = vadd.xlane.f32.xlu1 %v1471_v44  ;;  %v4690_v44 = vld [vmem:[%s6223_s19 + $0x10] sm:$0xff] }
 0x29a   : > { %v5251_v45 = vpop.eup %5250 }
 0x29b   : > { %v1468_v46 = vsel %vm1455_vm5, %v5251_v45, 0.0 }
 0x29c   : > { %1469 = vadd.xlane.f32.xlu1 %v1468_v46  ;;  %v4677_v46 = vld [vmem:[%s5582_s23 + $0x28] sm:$0xff] }
 0x325   : > { %v1473_v47 = vpop.xlane.xlu1 %1472 }
 0x326   : > { %5252 = vrcp.f32 %v1473_v47 }
 0x329   : > { %v1470_v48 = vpop.xlane.xlu1 %1469 }
 0x32a   : > { %5254 = vrcp.f32 %v1470_v48 }
 0x330   : > { %v5253_v49 = vpop.eup %5252 }
 0x331   : > { %v1477_v50 = vmul.f32 %v5253_v49, %v5249_v43  ;;  %v4695_v49 = vld [vmem:[%s5552_s10 + $0x10] sm:$0xff] }
 0x333   : > { %4936 = vmatmul.mubr.msk.f32.vlgmr.msra.gmra.mrb[6].mxu0 %vm1478_vm6, %v1477_v50 }
 0x334   : > { %v5255_v52 = vpop.eup %5254  ;;  %4944 = vmatpush3.xpose.msk.msra.mxu0 %vm1048_vm1, %v4658_v51  ;;  %4945 = vmatprep.mubr.msk.f32.mxu0 %vm5383_vm2, %v5382_v4 }
 0x335   : > { %v1476_v53 = vmul.f32 %v5255_v52, %v5251_v45  ;;  %4953 = vmatprep.subr.mxu0 %v5382_v4  ;;  %v4676_v45 = vld [vmem:[%s5582_s23 + $0x20] sm:$0xff]  ;;  %v4678_v52 = vld [vmem:[%s5582_s23 + $0x30] sm:$0xff] }
 0x336   : > { %v5141_v50 = vpack.c.bf16 %v4677_v46, %v4676_v45 }
 0x337   : > { %4931 = vmatmul.mubr.msk.f32.vlgmr.msra.gmra.mrb[4].mxu1 %vm1478_vm6, %v1476_v53  ;;  %4946 = vmatmul.mubr.msk.f32.vlgmr.msra.gmra.mrb[8].mxu0 %vm1048_vm1, %v5638_v7  ;;  %v4679_v53 = vld [vmem:[%s5582_s23 + $0x38] sm:$0xff] }
 0x338   : > { %4939 = vmatpush3.xpose.msk.msra.mxu1 %vm1048_vm1, %v4653_v54  ;;  %4940 = vmatprep.mubr.msk.f32.mxu1 %vm5383_vm2, %v5382_v4  ;;  %v5145_v54 = vpack.c.bf16 %v4679_v53, %v4678_v52 }
 0x339   : > { %4948 = vmatprep.subr.mxu1 %v5382_v4  ;;  %4955 = vmatprep.mubr.msk.f32.mxu0 %vm5383_vm2, %v5382_v4 }
 0x33b   : > { %4941 = vmatmul.mubr.msk.f32.vlgmr.msra.gmra.mrb[6].mxu1 %vm1048_vm1, %v5638_v7 }
 0x33c   : > { %4950 = vmatprep.mubr.msk.f32.mxu1 %vm5383_vm2, %v5382_v4  ;;  %4949 = vmatpush3.xpose.msk.msra.mxu1 %vm1048_vm1, %v4663_v55  ;;  %v4700_v55 = vld [vmem:[%s6224_s24 + $0x10] sm:$0xff] }
 0x33d   : > { %4958 = vmatprep.subr.mxu1 %v5382_v4 }
 0x33f   : > { %4951 = vmatmul.mubr.msk.f32.vlgmr.msra.gmra.mrb[8].mxu1 %vm1048_vm1, %v5638_v7 }
 0x340   : > { %4960 = vmatprep.mubr.msk.f32.mxu1 %vm5383_vm2, %v5382_v4 }
 0x406   : > { %v5722_v57 = vpop.f32.mrb[6].mxu0 }
 0x407   : > { %v4937_v58 = vpop.f32.mrb[7].mxu0 }
 0x40a   : > { %v5725_v61 = vpop.f32.mrb[4].mxu1  ;;  %v1800_v62 = vpop.f32.mrb[8].mxu0 }
 0x40b   : > { %v2306_v63 = vcombine.low %v5725_v61, %v5722_v57  ;;  %v1801_v0 = vadd.f32 %v1800_v62, %v1729_v59  ;;  %v4932_v1 = vpop.f32.mrb[5].mxu1  ;;  %v4947_v2 = vpop.f32.mrb[9].mxu0  ;;  %v1630_v59 = vld [vmem:[%s5582_s23] sm:$0xff]  ;;  %v4727_v57 = vld [vmem:[%s5552_s10 + $0x18] sm:$0xff] }
 0x40c   : > { %v4697_v62 = vld [vmem:[%s6225_s25 + $0x2] ss:$0 sm:$0xff]  ;;  %v5149_v2 = vpack.c.bf16 %v1631_v60, %v1630_v59 }
 0x40d   : > { %v1805_v8 = vcombine.high %v1801_v0, %v1801_v0  ;;  %4954 = vmatpush3.xpose.msk.msra.mxu0 %vm1306_vm3, %v1801_v0 }
 0x40e   : > { %v1714_v9 = vpop.f32.mrb[6].mxu1  ;;  %4963 = vmatprep.subr.mxu0 %v5382_v4 }
 0x40f   : > { %v1715_v10 = vadd.f32 %v1714_v9, %v1643_v3  ;;  %v4942_v11 = vpop.f32.mrb[7].mxu1  ;;  %4959 = vmatpush3.xpose.msk.msra.mxu1 %vm1306_vm3, %v1805_v8  ;;  %v4692_v8 = vld [vmem:[%s6226_s4 + $0x2] ss:$0 sm:$0xff] }
 0x410   : > { %4968 = vmatprep.subr.mxu1 %v5382_v4  ;;  %v2489_v11 = vcombine.low %v4697_v62, %v4697_v62  ;;  %v4734_v62 = vld [vmem:[%s6227_s2 + $0x3] ss:$0 sm:$0xff] }
 0x411   : > { %v1719_v12 = vcombine.high %v1715_v10, %v1715_v10  ;;  %4956 = vmatmul.mubr.msk.f32.vlgmr.msra.gmra.mrb[10].mxu0 %vm1306_vm3, %v1715_v10 }
 0x412   : > { %4965 = vmatprep.mubr.msk.f32.mxu0 %vm5383_vm2, %v5382_v4  ;;  %v1886_v15 = vpop.f32.mrb[8].mxu1 }
 0x413   : > { %4961 = vmatmul.mubr.msk.f32.vlgmr.msra.gmra.mrb[10].mxu1 %vm1306_vm3, %v1719_v12  ;;  %v1887_v16 = vadd.f32 %v1886_v15, %v1815_v14  ;;  %v4952_v17 = vpop.f32.mrb[9].mxu1  ;;  %v2403_v12 = vcombine.low %v4692_v8, %v4692_v8 }
 0x414   : > { %4970 = vmatprep.mubr.msk.f32.mxu1 %vm5383_vm2, %v5382_v4  ;;  %v1633_v17 = vld [vmem:[%s5582_s23 + $0x18] sm:$0xff] }
 0x415   : > { %v1891_v18 = vcombine.high %v1887_v16, %v1887_v16  ;;  %4964 = vmatpush3.msk.msra.mxu0 %vm1482_vm4, %v1887_v16  ;;  %v1632_v16 = vld [vmem:[%s5582_s23 + $0x10] sm:$0xff] }
 0x416   : > { %5140 = vmatprep.subr.bf16.mxu0 %v5384_v39 }
 0x417   : > { %4969 = vmatpush3.msk.msra.mxu1 %vm1482_vm4, %v1891_v18 }
 0x418   : > { %4995 = vmatprep.subr.mxu1 %v5382_v4 }
 0x4e4   : > { %v1962_v19 = vpop.f32.mrb[10].mxu0 }
 0x4e5   : > { %v4957_v20 = vpop.f32.mrb[11].mxu0  ;;  %v1963_v24 = vadd.f32 %v5686_v30, %v1962_v19  ;;  %v5153_v19 = vpack.c.bf16 %v1633_v17, %v1632_v16  ;;  %v4713_v17 = vld [vmem:[%s5582_s23 + $0x40] sm:$0xff] }
 0x4e6   : > { %v2036_v21 = vpop.f32.mrb[10].mxu1 }
 0x4e7   : > { %v2037_v22 = vadd.f32 %v5681_v28, %v2036_v21  ;;  %v4962_v23 = vpop.f32.mrb[11].mxu1  ;;  %v2040_v26 = vsel %vm1455_vm5, %v1963_v24, -inf }
 0x4e9   : > { %v2043_v25 = vsel %vm1455_vm5, %v2037_v22, -inf }
 0x4ea   : > { %2044 = vmax.xlane.f32.xlu0 %v2043_v25 }
 0x4ee   : > { %2041 = vmax.xlane.f32.xlu0 %v2040_v26 }
 0x577   : > { %v2045_v27 = vpop.xlane.xlu0 %2044 }
 0x578   : > { %v2047_v29 = vsub.f32 %v2037_v22, %v2045_v27  ;;  %v4702_v22 = vld [vmem:[%s6227_s2 + $0x2] ss:$0 sm:$0xff]  ;;  %v4722_v27 = vld [vmem:[%s6223_s19 + $0x18] sm:$0xff]  ;;  %s6238_s19 = sld [smem:[#allocation27_spill]] (!%p4775_p5) }
 0x579   : > { %v2575_v23 = vcombine.low %v4702_v22, %v4702_v22  ;;  %v4716_v22 = vld [vmem:[%s5582_s23 + $0x58] sm:$0xff] }
 0x57a   : > { %v2050_v31 = vmul.f32 1.442695, %v2047_v29 }
 0x57b   : > { %v2042_v32 = vpop.xlane.xlu0 %2041 }
 0x57c   : > { %5256 = vpow2.f32 %v2050_v31  ;;  %v2046_v33 = vsub.f32 %v1963_v24, %v2042_v32 }
 0x57e   : > { %v2048_v34 = vmul.f32 1.442695, %v2046_v33 }
 0x580   : > { %5258 = vpow2.f32 %v2048_v34 }
 0x586   : > { %v5257_v35 = vpop.eup %5256 }
 0x587   : > { %v2055_v36 = vsel %vm1455_vm5, %v5257_v35, 0.0 }
 0x588   : > { %2056 = vadd.xlane.f32.xlu1 %v2055_v36 }
 0x58a   : > { %v5259_v37 = vpop.eup %5258 }
 0x58b   : > { %v2052_v38 = vsel %vm1455_vm5, %v5259_v37, 0.0 }
 0x58c   : > { %2053 = vadd.xlane.f32.xlu1 %v2052_v38  ;;  %v4732_v38 = vld [vmem:[%s6224_s24 + $0x18] sm:$0xff] }
 0x615   : > { %v2057_v40 = vpop.xlane.xlu1 %2056 }
 0x616   : > { %5260 = vrcp.f32 %v2057_v40  ;;  %v4729_v40 = vld [vmem:[%s6225_s25 + $0x3] ss:$0 sm:$0xff] }
 0x619   : > { %v2054_v41 = vpop.xlane.xlu1 %2053 }
 0x61a   : > { %5262 = vrcp.f32 %v2054_v41  ;;  %v4724_v41 = vld [vmem:[%s6226_s4 + $0x3] ss:$0 sm:$0xff]  ;;  %s6239_s4 = sld [smem:[#allocation31_spill]] (!%p4775_p5) }
 0x61b   : > { %v3078_v45 = vcombine.low %v4724_v41, %v4724_v41 }
 0x620   : > { %v5261_v42 = vpop.eup %5260 }
 0x621   : > { %v2061_v43 = vmul.f32 %v5261_v42, %v5257_v35 }
 0x623   : > { %4971 = vmatmul.mubr.msk.f32.vlgmr.msra.gmra.mrb[12].mxu1 %vm1478_vm6, %v2061_v43 }
 0x624   : > { %v5263_v47 = vpop.eup %5262  ;;  %4996 = vmatpush3.xpose.msk.msra.mxu1 %vm1048_vm1, %v4690_v44  ;;  %4997 = vmatprep.mubr.msk.f32.mxu1 %vm5383_vm2, %v5382_v4  ;;  %v3164_v44 = vcombine.low %v4729_v40, %v4729_v40 }
 0x625   : > { %v2060_v48 = vmul.f32 %v5263_v47, %v5259_v37  ;;  %5000 = vmatprep.subr.mxu1 %v5382_v4 }
 0x627   : > { %4966 = vmatmul.mubr.msk.f32.vlgmr.msra.gmra.mrb[12].mxu0 %vm1478_vm6, %v2060_v48  ;;  %4998 = vmatmul.mubr.msk.f32.vlgmr.msra.gmra.mrb[14].mxu1 %vm1048_vm1, %v5638_v7 }
 0x628   : > { %5001 = vmatpush3.xpose.msk.msra.mxu1 %vm1048_vm1, %v4695_v49  ;;  %5002 = vmatprep.mubr.msk.f32.mxu1 %vm5383_vm2, %v5382_v4 }
 0x629   : > { %5143 = vmatpush3.bf16.xpose.msk.msra.mxu0 %vm5761_vm7, %v5141_v50  ;;  %4981 = vmatprep.mubr.msk.f32.mxu0 %vm5383_vm2, %v5382_v4 }
 0x62a   : > { %5144 = vmatprep.subr.bf16.mxu0 %v5384_v39  ;;  %5005 = vmatprep.subr.mxu1 %v5382_v4 }
 0x62b   : > { %5003 = vmatmul.mubr.msk.f32.vlgmr.msra.gmra.mrb[16].mxu1 %vm1048_vm1, %v5638_v7 }
 0x62c   : > { %5007 = vmatprep.mubr.msk.f32.mxu1 %vm5383_vm2, %v5382_v4  ;;  %5006 = vmatpush3.xpose.msk.msra.mxu1 %vm1048_vm1, %v4700_v55 }
 0x62d   : > { %5010 = vmatprep.subr.mxu1 %v5382_v4 }
 0x62f   : > { %5008 = vmatmul.mubr.msk.f32.vlgmr.msra.gmra.mrb[18].mxu1 %vm1048_vm1, %v5638_v7 }
 0x630   : > { %5012 = vmatprep.mubr.msk.f32.mxu1 %vm5383_vm2, %v5382_v4 }
 0x631   : > { %5147 = vmatpush3.bf16.xpose.msk.msra.mxu0 %vm5761_vm7, %v5145_v54 }
 0x632   : > { %5148 = vmatprep.subr.bf16.mxu0 %v5384_v39 }
 0x6f6   : > { %v2208_v56 = vpop.f32.mrb[12].mxu1 }
 0x6f7   : > { %v4972_v58 = vpop.f32.mrb[13].mxu1 }
 0x6fa   : > { %v2133_v0 = vpop.f32.mrb[12].mxu0  ;;  %v2474_v1 = vpop.f32.mrb[14].mxu1 }
 0x6fb   : > { %v2219_v3 = vcombine.low %v2133_v0, %v2208_v56  ;;  %v4967_v9 = vpop.f32.mrb[13].mxu0  ;;  %v4999_v10 = vpop.f32.mrb[15].mxu1  ;;  %v2475_v18 = vadd.f32 %v2474_v1, %v2403_v12  ;;  %v3250_v0 = vcombine.low %v4734_v62, %v4734_v62  ;;  %v4748_v62 = vld [vmem:[%s5582_s23 + $0x78] sm:$0xff] }
 0x6fd   : > { %4982 = vmatmul.mubr.msk.f32.vlgmr.msra.gmra.mrb[14].mxu0 %vm1306_vm3, %v2219_v3  ;;  %v2479_v21 = vcombine.high %v2475_v18, %v2475_v18 }
 0x6fe   : > { %5151 = vmatpush3.bf16.xpose.msk.msra.mxu0 %vm5761_vm7, %v5149_v2  ;;  %v2560_v13 = vpop.f32.mrb[16].mxu1  ;;  %4992 = vmatprep.mubr.msk.f32.mxu0 %vm5383_vm2, %v5382_v4 }
 0x6ff   : > { %v2561_v14 = vadd.f32 %v2560_v13, %v2489_v11  ;;  %v5004_v15 = vpop.f32.mrb[17].mxu1  ;;  %5152 = vmatprep.subr.bf16.mxu0 %v5384_v39 }
 0x701   : > { %5011 = vmatpush3.xpose.msk.msra.mxu1 %vm1306_vm3, %v2561_v14  ;;  %v2565_v20 = vcombine.high %v2561_v14, %v2561_v14 }
 0x702   : > { %5015 = vmatprep.subr.mxu1 %v5382_v4  ;;  %v2646_v24 = vpop.f32.mrb[18].mxu1 }
 0x703   : > { %v5825_v25 = vadd.f32 %v2646_v24, %v2575_v23  ;;  %v5009_v26 = vpop.f32.mrb[19].mxu1 }
 0x704   : > { %5013 = vmatmul.mubr.msk.f32.vlgmr.msra.gmra.mrb[20].mxu1 %vm1306_vm3, %v2475_v18  ;;  %v4714_v18 = vld [vmem:[%s5582_s23 + $0x48] sm:$0xff] }
 0x705   : > { %5016 = vmatpush3.xpose.msk.msra.mxu1 %vm1306_vm3, %v2565_v20  ;;  %5017 = vmatprep.mubr.msk.f32.mxu1 %vm5383_vm2, %v5382_v4  ;;  %v2651_v12 = vcombine.high %v5825_v25, %v5825_v25 }
 0x706   : > { %5155 = vmatpush3.bf16.xpose.msk.msra.mxu0 %vm5761_vm7, %v5153_v19  ;;  %5020 = vmatprep.subr.mxu1 %v5382_v4 }
 0x707   : > { %5041 = vmatprep.subr.mxu0 %v5382_v4 }
 0x708   : > { %5018 = vmatmul.mubr.msk.f32.vlgmr.msra.gmra.mrb[22].mxu1 %vm1306_vm3, %v2479_v21  ;;  %v4715_v21 = vld [vmem:[%s5582_s23 + $0x50] sm:$0xff] }
 0x709   : > { %5022 = vmatprep.mubr.msk.f32.mxu1 %vm5383_vm2, %v5382_v4  ;;  %5021 = vmatpush3.msk.msra.mxu1 %vm1482_vm4, %v5825_v25  ;;  %v5161_v23 = vpack.c.bf16 %v4716_v22, %v4715_v21  ;;  %v3802_v21 = vld [vmem:[%s5596_s22 + $0x8] sm:$0xff] }
 0x70a   : > { %5025 = vmatprep.subr.mxu1 %v5382_v4 }
 0x70d   : > { %4993 = vmatmul.mubr.msk.f32.vlgmr.msra.gmra.mrb[14].mxu0 %vm1306_vm3, %v2306_v63 }
 0x70e   : > { %5043 = vmatprep.mubr.msk.f32.mxu0 %vm5383_vm2, %v5382_v4  ;;  %5042 = vmatpush3.xpose.msk.msra.mxu0 %vm1048_vm1, %v4722_v27 }
 0x70f   : > { %5046 = vmatprep.subr.mxu0 %v5382_v4 }
 0x711   : > { %5044 = vmatmul.mubr.msk.f32.vlgmr.msra.gmra.mrb[16].mxu0 %vm1048_vm1, %v5638_v7 }
 0x712   : > { %5047 = vmatpush3.xpose.msk.msra.mxu0 %vm1048_vm1, %v4727_v57  ;;  %5048 = vmatprep.mubr.msk.f32.mxu0 %vm5383_vm2, %v5382_v4 }
 0x713   : > { %5051 = vmatprep.subr.mxu0 %v5382_v4 }
 0x715   : > { %5049 = vmatmul.mubr.msk.f32.vlgmr.msra.gmra.mrb[18].mxu0 %vm1048_vm1, %v5638_v7 }
 0x716   : > { %5053 = vmatprep.mubr.msk.f32.mxu0 %vm5383_vm2, %v5382_v4  ;;  %5052 = vmatpush3.xpose.msk.msra.mxu0 %vm1048_vm1, %v4732_v38 }
 0x717   : > { %5056 = vmatprep.subr.mxu0 %v5382_v4 }
 0x719   : > { %5054 = vmatmul.mubr.msk.f32.vlgmr.msra.gmra.mrb[20].mxu0 %vm1048_vm1, %v5638_v7 }
 0x71a   : > { %5058 = vmatprep.mubr.msk.f32.mxu0 %vm5383_vm2, %v5382_v4 }
 0x7d7   : > { %v2722_v61 = vpop.f32.mrb[20].mxu1 }
 0x7d8   : > { %v2723_v63 = vadd.f32 %v5686_v30, %v2722_v61  ;;  %v5014_v29 = vpop.f32.mrb[21].mxu1 }
 0x7da   : > { %v2800_v31 = vsel %vm1455_vm5, %v2723_v63, -inf }
 0x7db   : > { %v2796_v32 = vpop.f32.mrb[22].mxu1  ;;  %2801 = vmax.xlane.f32.xlu0 %v2800_v31 }
 0x7dc   : > { %v2797_v33 = vadd.f32 %v5681_v28, %v2796_v32  ;;  %v5019_v34 = vpop.f32.mrb[23].mxu1 }
 0x7de   : > { %v2803_v35 = vsel %vm1455_vm5, %v2797_v33, -inf }
 0x7df   : > { %2804 = vmax.xlane.f32.xlu1 %v2803_v35 }
 0x7e0   : > { %v5848_v36 = vpop.f32.mrb[14].mxu0 }
 0x7e1   : > { %v4994_v37 = vpop.f32.mrb[15].mxu0 }
 0x7e4   : > { %v3149_v42 = vpop.f32.mrb[16].mxu0 }
 0x7e5   : > { %v5045_v43 = vpop.f32.mrb[17].mxu0  ;;  %v5861_v49 = vadd.f32 %v3149_v42, %v3078_v45  ;;  %v2392_v42 = vcombine.high %v5848_v36, %v5848_v36 }
 0x7e7   : > { %v3154_v35 = vcombine.high %v5861_v49, %v5861_v49 }
 0x7e8   : > { %v3235_v46 = vpop.f32.mrb[18].mxu0 }
 0x7e9   : > { %v5859_v47 = vadd.f32 %v3235_v46, %v3164_v44  ;;  %v5050_v48 = vpop.f32.mrb[19].mxu0 }
 0x7eb   : > { %5057 = vmatpush3.xpose.msk.msra.mxu0 %vm1306_vm3, %v5859_v47  ;;  %v3240_v29 = vcombine.high %v5859_v47, %v5859_v47 }
 0x7ec   : > { %5066 = vmatprep.subr.mxu0 %v5382_v4  ;;  %v3321_v1 = vpop.f32.mrb[20].mxu0 }
 0x7ed   : > { %v3322_v2 = vadd.f32 %v3321_v1, %v3250_v0  ;;  %v5055_v3 = vpop.f32.mrb[21].mxu0 }
 0x7ee   : > { %5059 = vmatmul.mubr.msk.f32.vlgmr.msra.gmra.mrb[22].mxu0 %vm1306_vm3, %v5861_v49 }
 0x7ef   : > { %5068 = vmatprep.mubr.msk.f32.mxu0 %vm5383_vm2, %v5382_v4  ;;  %5067 = vmatpush3.msk.msra.mxu0 %vm1482_vm4, %v3322_v2  ;;  %v3326_v34 = vcombine.high %v3322_v2, %v3322_v2 }
 0x7f0   : > { %5164 = vmatprep.subr.bf16.mxu0 %v5384_v39 }
 0x868   : > { %v2802_v7 = vpop.xlane.xlu0 %2801 }
 0x869   : > { %v2806_v50 = vsub.f32 %v2723_v63, %v2802_v7 }
 0x86b   : > { %v2808_v52 = vmul.f32 1.442695, %v2806_v50 }
 0x86c   : > { %v2805_v53 = vpop.xlane.xlu1 %2804 }
 0x86d   : > { %5264 = vpow2.f32 %v2808_v52  ;;  %v2807_v54 = vsub.f32 %v2797_v33, %v2805_v53 }
 0x86f   : > { %v2810_v55 = vmul.f32 1.442695, %v2807_v54 }
 0x871   : > { %5266 = vpow2.f32 %v2810_v55 }
 0x877   : > { %v5265_v56 = vpop.eup %5264 }
 0x878   : > { %v2812_v58 = vsel %vm1455_vm5, %v5265_v56, 0.0 }
 0x879   : > { %2813 = vadd.xlane.f32.xlu0 %v2812_v58  ;;  %v4745_v58 = vld [vmem:[%s5582_s23 + $0x60] sm:$0xff] }
 0x87b   : > { %v5267_v59 = vpop.eup %5266 }
 0x87c   : > { %v2815_v60 = vsel %vm1455_vm5, %v5267_v59, 0.0 }
 0x87d   : > { %2816 = vadd.xlane.f32.xlu1 %v2815_v60 }
 0x8c1   : > { %v3397_v13 = vpop.f32.mrb[22].mxu0 }
 0x8c2   : > { %v3398_v14 = vadd.f32 %v5686_v30, %v3397_v13  ;;  %v5060_v15 = vpop.f32.mrb[23].mxu0  ;;  %v5157_v30 = vpack.c.bf16 %v4714_v18, %v4713_v17 }
 0x8c4   : > { %v3475_v20 = vsel %vm1455_vm5, %v3398_v14, -inf }
 0x8c5   : > { %3476 = vmax.xlane.f32.xlu0 %v3475_v20 }
 0x906   : > { %v2814_v8 = vpop.xlane.xlu0 %2813 }
 0x907   : > { %5268 = vrcp.f32 %v2814_v8 }
 0x90a   : > { %v2817_v9 = vpop.xlane.xlu1 %2816 }
 0x90b   : > { %5270 = vrcp.f32 %v2817_v9 }
 0x911   : > { %v5269_v10 = vpop.eup %5268 }
 0x912   : > { %v2820_v11 = vmul.f32 %v5269_v10, %v5265_v56 }
 0x914   : > { %5023 = vmatmul.mubr.msk.f32.vlgmr.msra.gmra.mrb[24].mxu1 %vm1478_vm6, %v2820_v11  ;;  %v4754_v11 = vld [vmem:[%s994_s20] ss:$0 sm:$0xff] }
 0x915   : > { %v5271_v16 = vpop.eup %5270  ;;  %5026 = vmatpush3.msk.msra.mxu1 %vm1482_vm4, %v2651_v12  ;;  %5027 = vmatprep.mubr.msk.f32.mxu1 %vm5383_vm2, %v5382_v4 }
 0x916   : > { %v2821_v19 = vmul.f32 %v5271_v16, %v5267_v59  ;;  %5156 = vmatprep.subr.bf16.mxu1 %v5384_v39  ;;  %v4746_v59 = vld [vmem:[%s5582_s23 + $0x68] sm:$0xff] }
 0x917   : > { %v5165_v60 = vpack.c.bf16 %v4746_v59, %v4745_v58 }
 0x918   : > { %5028 = vmatmul.mubr.msk.f32.vlgmr.msra.gmra.mrb[26].mxu1 %vm1478_vm6, %v2821_v19 }
 0x919   : > { %5038 = vmatprep.mubr.msk.f32.mxu1 %vm5383_vm2, %v5382_v4 }
 0x91c   : > { %5159 = vmatpush3.bf16.xpose.msk.msra.mxu1 %vm5761_vm7, %v5157_v30  ;;  %v3801_v30 = vld [vmem:[%s5596_s22] sm:$0xff] }
 0x91d   : > { %5160 = vmatprep.subr.bf16.mxu1 %v5384_v39 }
 0x924   : > { %5163 = vmatpush3.bf16.xpose.msk.msra.mxu1 %vm5761_vm7, %v5161_v23  ;;  %v5173_v23 = vpack.c.bf16 %v3802_v21, %v3801_v30 }
 0x925   : > { %5061 = vmatprep.subr.mxu1 %v5382_v4 }
 0x952   : > { %v3477_v24 = vpop.xlane.xlu0 %3476 }
 0x953   : > { %v3481_v25 = vsub.f32 %v3398_v14, %v3477_v24 }
 0x955   : > { %v3483_v26 = vmul.f32 1.442695, %v3481_v25 }
 0x957   : > { %5272 = vpow2.f32 %v3483_v26 }
 0x961   : > { %v5273_v27 = vpop.eup %5272 }
 0x962   : > { %v3487_v57 = vsel %vm1455_vm5, %v5273_v27, 0.0 }
 0x963   : > { %3488 = vadd.xlane.f32.xlu0 %v3487_v57 }
 0x9e7   : > { %v2893_v61 = vpop.f32.mrb[24].mxu1 }
 0x9e8   : > { %v5024_v63 = vpop.f32.mrb[25].mxu1 }
 0x9eb   : > { %v2968_v31 = vpop.f32.mrb[26].mxu1 }
 0x9ec   : > { %v2979_v32 = vcombine.low %v2893_v61, %v2968_v31  ;;  %v5029_v33 = vpop.f32.mrb[27].mxu1  ;;  %v3803_v31 = vld [vmem:[%s5596_s22 + $0x10] sm:$0xff] }
 0x9ee   : > { %5039 = vmatmul.mubr.msk.f32.vlgmr.msra.gmra.mrb[28].mxu1 %vm1306_vm3, %v2979_v32  ;;  %v3804_v32 = vld [vmem:[%s5596_s22 + $0x18] sm:$0xff] }
 0x9ef   : > { %5062 = vmatpush3.xpose.msk.msra.mxu1 %vm1306_vm3, %v3240_v29  ;;  %5063 = vmatprep.mubr.msk.f32.mxu1 %vm5383_vm2, %v5382_v4  ;;  %v5177_v33 = vpack.c.bf16 %v3804_v32, %v3803_v31 }
 0x9f0   : > { %5071 = vmatprep.subr.mxu1 %v5382_v4  ;;  %v3489_v37 = vpop.xlane.xlu0 %3488 }
 0x9f1   : > { %5274 = vrcp.f32 %v3489_v37 }
 0x9f2   : > { %5064 = vmatmul.mubr.msk.f32.vlgmr.msra.gmra.mrb[30].mxu1 %vm1306_vm3, %v3154_v35  ;;  %v3806_v35 = vld [vmem:[%s5596_s22 + $0x28] sm:$0xff] }
 0x9f3   : > { %5072 = vmatpush3.msk.msra.mxu1 %vm1482_vm4, %v3326_v34  ;;  %5073 = vmatprep.mubr.msk.f32.mxu1 %vm5383_vm2, %v5382_v4  ;;  %v3805_v34 = vld [vmem:[%s5596_s22 + $0x20] sm:$0xff] }
 0x9f4   : > { %5172 = vmatprep.subr.bf16.mxu1 %v5384_v39  ;;  %v5181_v37 = vpack.c.bf16 %v3806_v35, %v3805_v34 }
 0x9fb   : > { %v5275_v38 = vpop.eup %5274 }
 0x9fc   : > { %v3495_v40 = vmul.f32 %v5275_v38, %v5273_v27  ;;  %v3807_v38 = vld [vmem:[%s5596_s22 + $0x30] sm:$0xff] }
 0x9fe   : > { %5069 = vmatmul.mubr.msk.f32.vlgmr.msra.gmra.mrb[24].mxu0 %vm1478_vm6, %v3495_v40  ;;  %v3808_v40 = vld [vmem:[%s5596_s22 + $0x38] sm:$0xff] }
 0x9ff   : > { %5084 = vmatprep.mubr.msk.f32.mxu0 %vm5383_vm2, %v5382_v4  ;;  %5167 = vmatpush3.bf16.xpose.msk.msra.mxu0 %vm5761_vm7, %v5165_v60 }
 0xa00   : > { %5168 = vmatprep.subr.bf16.mxu0 %v5384_v39 }
 0xac1   : > { %v3060_v41 = vpop.f32.mrb[28].mxu1 }
 0xac2   : > { %v3065_v43 = vcombine.high %v3060_v41, %v3060_v41  ;;  %v3067_v44 = vadd.f32 %v3060_v41, %v5848_v36  ;;  %v5040_v45 = vpop.f32.mrb[29].mxu1  ;;  %v5185_v41 = vpack.c.bf16 %v3808_v40, %v3807_v38  ;;  %v4773_v38 = vld [vmem:[%s1019_s0] ss:$0 sm:$0xff] }
 0xac4   : > { %v3068_v46 = vadd.f32 %v3065_v43, %v2392_v42  ;;  %v3921_v42 = vld [vmem:[%s5605_s27] sm:$0xff]  ;;  %v3922_v43 = vld [vmem:[%s5605_s27 + $0x8] sm:$0xff] }
 0xac5   : > { %v3471_v47 = vpop.f32.mrb[30].mxu1 }
 0xac6   : > { %v3472_v48 = vadd.f32 %v5681_v28, %v3471_v47  ;;  %v5065_v49 = vpop.f32.mrb[31].mxu1  ;;  %v4747_v28 = vld [vmem:[%s5582_s23 + $0x70] sm:$0xff] }
 0xac7   : > { %v5169_v0 = vpack.c.bf16 %v4748_v62, %v4747_v28  ;;  %v3923_v62 = vld [vmem:[%s5605_s27 + $0x10] sm:$0xff] }
 0xac8   : > { %v3478_v7 = vsel %vm1455_vm5, %v3472_v48, -inf }
 0xac9   : > { %3479 = vmax.xlane.f32.xlu1 %v3478_v7  ;;  %5171 = vmatpush3.bf16.xpose.msk.msra.mxu0 %vm5761_vm7, %v5169_v0  ;;  %v3924_v0 = vld [vmem:[%s5605_s27 + $0x18] sm:$0xff] }
 0xaca   : > { %5188 = vmatprep.subr.bf16.mxu0 %v5384_v39 }
 0xad1   : > { %v3568_v50 = vpop.f32.mrb[24].mxu0 }
 0xad2   : > { %v5070_v52 = vpop.f32.mrb[25].mxu0 }
 0xb56   : > { %v3480_v53 = vpop.xlane.xlu1 %3479 }
 0xb57   : > { %v3482_v54 = vsub.f32 %v3472_v48, %v3480_v53  ;;  %v4755_v53 = vld [vmem:[%s997_s29] ss:$0 sm:$0xff] }
 0xb59   : > { %v3485_v55 = vmul.f32 1.442695, %v3482_v54 }
 0xb5b   : > { %5276 = vpow2.f32 %v3485_v55 }
 0xb65   : > { %v5277_v36 = vpop.eup %5276 }
 0xb66   : > { %v3490_v56 = vsel %vm1455_vm5, %v5277_v36, 0.0 }
 0xb67   : > { %3491 = vadd.xlane.f32.xlu1 %v3490_v56  ;;  %v4756_v56 = vld [vmem:[%s1000_s30] ss:$0 sm:$0xff] }
 0xbf4   : > { %v3492_v1 = vpop.xlane.xlu1 %3491 }
 0xbf5   : > { %5278 = vrcp.f32 %v3492_v1  ;;  %v5193_v1 = vpack.c.bf16 %v3924_v0, %v3923_v62  ;;  %v4776_v62 = vld [vmem:[%s6241_s28] ss:$0 sm:$0xff] (!%p4775_p5) }
 0xbff   : > { %v5279_v2 = vpop.eup %5278 }
 0xc00   : > { %v3496_v3 = vmul.f32 %v5279_v2, %v5277_v36  ;;  %v4757_v2 = vld [vmem:[%s1008_s26] ss:$0 sm:$0xff] }
 0xc02   : > { %5074 = vmatmul.mubr.msk.f32.vlgmr.msra.gmra.mrb[32].mxu1 %vm1478_vm6, %v3496_v3  ;;  %v3818_v3 = vcombine.low %v4757_v2, %v4757_v2  ;;  %v4088_v2 = vcombine.low (!%p4775_p5), %v4776_v62, %v4776_v62 }
 0xc03   : > { %5103 = vmatprep.mubr.msk.f32.mxu1 %vm5383_vm2, %v5382_v4  ;;  %5175 = vmatpush3.bf16.xpose.msk.msra.mxu1 %vm5950_vm9, %v5173_v23 }
 0xc04   : > { %5176 = vmatprep.subr.bf16.mxu1 %v5384_v39 }
 0xc0b   : > { %5179 = vmatpush3.bf16.xpose.msk.msra.mxu1 %vm5950_vm9, %v5177_v33 }
 0xc0c   : > { %5180 = vmatprep.subr.bf16.mxu1 %v5384_v39 }
 0xc13   : > { %5183 = vmatpush3.bf16.xpose.msk.msra.mxu1 %vm5950_vm9, %v5181_v37 }
 0xc14   : > { %5184 = vmatprep.subr.bf16.mxu1 %v5384_v39 }
 0xc1b   : > { %5187 = vmatpush3.bf16.xpose.msk.msra.mxu1 %vm5950_vm9, %v5185_v41 }
 0xcd5   : > { %v3643_v8 = vpop.f32.mrb[32].mxu1 }
 0xcd6   : > { %v3654_v9 = vcombine.low %v3568_v50, %v3643_v8  ;;  %v5075_v10 = vpop.f32.mrb[33].mxu1 }
 0xcd8   : > { %5085 = vmatmul.mubr.msk.f32.vlgmr.msra.gmra.mrb[26].mxu0 %vm1306_vm3, %v3654_v9 }
 0xcd9   : > { %5114 = vmatprep.mubr.msk.f32.mxu0 %vm5383_vm2, %v5382_v4 }
 0xdab   : > { %v3735_v51 = vpop.f32.mrb[26].mxu0 }
 0xdac   : > { %v3740_v12 = vcombine.high %v3735_v51, %v3735_v51  ;;  %v3742_v13 = vadd.f32 %v3735_v51, %v3067_v44  ;;  %v5086_v14 = vpop.f32.mrb[27].mxu0  ;;  %v5189_v44 = vpack.c.bf16 %v3922_v43, %v3921_v42  ;;  %v4774_v42 = vld [vmem:[%s1022_s5] ss:$0 sm:$0xff] }
 0xdad   : > { %v4767_v14 = vld [vmem:[%s1016_s21] ss:$0 sm:$0xff] }
 0xdae   : > { %v3743_v15 = vadd.f32 %v3740_v12, %v3068_v46  ;;  %v3751_v16 = vadd.f32 %v4754_v11, %v3742_v13  ;;  %5191 = vmatpush3.bf16.xpose.msk.msra.mxu0 %vm5977_vm11, %v5189_v44 }
 0xdaf   : > { %5192 = vmatprep.subr.bf16.mxu0 %v5384_v39 }
 0xdb0   : > { %v3753_v17 = vadd.f32 %v3751_v16, %v5630_v5  ;;  %v3752_v18 = vadd.f32 %v4754_v11, %v3743_v15  ;;  %v3934_v15 = vcombine.low %v4767_v14, %v4767_v14 }
 0xdb2   : > { %v3758_v19 = vsel %vm3757_vm8, %v3753_v17, 0.0  ;;  %v3754_v4 = vadd.f32 %v3752_v18, %v5632_v6 }
 0xdb3   : > { %3759 = vadd.xlane.f32.xlu0 %v3758_v19 }
 0xdb4   : > { %v3761_v20 = vsel %vm3757_vm8, %v3754_v4, 0.0 }
 0xdb5   : > { %3762 = vadd.xlane.f32.xlu1 %v3761_v20 }
 0xdb6   : > { %5195 = vmatpush3.bf16.xpose.msk.msra.mxu0 %vm5977_vm11, %v5193_v1 }
 0xe40   : > { %v3760_v5 = vpop.xlane.xlu0 %3759 }
 0xe41   : > { %v3765_v6 = vmul.f32 0.03125, %v3760_v5 }
 0xe42   : > { %v3763_v24 = vpop.xlane.xlu1 %3762 }
 0xe43   : > { %v3767_v25 = vsub.f32 %v3753_v17, %v3765_v6  ;;  %v3766_v26 = vmul.f32 0.03125, %v3763_v24 }
 0xe45   : > { %v3768_v27 = vsub.f32 %v3754_v4, %v3766_v26  ;;  %v3769_v57 = vmul.f32 %v3767_v25, %v3767_v25 }
 0xe47   : > { %v3771_v61 = vsel %vm3757_vm8, %v3769_v57, 0.0  ;;  %v3770_v63 = vmul.f32 %v3768_v27, %v3768_v27 }
 0xe48   : > { %3772 = vadd.xlane.f32.xlu0 %v3771_v61 }
 0xe49   : > { %v3774_v29 = vsel %vm3757_vm8, %v3770_v63, 0.0 }
 0xe4a   : > { %3775 = vadd.xlane.f32.xlu1 %v3774_v29 }
 0xed5   : > { %v3773_v46 = vpop.xlane.xlu0 %3772 }
 0xed6   : > { %v3777_v47 = vmul.f32 0.03125, %v3773_v46 }
 0xed7   : > { %v3776_v48 = vpop.xlane.xlu1 %3775 }
 0xed8   : > { %v3779_v49 = vadd.f32 1e-05, %v3777_v47  ;;  %v3778_v7 = vmul.f32 0.03125, %v3776_v48  ;;  %v4177_v48 = vld [vmem:[%s6237_s9] sm:$0xff] (!%p4775_p5) }
 0xeda   : > { %5280 = vrsqrt.f32 %v3779_v49  ;;  %v3780_v50 = vadd.f32 1e-05, %v3778_v7  ;;  %v4178_v49 = vld [vmem:[%s6237_s9 + $0x8] sm:$0x3] (!%p4775_p5)  ;;  %v4076_v7 = vld [vmem:[%s6238_s19] sm:$0xff] (!%p4775_p5) }
 0xedc   : > { %5282 = vrsqrt.f32 %v3780_v50  ;;  %v5385_v50 = vmov (!%p4775_p5), 0.0|0.0  }
 0xedd   : > { %5200 = vmatprep.subr.bf16.mxu1 (!%p4775_p5), %v5385_v50  ;;  %5196 = vmatprep.subr.bf16.mxu0 (!%p4775_p5), %v5385_v50 }
 0xee4   : > { %v5281_v52 = vpop.eup %5280 }
 0xee5   : > { %v3783_v54 = vmul.f32 %v5281_v52, %v3767_v25  ;;  %v5201_v52 = vpack.c.bf16 (!%p4775_p5), %v4178_v49, %v4177_v48 }
 0xee6   : > { %v5283_v55 = vpop.eup %5282 }
 0xee7   : > { %v3791_v39 = vmul.f32 %v4755_v53, %v3783_v54  ;;  %v3784_v36 = vmul.f32 %v5283_v55, %v3768_v27  ;;  %v5387_v55 = vmov (!%p4775_p5), 0.0  }
 0xee9   : > { %v3792_v58 = vmul.f32 %v4755_v53, %v3784_v36  ;;  %v3799_v59 = vadd.f32 %v4756_v56, %v3791_v39  ;;  %v4077_v53 = vld [vmem:[%s6238_s19 + $0x8] sm:$0xff] (!%p4775_p5)  ;;  %v4269_v39 = vld [vmem:[%s6239_s4] sm:$0xff] (!%p4775_p5) }
 0xeea   : > { %v5197_v54 = vpack.c.bf16 (!%p4775_p5), %v4077_v53, %v4076_v7  ;;  %v4270_v36 = vld [vmem:[%s6239_s4 + $0x8] sm:$0x3] (!%p4775_p5) }
 0xeeb   : > { %v3800_v60 = vadd.f32 %v4756_v56, %v3792_v58  ;;  %v5205_v58 = vpack.c.bf16 (!%p4775_p5), %v4270_v36, %v4269_v39 }
 0xeed   : > { %v3817_v28 = vcombine.low %v3799_v59, %v3800_v60 }
 0xeef   : > { %5104 = vmatmul.mubr.msk.f32.vlgmr.msra.gmra.mrb[34].mxu1 %vm1048_vm1, %v3817_v28 }
 0xef0   : > { %5130 = vmatprep.mubr.msk.f32.mxu1 (!%p4775_p5), %vm5386_vm12, %v5387_v55  ;;  %5203 = vmatpush3.bf16.xpose.msk.msra.mxu1 (!%p4775_p5), %vm5950_vm9, %v5201_v52 }
 0xef1   : > { %5204 = vmatprep.subr.bf16.mxu1 (!%p4775_p5), %v5385_v50 }
 0xfc2   : > { %v3912_v8 = vpop.f32.mrb[34].mxu1 }
 0xfc3   : > { %v3913_v9 = vadd.f32 %v3912_v8, %v3818_v3  ;;  %v5105_v10 = vpop.f32.mrb[35].mxu1  ;;  %v4785_v3 = vld [vmem:[%s6242_s7] ss:$0 sm:$0xff] (!%p4775_p5) }
 0xfc4   : > { %v4277_v10 = vcombine.low (!%p4775_p5), %v4785_v3, %v4785_v3 }
 0xfc5   : > { %v3917_v51 = vcombine.high %v3913_v9, %v3913_v9  ;;  %v3919_v11 = vmax.f32 %v3913_v9, 0.0 }
 0xfc7   : > { %v3920_v12 = vmax.f32 %v3917_v51, 0.0 }
 0xfc9   : > { %v3933_v13 = vcombine.low %v3919_v11, %v3920_v12 }
 0xfcb   : > { %5115 = vmatmul.mubr.msk.f32.vlgmr.msra.gmra.mrb[28].mxu0 %vm3936_vm10, %v3933_v13 }
 0xfcc   : > { %5123 = vmatprep.mubr.msk.f32.mxu0 (!%p4775_p5), %vm5386_vm12, %v5387_v55  ;;  %5199 = vmatpush3.bf16.xpose.msk.msra.mxu0 (!%p4775_p5), %vm5950_vm9, %v5197_v54 }
 0xfcd   : > { %5121 = vmatprep.subr.mxu0 (!%p4775_p5), %v5387_v55 }
0x109e   : > { %v4017_v16 = vpop.f32.mrb[28].mxu0 }
0x109f   : > { %v4018_v17 = vadd.f32 %v4017_v16, %v3934_v15  ;;  %v5116_v18 = vpop.f32.mrb[29].mxu0 }
0x10a1   : > { %v4022_v19 = vcombine.high %v4018_v17, %v4018_v17  ;;  %v4024_v4 = vadd.f32 %v4018_v17, %v3799_v59  ;;  %v4078_v59 = vld [vmem:[%s6238_s19 + $0x10] sm:$0xf] (!%p4775_p5) }
0x10a2   : > { %5122 = vmatpush3.xpose.msk.msra.mxu0 (!%p4775_p5), %vm1048_vm1, %v4078_v59 }
0x10a3   : > { %v4028_v20 = vsel %vm3757_vm8, %v4024_v4, 0.0  ;;  %v4025_v30 = vadd.f32 %v4022_v19, %v3800_v60  ;;  %v4781_v60 = vld [vmem:[%s6240_s8] ss:$0 sm:$0xff] (!%p4775_p5) }
0x10a4   : > { %4029 = vadd.xlane.f32.xlu0 %v4028_v20  ;;  %v4185_v28 = vcombine.low (!%p4775_p5), %v4781_v60, %v4781_v60 }
0x10a5   : > { %v4031_v21 = vsel %vm3757_vm8, %v4025_v30, 0.0 }
0x10a6   : > { %4032 = vadd.xlane.f32.xlu1 %v4031_v21 }
0x1131   : > { %v4030_v23 = vpop.xlane.xlu0 %4029 }
0x1132   : > { %v4034_v5 = vmul.f32 0.03125, %v4030_v23 }
0x1133   : > { %v4033_v6 = vpop.xlane.xlu1 %4032 }
0x1134   : > { %v4036_v24 = vsub.f32 %v4024_v4, %v4034_v5  ;;  %v4035_v25 = vmul.f32 0.03125, %v4033_v6 }
0x1136   : > { %v4037_v26 = vsub.f32 %v4025_v30, %v4035_v25  ;;  %v4038_v27 = vmul.f32 %v4036_v24, %v4036_v24 }
0x1138   : > { %v4040_v57 = vsel %vm3757_vm8, %v4038_v27, 0.0  ;;  %v4039_v61 = vmul.f32 %v4037_v26, %v4037_v26 }
0x1139   : > { %4041 = vadd.xlane.f32.xlu0 %v4040_v57 }
0x113a   : > { %v4043_v63 = vsel %vm3757_vm8, %v4039_v61, 0.0 }
0x113b   : > { %4044 = vadd.xlane.f32.xlu1 %v4043_v63 }
0x11c6   : > { %v4042_v29 = vpop.xlane.xlu0 %4041 }
0x11c7   : > { %v4046_v31 = vmul.f32 0.03125, %v4042_v29 }
0x11c8   : > { %v4045_v32 = vpop.xlane.xlu1 %4044 }
0x11c9   : > { %v4048_v33 = vadd.f32 1e-05, %v4046_v31  ;;  %v4047_v34 = vmul.f32 0.03125, %v4045_v32 }
0x11cb   : > { %5284 = vrsqrt.f32 %v4048_v33  ;;  %v4049_v35 = vadd.f32 1e-05, %v4047_v34 }
0x11cd   : > { %5286 = vrsqrt.f32 %v4049_v35 }
0x11d5   : > { %v5285_v37 = vpop.eup %5284 }
0x11d6   : > { %v4052_v40 = vmul.f32 %v5285_v37, %v4036_v24 }
0x11d7   : > { %v5287_v41 = vpop.eup %5286 }
0x11d8   : > { %v4060_v43 = vmul.f32 %v4773_v38, %v4052_v40  ;;  %v4053_v44 = vmul.f32 %v5287_v41, %v4037_v26  ;;  %4075 = sbr.rel (%p4775_p5) target bundleno = 4801 (0x12c1), region = 124 }
0x11da   : > { %v4068_v45 = vadd.f32 %v4774_v42, %v4060_v43  ;;  %v4061_v46 = vmul.f32 %v4773_v38, %v4053_v44 }
0x11dc   : > { %4070 = vst.msk [vmem:[#allocation2] sm:$0xf] %vm3757_vm8, %v4068_v45  ;;  %v4069_v47 = vadd.f32 %v4774_v42, %v4061_v46 }
0x11de   : > { %4071 = vst.msk [vmem:[#allocation2 + $0x4] sm:$0xf] %vm3757_vm8, %v4069_v47  ;;  %v4087_v56 = vcombine.low (!%p4775_p5), %v4068_v45, %v4069_v47 }
0x11e0   : > { %5131 = vmatmul.mubr.msk.f32.vlgmr.msra.gmra.mrb[0].mxu1 %vm1048_vm1, %v4087_v56  ;;  %5124 = vmatmul.mubr.msk.f32.vlgmr.msra.gmra.mrb[0].mxu0 %vm1048_vm1, %v4087_v56 }
0x11e1   : > { %5207 = vmatpush3.bf16.xpose.msk.msra.mxu1 %vm5950_vm9, %v5205_v58  ;;  %5137 = vmatprep.mubr.msk.f32.mxu1 %vm5386_vm12, %v5387_v55 }
0x11e8   : > { %5138 = vmatmul.mubr.msk.f32.vlgmr.msra.gmra.mrb[2].mxu1 %vm1048_vm1, %v4087_v56 }
0x12b3   : > { %v4259_v0 = vpop.f32.mrb[0].mxu1  ;;  %v4167_v9 = vpop.f32.mrb[0].mxu0 }
0x12b4   : > { %v4260_v22 = vadd.f32 %v4259_v0, %v4185_v28  ;;  %v5132_v1 = vpop.f32.mrb[1].mxu1  ;;  %v4168_v51 = vadd.f32 %v4167_v9, %v4088_v2  ;;  %v5125_v11 = vpop.f32.mrb[1].mxu0 }
0x12b6   : > { %v4264_v8 = vcombine.high %v4260_v22, %v4260_v22  ;;  %4267 = vst.msk [vmem:[#allocation5] sm:$0xf] %vm4266_vm13, %v4260_v22  ;;  %v4172_v12 = vcombine.high %v4168_v51, %v4168_v51 }
0x12b7   : > { %4175 = vst.msk [vmem:[#allocation3] sm:$0xf] %vm4174_vm14, %v4168_v51 }
0x12b8   : > { %4268 = vst.msk [vmem:[#allocation5 + $0x4] sm:$0xf] %vm4266_vm13, %v4264_v8 }
0x12b9   : > { %4176 = vst.msk [vmem:[#allocation3 + $0x4] sm:$0xf] %vm4174_vm14, %v4172_v12 }
0x12bb   : > { %v4351_v13 = vpop.f32.mrb[2].mxu1 }
0x12bc   : > { %v4352_v14 = vadd.f32 %v4351_v13, %v4277_v10  ;;  %v5139_v15 = vpop.f32.mrb[3].mxu1 }
0x12be   : > { %v4356_v16 = vcombine.high %v4352_v14, %v4352_v14  ;;  %4358 = vst.msk [vmem:[#allocation7] sm:$0xf] %vm4266_vm13, %v4352_v14 }
0x12c0   : > { %4359 = vst.msk [vmem:[#allocation7 + $0x4] sm:$0xf] %vm4266_vm13, %v4356_v16 }
0x12c1 PF: > { %p5222_p6 = scmp.eq.s32.totalorder %s5534_s3, 1  ;;  %s5388_s5 = smov [#allocation5]  }
0x12c2   : > { %s4379_s20 = sshll.u32 %s5388_s5, 4  ;;  %s5389_s22 = smov [#allocation3]   ;;  %s4380_s20 = int_to_ptr.vmem [resolvable:$true] %s4379_s20 }
0x12c3   : > { %s4366_s24 = sshll.u32 %s5389_s22, 4  ;;  %s5288_s25 = scalar_lea.vmem %s4380_s20, 128  ;;  %s4367_s24 = int_to_ptr.vmem [resolvable:$true] %s4366_s24 }
0x12c4   : > { %p5289_p7 = scmp.ne.s32.totalorder %s4380_s20, %s5288_s25  ;;  %p5295_p10 = scmp.lt.s32.totalorder %s4380_s20, %s4380_s20 }
0x12c5   : > { %p5296_p11 = scmp.lt.s32.totalorder %s5288_s25, %s5288_s25 }
0x12c6   : > { %p5290_p8 = pnand %p5289_p7, %p5222_p6 }
0x12c7   : > { %p5297_p12 = por %p5296_p11, %p5295_p10 }
0x12c8   : > { %p5291_p9 = pneg %p5290_p8 }
0x12ca   : > { %p5298_p13 = pnand %p5297_p12, %p5291_p9 }
0x12cc   : > { %5301 = shalt.err (!%p5298_p13)
}
0x12cd   : > { %s6243_s30 = sld [smem:[#allocation34_spill]] }
0x12d3   : > { %s5302_s27 = scalar_lea.hbm %s6243_s30, 128 }
0x12d4   : > { %p5303_p0 = scmp.ne.s32.totalorder %s6243_s30, %s5302_s27  ;;  %p5308_p3 = scmp.lt.u32.totalorder %s5302_s27, %s6243_s30 }
0x12d6   : > { %p5304_p1 = pnand %p5303_p0, %p5222_p6 }
0x12d8   : > { %p5305_p2 = pneg %p5304_p1 }
0x12da   : > { %p5310_p4 = pnand %p5308_p3, %p5305_p2 }
0x12dc   : > { %5313 = shalt.err (!%p5310_p4)
}
0x12dd   : > { %s5390_s0 = smov 64   ;;  %s5391_s28 = smov 4  }
0x12de   : > { %5213 = dma.vmem_to_hbm [thread:$0]  (%p5222_p6), %s4380_s20, 128, %s6243_s30, [#allocation6], %s5390_s0, %s5390_s0, %s5391_s28  }
0x12df   : > { %s5314_s7 = scalar_lea.vmem %s4367_s24, 128  ;;  %p5321_p9 = scmp.lt.s32.totalorder %s4367_s24, %s4367_s24 }
0x12e0   : > { %p5315_p5 = scmp.ne.s32.totalorder %s4367_s24, %s5314_s7  ;;  %p5322_p10 = scmp.lt.s32.totalorder %s5314_s7, %s5314_s7 }
0x12e2   : > { %p5316_p7 = pnand %p5315_p5, %p5222_p6  ;;  %p5323_p11 = por %p5322_p10, %p5321_p9 }
0x12e4   : > { %p5317_p8 = pneg %p5316_p7 }
0x12e6   : > { %p5324_p12 = pnand %p5323_p11, %p5317_p8 }
0x12e8   : > { %5327 = shalt.err (!%p5324_p12)
}
0x12e9   : > { %s6244_s25 = sld [smem:[#allocation33_spill]] }
0x12ef   : > { %s5328_s29 = scalar_lea.hbm %s6244_s25, 128 }
0x12f0   : > { %p5329_p13 = scmp.ne.s32.totalorder %s6244_s25, %s5328_s29  ;;  %p5334_p2 = scmp.lt.u32.totalorder %s5328_s29, %s6244_s25 }
0x12f2   : > { %p5330_p0 = pnand %p5329_p13, %p5222_p6 }
0x12f4   : > { %p5331_p1 = pneg %p5330_p0 }
0x12f6   : > { %p5336_p3 = pnand %p5334_p2, %p5331_p1 }
0x12f8   : > { %5339 = shalt.err (!%p5336_p3)
}
0x12f9   : > { %5211 = dma.vmem_to_hbm [thread:$0]  (%p5222_p6), %s4367_s24, 128, %s6244_s25, [#allocation4], %s5390_s0, %s5390_s0, %s5391_s28  }
0x12fa   : > { %s5392_s6 = smov [#allocation7]  }
0x12fb   : > { %s4392_s10 = sshll.u32 %s5392_s6, 4  ;;  %s4393_s10 = int_to_ptr.vmem [resolvable:$true] %s4392_s10 }
0x12fc   : > { %s5340_s23 = scalar_lea.vmem %s4393_s10, 128  ;;  %p5347_p8 = scmp.lt.s32.totalorder %s4393_s10, %s4393_s10 }
0x12fd   : > { %p5341_p4 = scmp.ne.s32.totalorder %s4393_s10, %s5340_s23  ;;  %p5348_p9 = scmp.lt.s32.totalorder %s5340_s23, %s5340_s23 }
0x12ff   : > { %p5342_p5 = pnand %p5341_p4, %p5222_p6  ;;  %p5349_p10 = por %p5348_p9, %p5347_p8 }
0x1301   : > { %p5343_p7 = pneg %p5342_p5 }
0x1303   : > { %p5350_p11 = pnand %p5349_p10, %p5343_p7 }
0x1305   : > { %5353 = shalt.err (!%p5350_p11)
}
0x1306   : > { %s6245_s22 = sld [smem:[#allocation35_spill]] }
0x130c   : > { %s5354_s29 = scalar_lea.hbm %s6245_s22, 128 }
0x130d   : > { %p5355_p12 = scmp.ne.s32.totalorder %s6245_s22, %s5354_s29  ;;  %p5360_p1 = scmp.lt.u32.totalorder %s5354_s29, %s6245_s22 }
0x130f   : > { %p5356_p13 = pnand %p5355_p12, %p5222_p6 }
0x1311   : > { %p5357_p0 = pneg %p5356_p13 }
0x1313   : > { %p5362_p2 = pnand %p5360_p1, %p5357_p0 }
0x1315   : > { %5365 = shalt.err (!%p5362_p2)
}
0x1316   : > { %5215 = dma.vmem_to_hbm [thread:$0]  (%p5222_p6), %s4393_s10, 128, %s6245_s22, [#allocation6], %s5390_s0, %s5390_s0, %s5391_s28  }
0x1317   : > { %5371 = dma.done.wait (%p5222_p6), [#allocation4], 128  }
0x1318   : > { %5373 = vsyncadd (%p5222_p6), [#allocation4], 4294967168 }
0x1319   : > { %5375 = dma.done.wait (%p5222_p6), [#allocation6], 256  }
0x131a   : > { %5377 = vsyncadd (%p5222_p6), [#allocation6], 4294967040 }
0x131b PF: > { %s6246_s8 = sld [smem:[#allocation10_spill]] }
0x1321   : > { %s39_s27 = sadd.s32 1, %s6246_s8  }
0x1322   : > { %p36_p3 = scmp.ge.s32.totalorder %s39_s27, 4  }
0x1324   :  { %38 = sbr.rel (!%p36_p3) target bundleno = 23 (0x17), region = 233 }
0x132b   :  { %4416 = vsyncpa [#allocation4], 1 }
0x132c   :  { %4418 = vsyncpa [#allocation4 + $0x1], 1 }
0x132d   :  { %4419 = vsyncpa [#allocation6], 1 }

// kernel: hynt_forward.2
= control target key start
LH: loop header
LB: loop body
LE: loop exit
PB: predicated region body
PF: predicated region fallthrough
CT: control target
= control target key end

     0   :  { %s8698_s6 = smov 1   ;;  %s8699_s10 = smov 2   ;;  %s9823_s0 = inlined_call_operand.smem [shape: u32[30], index: -1, kind: input, shape index: {}] }
   0x1   :  { %s8744_s5 = sld [smem:[%s9823_s0]]   ;;  %s8700_s14 = smov 3  }
   0x2   :  { %s8749_s9 = sld [smem:[%s9823_s0 + %s8698_s6]]   ;;  %s8701_s18 = smov 4  }
   0x3   :  { %s8754_s13 = sld [smem:[%s9823_s0 + %s8699_s10]]   ;;  %s8702_s22 = smov 5  }
   0x4   :  { %s8759_s17 = sld [smem:[%s9823_s0 + %s8700_s14]]   ;;  %s8703_s26 = smov 6  }
   0x5   :  { %s8764_s21 = sld [smem:[%s9823_s0 + %s8701_s18]]   ;;  %s8704_s30 = smov 7  }
   0x6   :  { %s8769_s25 = sld [smem:[%s9823_s0 + %s8702_s22]]   ;;  %s8705_s4 = smov 8  }
   0x7   :  { %9843 = sst [smem:[#allocation2_spill]] %s8744_s5  ;;  %s8706_s10 = smov 9  }
   0x8   :  { %9844 = sst [smem:[#allocation3_spill]] %s8749_s9  ;;  %s8707_s15 = smov 10  }
   0x9   :  { %9845 = sst [smem:[#allocation4_spill]] %s8754_s13  ;;  %s8708_s20 = smov 11  }
   0xa   :  { %9846 = sst [smem:[#allocation5_spill]] %s8759_s17  ;;  %s8710_s1 = smov 13  }
   0xb   :  { %9847 = sst [smem:[#allocation6_spill]] %s8764_s21  ;;  %s8711_s7 = smov 14  }
   0xc   :  { %9848 = sst [smem:[#allocation7_spill]] %s8769_s25  ;;  %s8713_s22 = smov 16  }
   0xd   :  { %s8774_s29 = sld [smem:[%s9823_s0 + %s8703_s26]]   ;;  %s8709_s26 = smov 12  }
   0xe   :  { %s8779_s3 = sld [smem:[%s9823_s0 + %s8704_s30]]   ;;  %s8714_s28 = smov 17  }
   0xf   :  { %s8784_s8 = sld [smem:[%s9823_s0 + %s8705_s4]]  }
  0x10   :  { %s8789_s14 = sld [smem:[%s9823_s0 + %s8706_s10]]  }
  0x11   :  { %s8794_s19 = sld [smem:[%s9823_s0 + %s8707_s15]]   ;;  %s8712_s15 = smov 15  }
  0x12   :  { %s8799_s24 = sld [smem:[%s9823_s0 + %s8708_s20]]  }
  0x13   :  { %9849 = sst [smem:[#allocation8_spill]] %s8774_s29 }
  0x14   :  { %9850 = sst [smem:[#allocation9_spill]] %s8779_s3 }
  0x15   :  { %9851 = sst [smem:[#allocation10_spill]] %s8784_s8 }
  0x16   :  { %9852 = sst [smem:[#allocation11_spill]] %s8789_s14 }
  0x17   :  { %9853 = sst [smem:[#allocation12_spill]] %s8794_s19 }
  0x18   :  { %9854 = sst [smem:[#allocation13_spill]] %s8799_s24 }
  0x19   :  { %s8804_s30 = sld [smem:[%s9823_s0 + %s8709_s26]]  }
  0x1a   :  { %s8809_s6 = sld [smem:[%s9823_s0 + %s8710_s1]]  }
  0x1b   :  { %s8814_s12 = sld [smem:[%s9823_s0 + %s8711_s7]]   ;;  %s8715_s7 = smov 18  }
  0x1c   :  { %s8819_s20 = sld [smem:[%s9823_s0 + %s8712_s15]]   ;;  %s8716_s15 = smov 19  }
  0x1d   :  { %s8824_s27 = sld [smem:[%s9823_s0 + %s8713_s22]]   ;;  %s8717_s22 = smov 20  }
  0x1e   :  { %s8829_s4 = sld [smem:[%s9823_s0 + %s8714_s28]]   ;;  %s8718_s28 = smov 21  }
  0x1f   :  { %9855 = sst [smem:[#allocation14_spill]] %s8804_s30 }
  0x20   :  { %9856 = sst [smem:[#allocation15_spill]] %s8809_s6 }
  0x21   :  { %9857 = sst [smem:[#allocation16_spill]] %s8814_s12 }
  0x22   :  { %9858 = sst [smem:[#allocation17_spill]] %s8819_s20 }
  0x23   :  { %9859 = sst [smem:[#allocation18_spill]] %s8824_s27 }
  0x24   :  { %9860 = sst [smem:[#allocation19_spill]] %s8829_s4 }
  0x25   :  { %s8834_s30 = sld [smem:[%s9823_s0 + %s8715_s7]]   ;;  %s8719_s7 = smov 22  }
  0x26   :  { %s8839_s24 = sld [smem:[%s9823_s0 + %s8716_s15]]   ;;  %s8720_s15 = smov 23  }
  0x27   :  { %s8844_s8 = sld [smem:[%s9823_s0 + %s8717_s22]]   ;;  %s8721_s22 = smov 24  }
  0x28   :  { %s8849_s17 = sld [smem:[%s9823_s0 + %s8718_s28]]   ;;  %s8722_s28 = smov 25  }
  0x29   :  { %s8854_s14 = sld [smem:[%s9823_s0 + %s8719_s7]]   ;;  %s8723_s7 = smov 26  }
  0x2a   :  { %s8859_s21 = sld [smem:[%s9823_s0 + %s8720_s15]]   ;;  %s8724_s15 = smov 27  }
  0x2b   :  { %s8864_s5 = sld [smem:[%s9823_s0 + %s8721_s22]]   ;;  %s8725_s22 = smov 28  }
  0x2c   :  { %s8869_s19 = sld [smem:[%s9823_s0 + %s8722_s28]]   ;;  %s8726_s28 = smov 29  }
  0x2d   :  { %s8874_s25 = sld [smem:[%s9823_s0 + %s8723_s7]]   ;;  %s8891_s7 = smov 0  }
  0x2e   :  { %s8879_s13 = sld [smem:[%s9823_s0 + %s8724_s15]]  }
  0x2f   :  { %s8884_s9 = sld [smem:[%s9823_s0 + %s8725_s22]]  }
  0x30   :  { %s8889_s3 = sld [smem:[%s9823_s0 + %s8726_s28]]  }
  0x36   :  { %9861 = sst [smem:[#allocation20_spill]] %s8889_s3 }
  0x37 LB: > { %9862 = sst [smem:[#allocation21_spill]] %s8696_s7  ;;  %s7917_s10 = sadd.s32 4294967295, %s8696_s7   ;;  %s8696_s7 = sphi %s8891_s7, %s69_s7  }
  0x38   : > { %p7920_p0 = scmp.ge.s32.totalorder %s8696_s7, 1  ;;  %p945_p1 = scmp.lt.s32.totalorder %s8696_s7, 3 }
  0x3a   : > { %p946_p2 = pnand %p7920_p0, %p945_p1 }
  0x3c   : > { %949 = sbr.rel (%p946_p2) target bundleno = 5006 (0x138e), region = 136 }
  0x43   : > { %p1074_p3 = scmp.lt.s32.totalorder %s7917_s10, 1  ;;  %s9863_s6 = sld [smem:[#allocation15_spill]] }
  0x44   : > { %s9864_s12 = sld [smem:[#allocation16_spill]]  ;;  %s9865_s20 = sld [smem:[#allocation17_spill]] }
  0x45   : > { %s9866_s27 = sld [smem:[#allocation18_spill]]  ;;  %s9867_s4 = sld [smem:[#allocation19_spill]] }
  0x46   : > { %s8899_s0 = scalar_select %p1074_p3, %s7917_s10, 1 }
  0x47   : > { %p7936_p4 = scmp.ne.s32.totalorder %s7917_s10, 0 }
  0x48   : > { %s8106_s11 = sshll.u32 %s8899_s0, 5  ;;  %s7927_s15 = sshll.u32 %s8899_s0, 2  ;;  %vm1170_vm0 = vcmask (!%p7936_p4), 261120   ;;  %v1159_v3 = vlaneseq (!%p7936_p4)  ;;  %v8727_v4 = vmov (!%p7936_p4), 0.0|0.0   ;;  %vm8728_vm2 = vmmov (!%p7936_p4), 0  }
  0x49   : > { %s8904_s16 = scalar_lea.vmem %s9863_s6, %s8106_s11  ;;  %s8919_s28 = scalar_lea.vmem %s8834_s30, %s7927_s15  ;;  %8496 = vmatprep.subr.bf16.mxu0 (!%p7936_p4), %v8727_v4  ;;  %8512 = vmatprep.subr.bf16.mxu1 (!%p7936_p4), %v8727_v4  ;;  %vm8953_vm1 = vmpackc.low (!%p7936_p4), %vm1170_vm0, %vm1170_vm0  ;;  %v8729_v9 = vmov (!%p7936_p4), 0.0   ;;  %v8730_v10 = vmov (!%p7936_p4), 1966171168   ;;  %v8731_v39 = vmov (!%p7936_p4), 1983009808   ;;  %vm1738_vm3 = vcmask (!%p7936_p4), 253952  }
  0x4a   : > { %9868 = sst [smem:[#allocation22_spill]] %s8904_s16  ;;  %s8907_s18 = scalar_lea.vmem %s9864_s12, %s8106_s11  ;;  %8257 = vmatprep.mubr.msk.f32.mxu1 (!%p7936_p4), %vm8728_vm2, %v8729_v9  ;;  %8235 = vmatprep.mubr.msk.f32.mxu0 (!%p7936_p4), %vm8728_vm2, %v8729_v9  ;;  %v1157_v11 = vunpack.c.l.s4 (!%p7936_p4), %v8730_v10  ;;  %v1160_v12 = vshrl.u32 (!%p7936_p4), %v1159_v3, 7  ;;  %v1534_v40 = vunpack.c.l.s4 (!%p7936_p4), %v8731_v39  ;;  %vm1741_vm4 = vcmask (!%p7936_p4), 254976  }
  0x4b   : > { %9869 = sst [smem:[#allocation23_spill]] %s8907_s18  ;;  %s8910_s22 = scalar_lea.vmem %s9865_s20, %s8106_s11 }
  0x4c   : > { %9870 = sst [smem:[#allocation24_spill]] %s8910_s22  ;;  %s8913_s23 = scalar_lea.vmem %s9866_s27, %s7927_s15  ;;  %v1158_v16 = vunpack.c.0.s8 (!%p7936_p4), %v1157_v11  ;;  %v1535_v47 = vunpack.c.0.s8 (!%p7936_p4), %v1534_v40 }
  0x4d   : > { %s8916_s26 = scalar_lea.vmem %s9867_s4, %s7927_s15  ;;  %s8109_s1 = sshll.u32 %s8899_s0, 7 }
  0x4e   : > { %s8925_s7 = scalar_lea.vmem %s8839_s24, %s8109_s1  ;;  %s8110_s3 = sshll.u32 %s8899_s0, 6  ;;  %v8976_v22 = vsub.s32 (!%p7936_p4), %v1158_v16, %v1160_v12  ;;  %v1538_v53 = vsub.s32 (!%p7936_p4), %v1535_v47, %v1160_v12 }
  0x4f   : > { %s8933_s29 = scalar_lea.vmem %s8859_s21, %s8110_s3  ;;  %s8938_s18 = scalar_lea.vmem %s8869_s19, %s8106_s11 }
  0x50   : > { %1140 = sbr.rel (%p7936_p4) target bundleno = 356 (0x164), region = 140  ;;  %s9871_s4 = sld [smem:[#allocation8_spill]] (!%p7936_p4) }
  0x51   : > { %s9872_s15 = sld [smem:[#allocation9_spill]] (!%p7936_p4)  ;;  %s9873_s3 = sld [smem:[#allocation3_spill]] (!%p7936_p4) }
  0x52   : > { %s9876_s10 = sld [smem:[#allocation4_spill]] (!%p7936_p4)  ;;  %s9877_s11 = sld [smem:[#allocation7_spill]] (!%p7936_p4) }
  0x53   : > { %s9878_s1 = sld [smem:[#allocation12_spill]] (!%p7936_p4)  ;;  %s9879_s27 = sld [smem:[#allocation2_spill]] (!%p7936_p4) }
  0x54   : > { %s9880_s22 = sld [smem:[#allocation6_spill]] (!%p7936_p4)  ;;  %s9881_s20 = sld [smem:[#allocation11_spill]] (!%p7936_p4) }
  0x55   : > { %s9882_s12 = sld [smem:[#allocation5_spill]] (!%p7936_p4)  ;;  %s9883_s16 = sld [smem:[#allocation10_spill]] (!%p7936_p4) }
  0x56   : > { %v1149_v0 = vld [vmem:[%s9871_s4] sm:$0xff] (!%p7936_p4)  ;;  %v1150_v1 = vld [vmem:[%s9871_s4 + $0x8] sm:$0xff] (!%p7936_p4)  ;;  %v1151_v13 = vld [vmem:[%s9871_s4 + $0x10] sm:$0xff] (!%p7936_p4)  ;;  %s9884_s6 = sld [smem:[#allocation20_spill]] (!%p7936_p4)  ;;  %s9885_s2 = sld [smem:[#allocation13_spill]] (!%p7936_p4) }
  0x57   : > { %v1383_v2 = vld [vmem:[%s9872_s15] sm:$0xff]  ;;  %v8497_v5 = vpack.c.bf16 %v1150_v1, %v1149_v0  ;;  %v1384_v7 = vld [vmem:[%s9872_s15 + $0x8] sm:$0xff]  ;;  %v1152_v14 = vld [vmem:[%s9871_s4 + $0x18] sm:$0xff] }
  0x58   : > { %v8513_v8 = vpack.c.bf16 %v1384_v7, %v1383_v2  ;;  %v1147_v15 = vld [vmem:[%s9873_s3] sm:$0x1]  ;;  %v1382_v18 = vld [vmem:[%s9876_s10 + $0x1] sm:$0x1]  ;;  %v1385_v20 = vld [vmem:[%s9872_s15 + $0x10] sm:$0xff]  ;;  %v8501_v24 = vpack.c.bf16 %v1152_v14, %v1151_v13 }
  0x59   : > { %8499 = vmatpush3.bf16.xpose.msk.msra.mxu0 %vm8953_vm1, %v8497_v5  ;;  %v1381_v17 = vld [vmem:[%s9876_s10] sm:$0x1]  ;;  %v1148_v19 = vld [vmem:[%s9873_s3 + $0x1] sm:$0x1]  ;;  %v1386_v21 = vld [vmem:[%s9872_s15 + $0x18] sm:$0xff] }
  0x5a   : > { %8515 = vmatpush3.bf16.xpose.msk.msra.mxu1 %vm8953_vm1, %v8513_v8  ;;  %8500 = vmatprep.subr.bf16.mxu0 %v8727_v4  ;;  %v1155_v23 = vcombine.low %v1147_v15, %v1148_v19  ;;  %v1389_v25 = vcombine.low %v1381_v17, %v1382_v18  ;;  %v8517_v26 = vpack.c.bf16 %v1386_v21, %v1385_v20  ;;  %v1143_v29 = vld [vmem:[%s9877_s11] sm:$0xff]  ;;  %v1144_v30 = vld [vmem:[%s9877_s11 + $0x8] sm:$0xff]  ;;  %v1145_v41 = vld [vmem:[%s9877_s11 + $0x10] sm:$0xff] }
  0x5b   : > { %8516 = vmatprep.subr.bf16.mxu1 %v8727_v4  ;;  %v1526_v31 = vld [vmem:[%s9878_s1] sm:$0xff]  ;;  %v1527_v32 = vld [vmem:[%s9878_s1 + $0x8] sm:$0xff]  ;;  %v8505_v35 = vpack.c.bf16 %v1144_v30, %v1143_v29  ;;  %v1146_v42 = vld [vmem:[%s9877_s11 + $0x18] sm:$0xff] }
  0x5c   : > { %v1162_v27 = vrot.slane %v1155_v23, %v8976_v22  ;;  %v1396_v28 = vrot.slane %v1389_v25, %v8976_v22  ;;  %v8521_v36 = vpack.c.bf16 %v1527_v32, %v1526_v31  ;;  %v1141_v37 = vld [vmem:[%s9879_s27] sm:$0x1]  ;;  %v1142_v38 = vld [vmem:[%s9879_s27 + $0x1] sm:$0x1]  ;;  %v1528_v43 = vld [vmem:[%s9878_s1 + $0x10] sm:$0xff]  ;;  %v8509_v46 = vpack.c.bf16 %v1146_v42, %v1145_v41 }
  0x5d   : > { %v1529_v44 = vld [vmem:[%s9878_s1 + $0x18] sm:$0xff]  ;;  %v1257_v45 = vcombine.low %v1141_v37, %v1142_v38  ;;  %v1524_v49 = vld [vmem:[%s9880_s22] sm:$0x3]  ;;  %v1525_v50 = vld [vmem:[%s9880_s22 + $0x2] sm:$0x3] }
  0x5e   : > { %v1169_v33 = vrot.slane %v1162_v27, %v8976_v22  ;;  %v1403_v34 = vrot.slane %v1396_v28, %v8976_v22  ;;  %v8525_v48 = vpack.c.bf16 %v1529_v44, %v1528_v43  ;;  %v1532_v52 = vcombine.low %v1524_v49, %v1525_v50  ;;  %v1520_v54 = vld [vmem:[%s9881_s20] sm:$0xff]  ;;  %v1521_v55 = vld [vmem:[%s9881_s20 + $0x8] sm:$0xff]  ;;  %v1522_v59 = vld [vmem:[%s9881_s20 + $0x10] sm:$0xff] }
  0x5f   : > { %v1264_v51 = vrot.slane %v1257_v45, %v8976_v22  ;;  %v8529_v58 = vpack.c.bf16 %v1521_v55, %v1520_v54  ;;  %v1523_v60 = vld [vmem:[%s9881_s20 + $0x18] sm:$0xff]  ;;  %v1518_v62 = vld [vmem:[%s9882_s12] sm:$0x3]  ;;  %v1519_v63 = vld [vmem:[%s9882_s12 + $0x2] sm:$0x3] }
  0x60   : > { %v1539_v57 = vrot.slane %v1532_v52, %v1538_v53  ;;  %v8533_v61 = vpack.c.bf16 %v1523_v60, %v1522_v59  ;;  %v1626_v0 = vcombine.low %v1518_v62, %v1519_v63  ;;  %v1515_v12 = vld [vmem:[%s9883_s16] sm:$0x1] }
  0x61   : > { %8503 = vmatpush3.bf16.xpose.msk.msra.mxu0 %vm8953_vm1, %v8501_v24  ;;  %v1271_v56 = vrot.slane %v1264_v51, %v8976_v22  ;;  %v7962_v20 = vld [vmem:[%s9885_s2] ss:$0 sm:$0xff] }
  0x62   : > { %8519 = vmatpush3.bf16.xpose.msk.msra.mxu1 %vm8953_vm1, %v8517_v26  ;;  %8504 = vmatprep.subr.bf16.mxu0 %v8727_v4  ;;  %v1633_v1 = vrot.slane %v1626_v0, %v1538_v53 }
  0x63   : > { %8520 = vmatprep.subr.bf16.mxu1 %v8727_v4 }
  0x68   : > { %8236 = vmatmul.mubr.msk.f32.vlgmr.msra.gmra.mrb[0].mxu0 %vm1170_vm0, %v1169_v33 }
  0x69   : > { %8258 = vmatmul.mubr.msk.f32.vlgmr.msra.gmra.mrb[0].mxu1 %vm1170_vm0, %v1403_v34  ;;  %8507 = vmatpush3.bf16.xpose.msk.msra.mxu0 %vm8953_vm1, %v8505_v35 }
  0x6a   : > { %8523 = vmatpush3.bf16.xpose.msk.msra.mxu1 %vm8953_vm1, %v8521_v36  ;;  %8508 = vmatprep.subr.bf16.mxu0 %v8727_v4 }
  0x6b   : > { %8524 = vmatprep.subr.bf16.mxu1 %v8727_v4  ;;  %8246 = vmatprep.mubr.msk.f32.mxu0 %vm8728_vm2, %v8729_v9 }
  0x6c   : > { %8268 = vmatprep.mubr.msk.f32.mxu1 %vm8728_vm2, %v8729_v9 }
  0x71   : > { %8511 = vmatpush3.bf16.xpose.msk.msra.mxu0 %vm8953_vm1, %v8509_v46 }
  0x72   : > { %8527 = vmatpush3.bf16.xpose.msk.msra.mxu1 %vm8953_vm1, %v8525_v48 }
  0x73   : > { %8528 = vmatprep.subr.bf16.mxu1 %v8727_v4 }
  0x78   : > { %8247 = vmatmul.mubr.msk.f32.vlgmr.msra.gmra.mrb[0].mxu0 %vm1170_vm0, %v1271_v56 }
  0x79   : > { %8269 = vmatmul.mubr.msk.f32.vlgmr.msra.gmra.mrb[2].mxu1 %vm1170_vm0, %v1539_v57 }
  0x7a   : > { %8531 = vmatpush3.bf16.xpose.msk.msra.mxu1 %vm8953_vm1, %v8529_v58  ;;  %8279 = vmatprep.mubr.msk.f32.mxu1 %vm8728_vm2, %v8729_v9 }
  0x7b   : > { %8532 = vmatprep.subr.bf16.mxu1 %v8727_v4 }
  0x82   : > { %8535 = vmatpush3.bf16.xpose.msk.msra.mxu1 %vm8953_vm1, %v8533_v61 }
  0x89   : > { %8280 = vmatmul.mubr.msk.f32.vlgmr.msra.gmra.mrb[2].mxu1 %vm1170_vm0, %v1633_v1 }
 0x13c   : > { %v1484_v2 = vpop.f32.mrb[0].mxu1 }
 0x13d   : > { %v8259_v3 = vpop.f32.mrb[1].mxu1  ;;  %v1495_v5 = vrot.slane %v1484_v2, %v8976_v22 }
 0x13f   : > { %v1496_v4 = vcombine.high %v1495_v5, %v1495_v5  ;;  %v1503_v10 = vrot.slane %v1495_v5, %v8976_v22 }
 0x141   : > { %v1510_v13 = vrot.slane %v1496_v4, %v8976_v22 }
 0x14b   : > { %v1352_v7 = vpop.f32.mrb[0].mxu0 }
 0x14c   : > { %v1363_v8 = vrot.slane %v1352_v7, %v8976_v22  ;;  %v8248_v9 = vpop.f32.mrb[1].mxu0 }
 0x14e   : > { %v1364_v11 = vcombine.high %v1363_v8, %v1363_v8  ;;  %v1371_v6 = vrot.slane %v1363_v8, %v8976_v22 }
 0x150   : > { %v1378_v14 = vrot.slane %v1364_v11, %v8976_v22  ;;  %v1513_v15 = vadd.f32 %v1503_v10, %v1371_v6 }
 0x152   : > { %v1514_v16 = vadd.f32 %v1510_v13, %v1378_v14  ;;  %v1516_v17 = vadd.f32 %v1515_v12, %v1513_v15 }
 0x154   : > { %v1517_v18 = vadd.f32 %v1515_v12, %v1514_v16  ;;  %1739 = vst.msk [vmem:[%s9884_s6] sm:$0x1] %vm1738_vm3, %v1516_v17 }
 0x156   : > { %1740 = vst.msk [vmem:[%s9884_s6 + $0x4] sm:$0x1] %vm1738_vm3, %v1517_v18 }
 0x15c   : > { %v1714_v19 = vpop.f32.mrb[2].mxu1 }
 0x15d   : > { %v1725_v21 = vrot.slane %v1714_v19, %v1538_v53  ;;  %v8281_v23 = vpop.f32.mrb[3].mxu1 }
 0x15f   : > { %v1726_v24 = vcombine.high %v1725_v21, %v1725_v21  ;;  %v1736_v25 = vadd.f32 %v7962_v20, %v1725_v21 }
 0x161   : > { %v1737_v26 = vadd.f32 %v7962_v20, %v1726_v24  ;;  %1742 = vst.msk [vmem:[%s9884_s6 + $0x1] sm:$0x3] %vm1741_vm4, %v1736_v25 }
 0x163   : > { %1743 = vst.msk [vmem:[%s9884_s6 + $0x5] sm:$0x3] %vm1741_vm4, %v1737_v26 }
 0x164 PF: > { %vm1907_vm5 = vcmask 261120   ;;  %s9886_s16 = sld [smem:[#allocation23_spill]]  ;;  %s9887_s1 = sld [smem:[#allocation22_spill]]  ;;  %v1760_v28 = vlaneseq  ;;  %v8732_v29 = vmov 0.0   ;;  %v8733_v30 = vmov 1966171168  }
 0x165   : > { %s9888_s3 = sld [smem:[#allocation20_spill]]  ;;  %8287 = vmatprep.subr.mxu1 %v8732_v29  ;;  %8282 = vmatprep.subr.mxu0 %v8732_v29  ;;  %v1758_v31 = vunpack.c.l.s4 %v8733_v30  ;;  %vm8734_vm6 = vmmov 0   ;;  %s9889_s6 = sld [smem:[#allocation24_spill]]  ;;  %v7966_v56 = vld [vmem:[%s8916_s26] ss:$0 sm:$0xff]  ;;  %vm2473_vm7 = vcmask 64512   ;;  %vm9706_vm13 = vmpackc.low %vm1907_vm5, %vm1907_vm5 }
 0x166   : > { %v1761_v32 = vshrl.u32 %v1760_v28, 7  ;;  %8289 = vmatprep.mubr.msk.f32.mxu1 %vm8734_vm6, %v8732_v29  ;;  %8284 = vmatprep.mubr.msk.f32.mxu0 %vm8734_vm6, %v8732_v29  ;;  %v7963_v57 = vld [vmem:[%s8913_s23] ss:$0 sm:$0xff]  ;;  %s9890_s2 = sld [smem:[#allocation14_spill]]  ;;  %vm2718_vm8 = vcmask 1042432   ;;  %vm2668_vm9 = vcmask 18432   ;;  %vm9325_vm11 = vmpackc.low %vm2473_vm7, %vm2473_vm7 }
 0x167   : > { %v1759_v33 = vunpack.c.0.s8 %v1758_v31  ;;  %vm2714_vm10 = vcmask 23552   ;;  %vm6986_vm12 = vcmask 256000   ;;  %vm7472_vm14 = vcmask 523264  }
 0x168   : > { %vm8586_vm15 = vmpackc.low %vm7472_vm14, %vm7472_vm14 }
 0x169   : > { %v9061_v36 = vsub.s32 %v1759_v33, %v1761_v32 }
 0x16a   : > { %v2031_v22 = vld [vmem:[%s9886_s16] sm:$0xff] }
 0x16b   : > { %v1748_v27 = vld [vmem:[%s9887_s1] sm:$0xff]  ;;  %8288 = vmatpush3.xpose.msk.msra.mxu1 %vm1907_vm5, %v2031_v22  ;;  %v2044_v58 = vrot.slane %v7966_v56, %v9061_v36  ;;  %v1809_v59 = vrot.slane %v7963_v57, %v9061_v36 }
 0x16c   : > { %8283 = vmatpush3.xpose.msk.msra.mxu0 %vm1907_vm5, %v1748_v27  ;;  %8297 = vmatprep.subr.mxu1 %v8732_v29  ;;  %v8688_v34 = vld.sshfl [vmem:[%s9888_s3] sm:$0x13 pattern:$0x75316420] }
 0x16d   : > { %8292 = vmatprep.subr.mxu0 %v8732_v29  ;;  %v8689_v35 = vld.sshfl [vmem:[%s9888_s3 + $0x4] sm:$0x13 pattern:$0x75316420]  ;;  %v1764_v37 = vcombine.high %v8688_v34, %v8688_v34  ;;  %v1771_v38 = vrot.slane %v8688_v34, %v9061_v36  ;;  %v2045_v60 = vcombine.high %v2044_v58, %v2044_v58  ;;  %v2052_v61 = vrot.slane %v2044_v58, %v9061_v36 }
 0x16e   : > { %v1787_v39 = vcombine.high %v8689_v35, %v8689_v35  ;;  %v1794_v40 = vrot.slane %v8689_v35, %v9061_v36  ;;  %v2223_v55 = vld [vmem:[%s9889_s6] sm:$0xff]  ;;  %v1810_v62 = vcombine.high %v1809_v59, %v1809_v59  ;;  %v1817_v63 = vrot.slane %v1809_v59, %v9061_v36 }
 0x16f   : > { %v1778_v41 = vrot.slane %v1764_v37, %v9061_v36  ;;  %v1779_v42 = vcombine.high %v1771_v38, %v1771_v38  ;;  %v2059_v0 = vrot.slane %v2045_v60, %v9061_v36  ;;  %v2060_v1 = vcombine.high %v2052_v61, %v2052_v61 }
 0x170   : > { %v1801_v43 = vrot.slane %v1787_v39, %v9061_v36  ;;  %v1802_v44 = vcombine.high %v1794_v40, %v1794_v40  ;;  %v1824_v2 = vrot.slane %v1810_v62, %v9061_v36  ;;  %v1825_v3 = vcombine.high %v1817_v63, %v1817_v63 }
 0x171   : > { %v1826_v45 = vcombine.low %v1771_v38, %v1778_v41  ;;  %v1827_v46 = vcombine.low %v1779_v42, %v1794_v40  ;;  %v2061_v5 = vcombine.low %v2052_v61, %v2059_v0  ;;  %v2062_v7 = vcombine.low %v2060_v1, %v2052_v61 }
 0x172   : > { %v1828_v47 = vcombine.low %v1801_v43, %v1802_v44  ;;  %v1866_v4 = vcombine.low %v1817_v63, %v1824_v2  ;;  %v1867_v8 = vcombine.low %v1825_v3, %v1817_v63  ;;  %v2063_v9 = vcombine.low %v2059_v0, %v2060_v1 }
 0x173   : > { %v1835_v48 = vrot.slane %v1826_v45, %v9061_v36  ;;  %v1842_v49 = vrot.slane %v1827_v46, %v9061_v36  ;;  %v2070_v10 = vrot.slane %v2061_v5, %v9061_v36  ;;  %v2077_v11 = vrot.slane %v2062_v7, %v9061_v36 }
 0x174   : > { %v1849_v50 = vrot.slane %v1828_v47, %v9061_v36  ;;  %v1868_v6 = vcombine.low %v1824_v2, %v1825_v3  ;;  %v1875_v12 = vrot.slane %v1866_v4, %v9061_v36  ;;  %v1882_v13 = vrot.slane %v1867_v8, %v9061_v36 }
 0x175   : > { %v1850_v51 = vcombine.low %v1835_v48, %v1842_v49  ;;  %v2084_v14 = vrot.slane %v2063_v9, %v9061_v36  ;;  %v2085_v15 = vcombine.low %v2070_v10, %v2077_v11 }
 0x176   : > { %v1864_v52 = vrot.slane %v1849_v50, %v9061_v36  ;;  %v1889_v16 = vrot.slane %v1868_v6, %v9061_v36  ;;  %v1890_v17 = vcombine.low %v1875_v12, %v1882_v13  ;;  %v7969_v6 = vld [vmem:[%s8919_s28] ss:$0 sm:$0xff] }
 0x177   : > { %v1857_v53 = vrot.slane %v1850_v51, %v9061_v36  ;;  %v2092_v18 = vrot.slane %v2085_v15, %v9061_v36  ;;  %v2099_v19 = vrot.slane %v2084_v14, %v9061_v36  ;;  %v2236_v12 = vrot.slane %v7969_v6, %v9061_v36 }
 0x178   : > { %v1897_v20 = vrot.slane %v1890_v17, %v9061_v36  ;;  %v1904_v21 = vrot.slane %v1889_v16, %v9061_v36 }
 0x179   : > { %v9072_v54 = vcombine.low %v1857_v53, %v1864_v52  ;;  %v2100_v23 = vcombine.low %v2092_v18, %v2099_v19  ;;  %v2237_v13 = vcombine.high %v2236_v12, %v2236_v12  ;;  %v2244_v14 = vrot.slane %v2236_v12, %v9061_v36 }
 0x17a   : > { %v1905_v24 = vcombine.low %v1897_v20, %v1904_v21 }
 0x17b   : > { %8290 = vmatmul.mubr.msk.f32.vlgmr.msra.gmra.mrb[0].mxu1 %vm1907_vm5, %v9072_v54  ;;  %8285 = vmatmul.mubr.msk.f32.vlgmr.msra.gmra.mrb[0].mxu0 %vm1907_vm5, %v9072_v54  ;;  %v2251_v15 = vrot.slane %v2237_v13, %v9061_v36  ;;  %v2252_v16 = vcombine.high %v2244_v14, %v2244_v14 }
 0x17c   : > { %8294 = vmatprep.mubr.msk.f32.mxu0 %vm8734_vm6, %v8732_v29  ;;  %8299 = vmatprep.mubr.msk.f32.mxu1 %vm8734_vm6, %v8732_v29 }
 0x17d   : > { %8293 = vmatpush3.xpose.msk.msra.mxu0 %vm1907_vm5, %v2223_v55  ;;  %v2253_v17 = vcombine.low %v2244_v14, %v2251_v15  ;;  %v2254_v18 = vcombine.low %v2252_v16, %v2244_v14  ;;  %v2255_v19 = vcombine.low %v2251_v15, %v2252_v16  ;;  %v7987_v14 = vld [vmem:[%s9886_s16 + $0x8] sm:$0xff] }
 0x17e   : > { %8302 = vmatprep.subr.mxu0 %v8732_v29 }
 0x17f   : > { %v2262_v20 = vrot.slane %v2253_v17, %v9061_v36  ;;  %v2269_v21 = vrot.slane %v2254_v18, %v9061_v36  ;;  %v7982_v17 = vld [vmem:[%s9887_s1 + $0x8] sm:$0xff] }
 0x180   : > { %8295 = vmatmul.mubr.msk.f32.vlgmr.msra.gmra.mrb[2].mxu0 %vm1907_vm5, %v9072_v54  ;;  %v7992_v18 = vld [vmem:[%s9889_s6 + $0x8] sm:$0xff] }
 0x181   : > { %8304 = vmatprep.mubr.msk.f32.mxu0 %vm8734_vm6, %v8732_v29 }
 0x24e   : > { %v2171_v25 = vpop.f32.mrb[0].mxu1  ;;  %v1979_v26 = vpop.f32.mrb[0].mxu0 }
 0x24f   : > { %v2172_v22 = vadd.f32 %v2171_v25, %v2100_v23  ;;  %v1980_v27 = vadd.f32 %v1979_v26, %v1905_v24  ;;  %v8291_v28 = vpop.f32.mrb[1].mxu1  ;;  %v8286_v30 = vpop.f32.mrb[1].mxu0  ;;  %v2276_v23 = vrot.slane %v2255_v19, %v9061_v36  ;;  %v2277_v24 = vcombine.low %v2262_v20, %v2269_v21  ;;  %v7989_v19 = vld [vmem:[%s8916_s26 + $0x1] ss:$0 sm:$0xff] }
 0x250   : > { %v3102_v20 = vrot.slane %v7989_v19, %v9061_v36  ;;  %v7984_v21 = vld [vmem:[%s8913_s23 + $0x1] ss:$0 sm:$0xff] }
 0x251   : > { %v2176_v31 = vcombine.high %v2172_v22, %v2172_v22  ;;  %v2183_v32 = vrot.slane %v2172_v22, %v9061_v36  ;;  %v1984_v33 = vcombine.high %v1980_v27, %v1980_v27  ;;  %v1991_v34 = vrot.slane %v1980_v27, %v9061_v36 }
 0x252   : > { %v2284_v25 = vrot.slane %v2277_v24, %v9061_v36  ;;  %v2291_v26 = vrot.slane %v2276_v23, %v9061_v36  ;;  %v3103_v23 = vcombine.high %v3102_v20, %v3102_v20  ;;  %v3110_v24 = vrot.slane %v3102_v20, %v9061_v36 }
 0x253   : > { %v2190_v35 = vrot.slane %v2176_v31, %v9061_v36  ;;  %v2191_v37 = vcombine.high %v2183_v32, %v2183_v32  ;;  %v2199_v38 = vrot.slane %v2183_v32, %v9061_v36  ;;  %v1998_v39 = vrot.slane %v1984_v33, %v9061_v36  ;;  %v2363_v27 = vpop.f32.mrb[2].mxu0 }
 0x254   : > { %v1999_v40 = vcombine.high %v1991_v34, %v1991_v34  ;;  %v2007_v41 = vrot.slane %v1991_v34, %v9061_v36  ;;  %v2292_v22 = vcombine.low %v2284_v25, %v2291_v26  ;;  %v8296_v30 = vpop.f32.mrb[3].mxu0  ;;  %v2908_v25 = vrot.slane %v7984_v21, %v9061_v36 }
 0x255   : > { %v2192_v42 = vcombine.high %v2190_v35, %v2190_v35  ;;  %v2213_v43 = vrot.slane %v2191_v37, %v9061_v36  ;;  %v2221_v44 = vcombine.high %v2199_v38, %v2199_v38  ;;  %v2000_v45 = vcombine.high %v1998_v39, %v1998_v39 }
 0x256   : > { %v2014_v46 = vrot.slane %v1998_v39, %v9061_v36  ;;  %v2021_v47 = vrot.slane %v1999_v40, %v9061_v36  ;;  %v2029_v48 = vcombine.high %v2007_v41, %v2007_v41  ;;  %v2206_v49 = vrot.slane %v2190_v35, %v9061_v36 }
 0x257   : > { %v2220_v50 = vrot.slane %v2192_v42, %v9061_v36  ;;  %v2222_v51 = vcombine.high %v2213_v43, %v2213_v43  ;;  %v2450_v52 = vcombine.low %v2199_v38, %v2213_v43  ;;  %v2028_v53 = vrot.slane %v2000_v45, %v9061_v36 }
 0x258   : > { %v2030_v55 = vcombine.high %v2021_v47, %v2021_v47  ;;  %v2427_v56 = vcombine.low %v2007_v41, %v2021_v47  ;;  %v2441_v57 = vrot.slane %v2029_v48, %v9061_v36  ;;  %v2464_v59 = vrot.slane %v2221_v44, %v9061_v36 }
 0x259   : > { %v2457_v58 = vrot.slane %v2450_v52, %v9061_v36  ;;  %v2571_v60 = vcombine.low %v2222_v51, %v2206_v49  ;;  %v2562_v63 = vrot.slane %v2028_v53, %v9061_v36  ;;  %v2585_v2 = vrot.slane %v2220_v50, %v9061_v36 }
 0x25a   : > { %v2434_v61 = vrot.slane %v2427_v56, %v9061_v36  ;;  %v2548_v62 = vcombine.low %v2030_v55, %v2014_v46  ;;  %v2364_v28 = vadd.f32 %v2363_v27, %v2292_v22  ;;  %v9167_v55 = vld [vmem:[%s9890_s2 + $0x1] ss:$0 sm:$0xff]  ;;  %v3117_v26 = vrot.slane %v3103_v23, %v9061_v36 }
 0x25b   : > { %v2465_v0 = vcombine.low %v2457_v58, %v2464_v59  ;;  %v2578_v1 = vrot.slane %v2571_v60, %v9061_v36  ;;  %v3118_v22 = vcombine.high %v3110_v24, %v3110_v24  ;;  %v2909_v27 = vcombine.high %v2908_v25, %v2908_v25 }
 0x25c   : > { %v2442_v3 = vcombine.low %v2434_v61, %v2441_v57  ;;  %v2555_v5 = vrot.slane %v2548_v62, %v9061_v36  ;;  %v2368_v31 = vcombine.high %v2364_v28, %v2364_v28  ;;  %v2375_v32 = vrot.slane %v2364_v28, %v9061_v36  ;;  %v9170_v57 = vld [vmem:[%s9890_s2] ss:$0 sm:$0xff] }
 0x25d   : > { %v2586_v7 = vcombine.low %v2578_v1, %v2585_v2  ;;  %v2472_v4 = vrot.slane %v2465_v0, %v9061_v36  ;;  %v2916_v28 = vrot.slane %v2908_v25, %v9061_v36  ;;  %v3119_v30 = vcombine.low %v3110_v24, %v3117_v26 }
 0x25e   : > { %v2563_v8 = vcombine.low %v2555_v5, %v2562_v63  ;;  %v2449_v10 = vrot.slane %v2442_v3, %v9061_v36  ;;  %v2382_v33 = vrot.slane %v2368_v31, %v9061_v36  ;;  %v2383_v34 = vcombine.high %v2375_v32, %v2375_v32 }
 0x25f   : > { %8298 = vmatpush3.xpose.msk.msra.mxu1 %vm2473_vm7, %v2472_v4  ;;  %v2593_v9 = vrot.slane %v2586_v7, %v9061_v36  ;;  %v2391_v35 = vrot.slane %v2375_v32, %v9061_v36  ;;  %v3120_v31 = vcombine.low %v3118_v22, %v3110_v24  ;;  %v2923_v32 = vrot.slane %v2909_v27, %v9061_v36 }
 0x260   : > { %8307 = vmatprep.subr.mxu1 %v8732_v29  ;;  %v2570_v11 = vrot.slane %v2563_v8, %v9061_v36  ;;  %v2384_v37 = vcombine.high %v2382_v33, %v2382_v33  ;;  %v2398_v38 = vrot.slane %v2382_v33, %v9061_v36  ;;  %v2405_v39 = vrot.slane %v2383_v34, %v9061_v36 }
 0x261   : > { %8303 = vmatpush3.xpose.msk.msra.mxu0 %vm2473_vm7, %v2593_v9  ;;  %v2413_v40 = vcombine.high %v2391_v35, %v2391_v35  ;;  %v2924_v33 = vcombine.high %v2916_v28, %v2916_v28  ;;  %v3121_v34 = vcombine.low %v3117_v26, %v3118_v22 }
 0x262   : > { %8300 = vmatmul.mubr.msk.f32.vlgmr.msra.gmra.mrb[2].mxu1 %vm2473_vm7, %v2449_v10  ;;  %8312 = vmatprep.subr.mxu0 %v8732_v29  ;;  %v2412_v41 = vrot.slane %v2384_v37, %v9061_v36  ;;  %v2414_v42 = vcombine.high %v2405_v39, %v2405_v39  ;;  %v2691_v43 = vcombine.low %v2391_v35, %v2405_v39 }
 0x263   : > { %8309 = vmatprep.mubr.msk.f32.mxu1 %vm8734_vm6, %v8732_v29  ;;  %v2705_v44 = vrot.slane %v2413_v40, %v9061_v36  ;;  %v3128_v35 = vrot.slane %v3119_v30, %v9061_v36  ;;  %v3135_v37 = vrot.slane %v3120_v31, %v9061_v36  ;;  %v2926_v39 = vcombine.low %v2924_v33, %v2916_v28 }
 0x264   : > { %8305 = vmatmul.mubr.msk.f32.vlgmr.msra.gmra.mrb[4].mxu0 %vm2473_vm7, %v2570_v11  ;;  %v2698_v45 = vrot.slane %v2691_v43, %v9061_v36  ;;  %v2791_v46 = vcombine.low %v2414_v42, %v2398_v38  ;;  %v2805_v47 = vrot.slane %v2412_v41, %v9061_v36  ;;  %v2925_v38 = vcombine.low %v2916_v28, %v2923_v32 }
 0x265   : > { %8314 = vmatprep.mubr.msk.f32.mxu0 %vm8734_vm6, %v8732_v29  ;;  %v3142_v40 = vrot.slane %v3121_v34, %v9061_v36  ;;  %v3143_v41 = vcombine.low %v3128_v35, %v3135_v37  ;;  %v2927_v42 = vcombine.low %v2923_v32, %v2924_v33 }
 0x266   : > { %v2706_v48 = vcombine.low %v2698_v45, %v2705_v44  ;;  %v2798_v49 = vrot.slane %v2791_v46, %v9061_v36  ;;  %v2934_v43 = vrot.slane %v2925_v38, %v9061_v36  ;;  %v2941_v44 = vrot.slane %v2926_v39, %v9061_v36 }
 0x267   : > { %v3150_v45 = vrot.slane %v3143_v41, %v9061_v36  ;;  %v3157_v46 = vrot.slane %v3142_v40, %v9061_v36 }
 0x268   : > { %v2806_v50 = vcombine.low %v2798_v49, %v2805_v47  ;;  %v2713_v51 = vrot.slane %v2706_v48, %v9061_v36  ;;  %v2948_v47 = vrot.slane %v2927_v42, %v9061_v36  ;;  %v2949_v48 = vcombine.low %v2934_v43, %v2941_v44 }
 0x26a   : > { %8308 = vmatpush3.msk.msra.mxu1 %vm2718_vm8, %v2713_v51  ;;  %v2813_v52 = vrot.slane %v2806_v50, %v9061_v36 }
 0x26b   : > { %8317 = vmatprep.subr.mxu1 %v8732_v29 }
 0x26c   : > { %8313 = vmatpush3.msk.msra.mxu0 %vm2718_vm8, %v2813_v52  ;;  %v3158_v52 = vcombine.low %v3150_v45, %v3157_v46 }
 0x26d   : > { %8322 = vmatprep.subr.mxu0 %v8732_v29 }
 0x335   : > { %v2544_v53 = vpop.f32.mrb[2].mxu1 }
 0x336   : > { %v8301_v56 = vpop.f32.mrb[3].mxu1  ;;  %v2545_v61 = vadd.f32 %v9170_v57, %v2544_v53  ;;  %v2956_v53 = vrot.slane %v2949_v48, %v9061_v36 }
 0x337   : > { %v2664_v58 = vpop.f32.mrb[4].mxu0  ;;  %v2963_v56 = vrot.slane %v2948_v47, %v9061_v36 }
 0x338   : > { %v2665_v59 = vadd.f32 %v9167_v55, %v2664_v58  ;;  %v8306_v60 = vpop.f32.mrb[5].mxu0  ;;  %v2669_v63 = vsel %vm2668_vm9, %v2545_v61, -inf }
 0x33a   : > { %v2672_v62 = vsel %vm2668_vm9, %v2665_v59, -inf }
 0x33b   : > { %2673 = vmax.xlane.f32.xlu0 %v2672_v62 }
 0x33f   : > { %2670 = vmax.xlane.f32.xlu0 %v2669_v63 }
 0x3c8   : > { %v2674_v0 = vpop.xlane.xlu0 %2673 }
 0x3c9   : > { %v2676_v1 = vsub.f32 %v2665_v59, %v2674_v0 }
 0x3cb   : > { %v2679_v2 = vmul.f32 1.442695, %v2676_v1 }
 0x3cc   : > { %v2671_v3 = vpop.xlane.xlu0 %2670 }
 0x3cd   : > { %8644 = vpow2.f32 %v2679_v2  ;;  %v2675_v5 = vsub.f32 %v2545_v61, %v2671_v3 }
 0x3cf   : > { %v2677_v7 = vmul.f32 1.442695, %v2675_v5  ;;  %v2964_v5 = vcombine.low %v2956_v53, %v2963_v56 }
 0x3d1   : > { %8646 = vpow2.f32 %v2677_v7 }
 0x3d7   : > { %v8645_v4 = vpop.eup %8644 }
 0x3d8   : > { %v2684_v8 = vsel %vm2668_vm9, %v8645_v4, 0.0 }
 0x3d9   : > { %2685 = vadd.xlane.f32.xlu1 %v2684_v8 }
 0x3db   : > { %v8647_v9 = vpop.eup %8646 }
 0x3dc   : > { %v2681_v10 = vsel %vm2668_vm9, %v8647_v9, 0.0 }
 0x3dd   : > { %2682 = vadd.xlane.f32.xlu1 %v2681_v10 }
 0x466   : > { %v2686_v11 = vpop.xlane.xlu1 %2685 }
 0x467   : > { %8648 = vrcp.f32 %v2686_v11 }
 0x46a   : > { %v2683_v6 = vpop.xlane.xlu1 %2682 }
 0x46b   : > { %8650 = vrcp.f32 %v2683_v6 }
 0x471   : > { %v8649_v12 = vpop.eup %8648 }
 0x472   : > { %v2690_v13 = vmul.f32 %v8649_v12, %v8645_v4 }
 0x474   : > { %8315 = vmatmul.mubr.msk.f32.vlgmr.msra.gmra.mrb[6].mxu0 %vm2714_vm10, %v2690_v13 }
 0x475   : > { %v8651_v15 = vpop.eup %8650  ;;  %8323 = vmatpush3.xpose.msk.msra.mxu0 %vm1907_vm5, %v7987_v14  ;;  %8324 = vmatprep.mubr.msk.f32.mxu0 %vm8734_vm6, %v8732_v29 }
 0x476   : > { %v2689_v16 = vmul.f32 %v8651_v15, %v8647_v9  ;;  %8332 = vmatprep.subr.mxu0 %v8732_v29 }
 0x478   : > { %8310 = vmatmul.mubr.msk.f32.vlgmr.msra.gmra.mrb[4].mxu1 %vm2714_vm10, %v2689_v16  ;;  %8325 = vmatmul.mubr.msk.f32.vlgmr.msra.gmra.mrb[8].mxu0 %vm1907_vm5, %v9072_v54 }
 0x479   : > { %8318 = vmatpush3.xpose.msk.msra.mxu1 %vm1907_vm5, %v7982_v17  ;;  %8319 = vmatprep.mubr.msk.f32.mxu1 %vm8734_vm6, %v8732_v29 }
 0x47a   : > { %8327 = vmatprep.subr.mxu1 %v8732_v29  ;;  %8334 = vmatprep.mubr.msk.f32.mxu0 %vm8734_vm6, %v8732_v29 }
 0x47c   : > { %8320 = vmatmul.mubr.msk.f32.vlgmr.msra.gmra.mrb[6].mxu1 %vm1907_vm5, %v9072_v54 }
 0x47d   : > { %8329 = vmatprep.mubr.msk.f32.mxu1 %vm8734_vm6, %v8732_v29  ;;  %8328 = vmatpush3.xpose.msk.msra.mxu1 %vm1907_vm5, %v7992_v18 }
 0x47e   : > { %8337 = vmatprep.subr.mxu1 %v8732_v29 }
 0x480   : > { %8330 = vmatmul.mubr.msk.f32.vlgmr.msra.gmra.mrb[8].mxu1 %vm1907_vm5, %v9072_v54 }
 0x481   : > { %8339 = vmatprep.mubr.msk.f32.mxu1 %vm8734_vm6, %v8732_v29 }
 0x547   : > { %v2885_v49 = vpop.f32.mrb[6].mxu0 }
 0x548   : > { %v4141_v50 = vrot.slane %v2885_v49, %v9061_v36  ;;  %v8316_v51 = vpop.f32.mrb[7].mxu0 }
 0x54a   : > { %v4142_v58 = vcombine.high %v4141_v50, %v4141_v50  ;;  %v4149_v59 = vrot.slane %v4141_v50, %v9061_v36 }
 0x54b   : > { %v2787_v60 = vpop.f32.mrb[4].mxu1  ;;  %v3229_v61 = vpop.f32.mrb[8].mxu0 }
 0x54c   : > { %v4156_v62 = vrot.slane %v4142_v58, %v9061_v36  ;;  %v4157_v63 = vcombine.high %v4149_v59, %v4149_v59  ;;  %v4118_v0 = vrot.slane %v2787_v60, %v9061_v36  ;;  %v3230_v1 = vadd.f32 %v3229_v61, %v3158_v52  ;;  %v8311_v2 = vpop.f32.mrb[5].mxu1  ;;  %v8326_v3 = vpop.f32.mrb[9].mxu0 }
 0x54e   : > { %v4160_v7 = vcombine.low %v4156_v62, %v4157_v63  ;;  %v4119_v4 = vcombine.high %v4118_v0, %v4118_v0  ;;  %v4126_v8 = vrot.slane %v4118_v0, %v9061_v36  ;;  %v3234_v9 = vcombine.high %v3230_v1, %v3230_v1 }
 0x54f   : > { %v3241_v10 = vrot.slane %v3230_v1, %v9061_v36  ;;  %v3035_v11 = vpop.f32.mrb[6].mxu1 }
 0x550   : > { %v4133_v6 = vrot.slane %v4119_v4, %v9061_v36  ;;  %v4134_v12 = vcombine.high %v4126_v8, %v4126_v8  ;;  %v3248_v13 = vrot.slane %v3234_v9, %v9061_v36  ;;  %v8321_v14 = vpop.f32.mrb[7].mxu1  ;;  %v3036_v17 = vadd.f32 %v3035_v11, %v2964_v5 }
 0x551   : > { %v3249_v15 = vcombine.high %v3241_v10, %v3241_v10  ;;  %v3257_v16 = vrot.slane %v3241_v10, %v9061_v36  ;;  %v4181_v18 = vrot.slane %v4160_v7, %v9061_v36  ;;  %v7994_v7 = vld [vmem:[%s8919_s28 + $0x1] ss:$0 sm:$0xff] }
 0x552   : > { %v4158_v19 = vcombine.low %v4126_v8, %v4133_v6  ;;  %v4159_v20 = vcombine.low %v4134_v12, %v4149_v59  ;;  %v3250_v21 = vcombine.high %v3248_v13, %v3248_v13  ;;  %v3264_v23 = vrot.slane %v3248_v13, %v9061_v36 }
 0x553   : > { %v3271_v24 = vrot.slane %v3249_v15, %v9061_v36  ;;  %v3279_v25 = vcombine.high %v3257_v16, %v3257_v16  ;;  %v3040_v26 = vcombine.high %v3036_v17, %v3036_v17  ;;  %v3047_v30 = vrot.slane %v3036_v17, %v9061_v36 }
 0x554   : > { %v4167_v22 = vrot.slane %v4158_v19, %v9061_v36  ;;  %v4174_v27 = vrot.slane %v4159_v20, %v9061_v36  ;;  %v3278_v28 = vrot.slane %v3250_v21, %v9061_v36  ;;  %v4196_v43 = vrot.slane %v4181_v18, %v9061_v36  ;;  %v3423_v21 = vpop.f32.mrb[8].mxu1 }
 0x555   : > { %v3280_v31 = vcombine.high %v3271_v24, %v3271_v24  ;;  %v3498_v32 = vcombine.low %v3257_v16, %v3271_v24  ;;  %v3512_v33 = vrot.slane %v3279_v25, %v9061_v36  ;;  %v3054_v34 = vrot.slane %v3040_v26, %v9061_v36  ;;  %v8331_v24 = vpop.f32.mrb[9].mxu1 }
 0x556   : > { %v4182_v35 = vcombine.low %v4167_v22, %v4174_v27  ;;  %v3055_v37 = vcombine.high %v3047_v30, %v3047_v30  ;;  %v3063_v38 = vrot.slane %v3047_v30, %v9061_v36  ;;  %v3632_v41 = vrot.slane %v3278_v28, %v9061_v36 }
 0x557   : > { %v3505_v39 = vrot.slane %v3498_v32, %v9061_v36  ;;  %v3618_v40 = vcombine.low %v3280_v31, %v3264_v23  ;;  %v3056_v42 = vcombine.high %v3054_v34, %v3054_v34  ;;  %v3070_v49 = vrot.slane %v3054_v34, %v9061_v36 }
 0x558   : > { %v4189_v44 = vrot.slane %v4182_v35, %v9061_v36  ;;  %v3077_v45 = vrot.slane %v3055_v37, %v9061_v36  ;;  %v3085_v46 = vcombine.high %v3063_v38, %v3063_v38  ;;  %v3296_v4 = vrot.slane %v7994_v7, %v9061_v36 }
 0x559   : > { %v3513_v47 = vcombine.low %v3505_v39, %v3512_v33  ;;  %v3625_v48 = vrot.slane %v3618_v40, %v9061_v36  ;;  %v3084_v50 = vrot.slane %v3056_v42, %v9061_v36 }
 0x55a   : > { %v3086_v51 = vcombine.high %v3077_v45, %v3077_v45  ;;  %v3475_v52 = vcombine.low %v3063_v38, %v3077_v45  ;;  %v9250_v53 = vcombine.low %v4189_v44, %v4196_v43  ;;  %v3489_v60 = vrot.slane %v3085_v46, %v9061_v36 }
 0x55b   : > { %v3633_v56 = vcombine.low %v3625_v48, %v3632_v41  ;;  %v3520_v58 = vrot.slane %v3513_v47, %v9061_v36  ;;  %v3609_v1 = vrot.slane %v3084_v50, %v9061_v36  ;;  %v3297_v8 = vcombine.high %v3296_v4, %v3296_v4 }
 0x55c   : > { %v3482_v59 = vrot.slane %v3475_v52, %v9061_v36  ;;  %v3595_v61 = vcombine.low %v3086_v51, %v3070_v49  ;;  %v3304_v9 = vrot.slane %v3296_v4, %v9061_v36 }
 0x55d   : > { %8333 = vmatpush3.xpose.msk.msra.mxu0 %vm2473_vm7, %v3520_v58  ;;  %v3640_v62 = vrot.slane %v3633_v56, %v9061_v36  ;;  %v3311_v10 = vrot.slane %v3297_v8, %v9061_v36 }
 0x55e   : > { %v3490_v63 = vcombine.low %v3482_v59, %v3489_v60  ;;  %v3602_v0 = vrot.slane %v3595_v61, %v9061_v36  ;;  %8342 = vmatprep.subr.mxu0 %v8732_v29  ;;  %v3312_v11 = vcombine.high %v3304_v9, %v3304_v9 }
 0x55f   : > { %8338 = vmatpush3.xpose.msk.msra.mxu1 %vm2473_vm7, %v3640_v62  ;;  %v3313_v6 = vcombine.low %v3304_v9, %v3311_v10 }
 0x560   : > { %v3610_v2 = vcombine.low %v3602_v0, %v3609_v1  ;;  %v3497_v3 = vrot.slane %v3490_v63, %v9061_v36  ;;  %8347 = vmatprep.subr.mxu1 %v8732_v29  ;;  %v3314_v12 = vcombine.low %v3312_v11, %v3304_v9  ;;  %v3315_v13 = vcombine.low %v3311_v10, %v3312_v11  ;;  %v8019_v10 = vld [vmem:[%s9887_s1 + $0x10] sm:$0xff] }
 0x561   : > { %v3322_v14 = vrot.slane %v3313_v6, %v9061_v36 }
 0x562   : > { %8335 = vmatmul.mubr.msk.f32.vlgmr.msra.gmra.mrb[10].mxu0 %vm2473_vm7, %v3497_v3  ;;  %v3617_v5 = vrot.slane %v3610_v2, %v9061_v36  ;;  %v3329_v15 = vrot.slane %v3314_v12, %v9061_v36  ;;  %v3336_v16 = vrot.slane %v3315_v13, %v9061_v36  ;;  %v8024_v12 = vld [vmem:[%s9886_s16 + $0x10] sm:$0xff]  ;;  %v8005_v13 = vld [vmem:[%s8925_s7 + $0x20] sm:$0xff] }
 0x563   : > { %8344 = vmatprep.mubr.msk.f32.mxu0 %vm8734_vm6, %v8732_v29 }
 0x564   : > { %8340 = vmatmul.mubr.msk.f32.vlgmr.msra.gmra.mrb[10].mxu1 %vm2473_vm7, %v3617_v5  ;;  %v3337_v17 = vcombine.low %v3322_v14, %v3329_v15  ;;  %v3351_v19 = vrot.slane %v3336_v16, %v9061_v36  ;;  %v8006_v14 = vld [vmem:[%s8925_s7 + $0x28] sm:$0xff]  ;;  %v8735_v15 = vmov 0.0|0.0  }
 0x565   : > { %8349 = vmatprep.mubr.msk.f32.mxu1 %vm8734_vm6, %v8732_v29  ;;  %v8537_v16 = vpack.c.bf16 %v8006_v14, %v8005_v13 }
 0x566   : > { %v3344_v18 = vrot.slane %v3337_v17, %v9061_v36 }
 0x568   : > { %v3352_v20 = vcombine.low %v3344_v18, %v3351_v19  ;;  %v8007_v18 = vld [vmem:[%s8925_s7 + $0x30] sm:$0xff]  ;;  %v8008_v19 = vld [vmem:[%s8925_s7 + $0x38] sm:$0xff] }
 0x56a   : > { %v3424_v23 = vadd.f32 %v3423_v21, %v3352_v20  ;;  %v8541_v20 = vpack.c.bf16 %v8008_v19, %v8007_v18  ;;  %v8029_v21 = vld [vmem:[%s9889_s6 + $0x10] sm:$0xff] }
 0x56c   : > { %v3428_v25 = vcombine.high %v3424_v23, %v3424_v23  ;;  %v3435_v26 = vrot.slane %v3424_v23, %v9061_v36  ;;  %v8021_v23 = vld [vmem:[%s8913_s23 + $0x2] ss:$0 sm:$0xff] }
 0x56d   : > { %v4351_v24 = vrot.slane %v8021_v23, %v9061_v36 }
 0x56e   : > { %v3442_v22 = vrot.slane %v3428_v25, %v9061_v36  ;;  %v3443_v27 = vcombine.high %v3435_v26, %v3435_v26  ;;  %v3451_v28 = vrot.slane %v3435_v26, %v9061_v36  ;;  %v8026_v25 = vld [vmem:[%s8916_s26 + $0x2] ss:$0 sm:$0xff] }
 0x56f   : > { %v4352_v26 = vcombine.high %v4351_v24, %v4351_v24 }
 0x570   : > { %v3444_v30 = vcombine.high %v3442_v22, %v3442_v22  ;;  %v3458_v31 = vrot.slane %v3442_v22, %v9061_v36  ;;  %v3465_v32 = vrot.slane %v3443_v27, %v9061_v36  ;;  %v3473_v33 = vcombine.high %v3451_v28, %v3451_v28 }
 0x571   : > { %v4359_v22 = vrot.slane %v4351_v24, %v9061_v36  ;;  %v4545_v27 = vrot.slane %v8026_v25, %v9061_v36 }
 0x572   : > { %v3472_v34 = vrot.slane %v3444_v30, %v9061_v36  ;;  %v3474_v35 = vcombine.high %v3465_v32, %v3465_v32  ;;  %v3737_v37 = vcombine.low %v3451_v28, %v3465_v32  ;;  %v3751_v38 = vrot.slane %v3473_v33, %v9061_v36 }
 0x573   : > { %v4366_v28 = vrot.slane %v4352_v26, %v9061_v36  ;;  %v4367_v30 = vcombine.high %v4359_v22, %v4359_v22  ;;  %v4553_v32 = vrot.slane %v4545_v27, %v9061_v36 }
 0x574   : > { %v3744_v39 = vrot.slane %v3737_v37, %v9061_v36  ;;  %v3835_v40 = vcombine.low %v3474_v35, %v3458_v31  ;;  %v3849_v41 = vrot.slane %v3472_v34, %v9061_v36  ;;  %v4546_v31 = vcombine.high %v4545_v27, %v4545_v27 }
 0x575   : > { %v4368_v33 = vcombine.low %v4359_v22, %v4366_v28  ;;  %v4369_v34 = vcombine.low %v4367_v30, %v4359_v22  ;;  %v4561_v37 = vcombine.high %v4553_v32, %v4553_v32 }
 0x576   : > { %v3752_v42 = vcombine.low %v3744_v39, %v3751_v38  ;;  %v3842_v43 = vrot.slane %v3835_v40, %v9061_v36  ;;  %v4560_v35 = vrot.slane %v4546_v31, %v9061_v36  ;;  %v4370_v38 = vcombine.low %v4366_v28, %v4367_v30  ;;  %v2889_v31 = vld [vmem:[%s8925_s7] sm:$0xff] }
 0x577   : > { %v4377_v39 = vrot.slane %v4368_v33, %v9061_v36  ;;  %v4384_v40 = vrot.slane %v4369_v34, %v9061_v36 }
 0x578   : > { %v3850_v44 = vcombine.low %v3842_v43, %v3849_v41  ;;  %v3759_v45 = vrot.slane %v3752_v42, %v9061_v36  ;;  %v4562_v41 = vcombine.low %v4553_v32, %v4560_v35  ;;  %v4563_v42 = vcombine.low %v4561_v37, %v4553_v32  ;;  %v2890_v32 = vld [vmem:[%s8925_s7 + $0x8] sm:$0xff] }
 0x579   : > { %v4391_v43 = vrot.slane %v4370_v38, %v9061_v36 }
 0x57a   : > { %8343 = vmatpush3.msk.msra.mxu0 %vm2718_vm8, %v3759_v45  ;;  %v3857_v46 = vrot.slane %v3850_v44, %v9061_v36  ;;  %v4392_v44 = vcombine.low %v4377_v39, %v4384_v40  ;;  %v4564_v45 = vcombine.low %v4560_v35, %v4561_v37 }
 0x57b   : > { %8536 = vmatprep.subr.bf16.mxu0 %v8735_v15 }
 0x57c   : > { %8348 = vmatpush3.msk.msra.mxu1 %vm2718_vm8, %v3857_v46  ;;  %v4571_v46 = vrot.slane %v4562_v41, %v9061_v36 }
 0x57d   : > { %8374 = vmatprep.subr.mxu1 %v8732_v29 }
 0x635   : > { %v3591_v47 = vpop.f32.mrb[10].mxu0 }
 0x636   : > { %v8336_v48 = vpop.f32.mrb[11].mxu0  ;;  %v3592_v52 = vadd.f32 %v9170_v57, %v3591_v47  ;;  %v4578_v47 = vrot.slane %v4563_v42, %v9061_v36 }
 0x637   : > { %v3711_v49 = vpop.f32.mrb[10].mxu1  ;;  %v4399_v48 = vrot.slane %v4392_v44, %v9061_v36 }
 0x638   : > { %v3712_v50 = vadd.f32 %v9167_v55, %v3711_v49  ;;  %v8341_v51 = vpop.f32.mrb[11].mxu1  ;;  %v3715_v58 = vsel %vm2668_vm9, %v3592_v52, -inf  ;;  %v4406_v49 = vrot.slane %v4391_v43, %v9061_v36  ;;  %v8545_v43 = vpack.c.bf16 %v2890_v32, %v2889_v31 }
 0x639   : > { %v4586_v51 = vcombine.low %v4571_v46, %v4578_v47 }
 0x63a   : > { %v3718_v56 = vsel %vm2668_vm9, %v3712_v50, -inf }
 0x63b   : > { %3719 = vmax.xlane.f32.xlu0 %v3718_v56 }
 0x63f   : > { %3716 = vmax.xlane.f32.xlu0 %v3715_v58 }
 0x6c8   : > { %v3720_v59 = vpop.xlane.xlu0 %3719 }
 0x6c9   : > { %v3722_v60 = vsub.f32 %v3712_v50, %v3720_v59  ;;  %v4585_v50 = vrot.slane %v4564_v45, %v9061_v36  ;;  %v4407_v59 = vcombine.low %v4399_v48, %v4406_v49 }
 0x6cb   : > { %v3725_v61 = vmul.f32 1.442695, %v3722_v60  ;;  %v4593_v60 = vrot.slane %v4586_v51, %v9061_v36 }
 0x6cc   : > { %v3717_v62 = vpop.xlane.xlu0 %3716 }
 0x6cd   : > { %8652 = vpow2.f32 %v3725_v61  ;;  %v3721_v63 = vsub.f32 %v3592_v52, %v3717_v62  ;;  %v4600_v61 = vrot.slane %v4585_v50, %v9061_v36 }
 0x6cf   : > { %v3723_v0 = vmul.f32 1.442695, %v3721_v63 }
 0x6d1   : > { %8654 = vpow2.f32 %v3723_v0 }
 0x6d7   : > { %v8653_v1 = vpop.eup %8652 }
 0x6d8   : > { %v3730_v2 = vsel %vm2668_vm9, %v8653_v1, 0.0 }
 0x6d9   : > { %3731 = vadd.xlane.f32.xlu1 %v3730_v2 }
 0x6db   : > { %v8655_v3 = vpop.eup %8654 }
 0x6dc   : > { %v3727_v5 = vsel %vm2668_vm9, %v8655_v3, 0.0 }
 0x6dd   : > { %3728 = vadd.xlane.f32.xlu1 %v3727_v5 }
 0x766   : > { %v3732_v7 = vpop.xlane.xlu1 %3731 }
 0x767   : > { %8656 = vrcp.f32 %v3732_v7 }
 0x76a   : > { %v3729_v4 = vpop.xlane.xlu1 %3728 }
 0x76b   : > { %8658 = vrcp.f32 %v3729_v4 }
 0x771   : > { %v8657_v8 = vpop.eup %8656 }
 0x772   : > { %v3736_v9 = vmul.f32 %v8657_v8, %v8653_v1 }
 0x774   : > { %8350 = vmatmul.mubr.msk.f32.vlgmr.msra.gmra.mrb[12].mxu1 %vm2714_vm10, %v3736_v9  ;;  %v4601_v9 = vcombine.low %v4593_v60, %v4600_v61 }
 0x775   : > { %v8659_v11 = vpop.eup %8658  ;;  %8375 = vmatpush3.xpose.msk.msra.mxu1 %vm1907_vm5, %v8019_v10  ;;  %8376 = vmatprep.mubr.msk.f32.mxu1 %vm8734_vm6, %v8732_v29 }
 0x776   : > { %v3735_v6 = vmul.f32 %v8659_v11, %v8655_v3  ;;  %8379 = vmatprep.subr.mxu1 %v8732_v29 }
 0x778   : > { %8345 = vmatmul.mubr.msk.f32.vlgmr.msra.gmra.mrb[12].mxu0 %vm2714_vm10, %v3735_v6  ;;  %8377 = vmatmul.mubr.msk.f32.vlgmr.msra.gmra.mrb[14].mxu1 %vm1907_vm5, %v9072_v54 }
 0x779   : > { %8380 = vmatpush3.xpose.msk.msra.mxu1 %vm1907_vm5, %v8024_v12  ;;  %8381 = vmatprep.mubr.msk.f32.mxu1 %vm8734_vm6, %v8732_v29 }
 0x77a   : > { %8384 = vmatprep.subr.mxu1 %v8732_v29  ;;  %8360 = vmatprep.mubr.msk.f32.mxu0 %vm8734_vm6, %v8732_v29 }
 0x77b   : > { %8539 = vmatpush3.bf16.xpose.msk.msra.mxu0 %vm9325_vm11, %v8537_v16 }
 0x77c   : > { %8382 = vmatmul.mubr.msk.f32.vlgmr.msra.gmra.mrb[16].mxu1 %vm1907_vm5, %v9072_v54  ;;  %8540 = vmatprep.subr.bf16.mxu0 %v8735_v15 }
 0x77d   : > { %8386 = vmatprep.mubr.msk.f32.mxu1 %vm8734_vm6, %v8732_v29  ;;  %8385 = vmatpush3.xpose.msk.msra.mxu1 %vm1907_vm5, %v8029_v21 }
 0x77e   : > { %8389 = vmatprep.subr.mxu1 %v8732_v29 }
 0x780   : > { %8387 = vmatmul.mubr.msk.f32.vlgmr.msra.gmra.mrb[18].mxu1 %vm1907_vm5, %v9072_v54 }
 0x781   : > { %8391 = vmatprep.mubr.msk.f32.mxu1 %vm8734_vm6, %v8732_v29 }
 0x783   : > { %8543 = vmatpush3.bf16.xpose.msk.msra.mxu0 %vm9325_vm11, %v8541_v20 }
 0x784   : > { %8544 = vmatprep.subr.bf16.mxu0 %v8735_v15 }
 0x847   : > { %v3929_v52 = vpop.f32.mrb[12].mxu1 }
 0x848   : > { %v3969_v56 = vrot.slane %v3929_v52, %v9061_v36  ;;  %v8351_v58 = vpop.f32.mrb[13].mxu1 }
 0x84a   : > { %v3970_v62 = vcombine.high %v3969_v56, %v3969_v56  ;;  %v3977_v63 = vrot.slane %v3969_v56, %v9061_v36 }
 0x84b   : > { %v3831_v0 = vpop.f32.mrb[12].mxu0  ;;  %v4478_v1 = vpop.f32.mrb[14].mxu1 }
 0x84c   : > { %v3984_v2 = vrot.slane %v3970_v62, %v9061_v36  ;;  %v3985_v3 = vcombine.high %v3977_v63, %v3977_v63  ;;  %v3946_v5 = vrot.slane %v3831_v0, %v9061_v36  ;;  %v4479_v7 = vadd.f32 %v4478_v1, %v4407_v59  ;;  %v8346_v4 = vpop.f32.mrb[13].mxu0  ;;  %v8378_v8 = vpop.f32.mrb[15].mxu1 }
 0x84d   : > { %v2891_v4 = vld [vmem:[%s8925_s7 + $0x10] sm:$0xff]  ;;  %v2892_v8 = vld [vmem:[%s8925_s7 + $0x18] sm:$0xff] }
 0x84e   : > { %v3947_v10 = vcombine.high %v3946_v5, %v3946_v5  ;;  %v3954_v11 = vrot.slane %v3946_v5, %v9061_v36  ;;  %v4490_v6 = vrot.slane %v4479_v7, %v9061_v36  ;;  %v3988_v13 = vcombine.low %v3984_v2, %v3985_v3 }
 0x84f   : > { %v4672_v12 = vpop.f32.mrb[16].mxu1  ;;  %v4483_v19 = vcombine.high %v4479_v7, %v4479_v7 }
 0x850   : > { %v3961_v14 = vrot.slane %v3947_v10, %v9061_v36  ;;  %v3962_v16 = vcombine.high %v3954_v11, %v3954_v11  ;;  %v8383_v18 = vpop.f32.mrb[17].mxu1  ;;  %v4498_v20 = vcombine.high %v4490_v6, %v4490_v6  ;;  %v4673_v21 = vadd.f32 %v4672_v12, %v4601_v9 }
 0x851   : > { %v4009_v22 = vrot.slane %v3988_v13, %v9061_v36  ;;  %v4497_v33 = vrot.slane %v4483_v19, %v9061_v36  ;;  %v4506_v34 = vrot.slane %v4490_v6, %v9061_v36  ;;  %v8549_v13 = vpack.c.bf16 %v2892_v8, %v2891_v4 }
 0x852   : > { %v3986_v23 = vcombine.low %v3954_v11, %v3961_v14  ;;  %v3987_v24 = vcombine.low %v3962_v16, %v3977_v63  ;;  %v4520_v25 = vrot.slane %v4498_v20, %v9061_v36  ;;  %v4677_v26 = vcombine.high %v4673_v21, %v4673_v21  ;;  %v8031_v20 = vld [vmem:[%s8919_s28 + $0x2] ss:$0 sm:$0xff] }
 0x853   : > { %v4684_v30 = vrot.slane %v4673_v21, %v9061_v36  ;;  %v4024_v44 = vrot.slane %v4009_v22, %v9061_v36  ;;  %v4499_v48 = vcombine.high %v4497_v33, %v4497_v33  ;;  %v4513_v49 = vrot.slane %v4497_v33, %v9061_v36 }
 0x854   : > { %v3995_v27 = vrot.slane %v3986_v23, %v9061_v36  ;;  %v4002_v28 = vrot.slane %v3987_v24, %v9061_v36  ;;  %v4691_v35 = vrot.slane %v4677_v26, %v9061_v36  ;;  %v4529_v40 = vcombine.high %v4520_v25, %v4520_v25 }
 0x855   : > { %v4692_v38 = vcombine.high %v4684_v30, %v4684_v30  ;;  %v4700_v39 = vrot.slane %v4684_v30, %v9061_v36  ;;  %v4918_v41 = vcombine.low %v4506_v34, %v4520_v25  ;;  %v4528_v50 = vcombine.high %v4506_v34, %v4506_v34 }
 0x856   : > { %v4010_v37 = vcombine.low %v3995_v27, %v4002_v28  ;;  %v4693_v42 = vcombine.high %v4691_v35, %v4691_v35  ;;  %v4707_v51 = vrot.slane %v4691_v35, %v9061_v36  ;;  %v5038_v61 = vcombine.low %v4529_v40, %v4513_v49  ;;  %v8051_v49 = vld [vmem:[%s9887_s1 + $0x18] sm:$0xff]  ;;  %s9901_s1 = scalar_lea.vmem %s8884_s9, %s8899_s0 }
 0x857   : > { %v4714_v46 = vrot.slane %v4692_v38, %v9061_v36  ;;  %v4722_v47 = vcombine.high %v4700_v39, %v4700_v39  ;;  %v4925_v60 = vrot.slane %v4918_v41, %v9061_v36  ;;  %v4527_v1 = vrot.slane %v4499_v48, %v9061_v36 }
 0x858   : > { %v4017_v45 = vrot.slane %v4010_v37, %v9061_v36  ;;  %v4721_v52 = vrot.slane %v4693_v42, %v9061_v36  ;;  %v4932_v2 = vrot.slane %v4528_v50, %v9061_v36  ;;  %v5045_v10 = vrot.slane %v5038_v61, %v9061_v36  ;;  %v4866_v37 = vpop.f32.mrb[18].mxu1  ;;  %v8056_v61 = vld [vmem:[%s9886_s16 + $0x18] sm:$0xff] }
 0x859   : > { %v4723_v56 = vcombine.high %v4714_v46, %v4714_v46  ;;  %v4941_v58 = vcombine.low %v4700_v39, %v4714_v46  ;;  %v4955_v63 = vrot.slane %v4722_v47, %v9061_v36  ;;  %v5052_v12 = vrot.slane %v4527_v1, %v9061_v36  ;;  %v8388_v39 = vpop.f32.mrb[19].mxu1 }
 0x85a   : > { %v4025_v59 = vcombine.low %v4017_v45, %v4024_v44  ;;  %v5075_v7 = vrot.slane %v4721_v52, %v9061_v36  ;;  %v4933_v9 = vcombine.low %v4925_v60, %v4932_v2  ;;  %v4739_v21 = vrot.slane %v8031_v20, %v9061_v36 }
 0x85b   : > { %v4948_v62 = vrot.slane %v4941_v58, %v9061_v36  ;;  %v5061_v0 = vcombine.low %v4723_v56, %v4707_v51  ;;  %v5053_v14 = vcombine.low %v5045_v10, %v5052_v12 }
 0x85c   : > { %8361 = vmatmul.mubr.msk.f32.vlgmr.msra.gmra.mrb[14].mxu0 %vm2473_vm7, %v4025_v59  ;;  %v4940_v16 = vrot.slane %v4933_v9, %v9061_v36  ;;  %v4740_v23 = vcombine.high %v4739_v21, %v4739_v21  ;;  %v4747_v24 = vrot.slane %v4739_v21, %v9061_v36 }
 0x85d   : > { %8547 = vmatpush3.bf16.xpose.msk.msra.mxu0 %vm9325_vm11, %v8545_v43  ;;  %8371 = vmatprep.mubr.msk.f32.mxu0 %vm8734_vm6, %v8732_v29  ;;  %v4956_v3 = vcombine.low %v4948_v62, %v4955_v63  ;;  %v5068_v5 = vrot.slane %v5061_v0, %v9061_v36  ;;  %v5060_v19 = vrot.slane %v5053_v14, %v9061_v36 }
 0x85e   : > { %8548 = vmatprep.subr.bf16.mxu0 %v8735_v15  ;;  %v4754_v25 = vrot.slane %v4740_v23, %v9061_v36  ;;  %v4755_v26 = vcombine.high %v4747_v24, %v4747_v24 }
 0x85f   : > { %v5076_v11 = vcombine.low %v5068_v5, %v5075_v7  ;;  %v4963_v6 = vrot.slane %v4956_v3, %v9061_v36 }
 0x860   : > { %v4756_v22 = vcombine.low %v4747_v24, %v4754_v25  ;;  %v4757_v27 = vcombine.low %v4755_v26, %v4747_v24  ;;  %v4758_v28 = vcombine.low %v4754_v25, %v4755_v26 }
 0x861   : > { %8390 = vmatpush3.xpose.msk.msra.mxu1 %vm2473_vm7, %v4963_v6  ;;  %v5083_v18 = vrot.slane %v5076_v11, %v9061_v36  ;;  %v8061_v6 = vld [vmem:[%s9889_s6 + $0x18] sm:$0xff] }
 0x862   : > { %8394 = vmatprep.subr.mxu1 %v8732_v29  ;;  %v4765_v30 = vrot.slane %v4756_v22, %v9061_v36  ;;  %v4772_v31 = vrot.slane %v4757_v27, %v9061_v36 }
 0x864   : > { %8392 = vmatmul.mubr.msk.f32.vlgmr.msra.gmra.mrb[20].mxu1 %vm2473_vm7, %v4940_v16  ;;  %v4780_v32 = vcombine.low %v4765_v30, %v4772_v31 }
 0x865   : > { %8551 = vmatpush3.bf16.xpose.msk.msra.mxu0 %vm9325_vm11, %v8549_v13  ;;  %8395 = vmatpush3.xpose.msk.msra.mxu1 %vm2473_vm7, %v5083_v18  ;;  %v8058_v13 = vld [vmem:[%s8916_s26 + $0x3] ss:$0 sm:$0xff]  ;;  %s9897_s26 = scalar_lea.vmem %s8854_s14, %s8899_s0 }
 0x866   : > { %8396 = vmatprep.mubr.msk.f32.mxu1 %vm8734_vm6, %v8732_v29  ;;  %8420 = vmatprep.subr.mxu0 %v8732_v29  ;;  %v4787_v33 = vrot.slane %v4780_v32, %v9061_v36  ;;  %v5822_v18 = vrot.slane %v8058_v13, %v9061_v36 }
 0x867   : > { %8399 = vmatprep.subr.mxu1 %v8732_v29 }
 0x868   : > { %8397 = vmatmul.mubr.msk.f32.vlgmr.msra.gmra.mrb[22].mxu1 %vm2473_vm7, %v5060_v19  ;;  %v5823_v21 = vcombine.high %v5822_v18, %v5822_v18  ;;  %v5830_v23 = vrot.slane %v5822_v18, %v9061_v36 }
 0x869   : > { %8401 = vmatprep.mubr.msk.f32.mxu1 %vm8734_vm6, %v8732_v29 }
 0x86a   : > { %v5837_v25 = vrot.slane %v5823_v21, %v9061_v36  ;;  %v5838_v26 = vcombine.high %v5830_v23, %v5830_v23 }
 0x86c   : > { %8372 = vmatmul.mubr.msk.f32.vlgmr.msra.gmra.mrb[14].mxu0 %vm2473_vm7, %v9250_v53  ;;  %v4779_v53 = vrot.slane %v4758_v28, %v9061_v36  ;;  %v5839_v30 = vcombine.low %v5830_v23, %v5837_v25  ;;  %v5840_v31 = vcombine.low %v5838_v26, %v5830_v23 }
 0x86d   : > { %8422 = vmatprep.mubr.msk.f32.mxu0 %vm8734_vm6, %v8732_v29  ;;  %8421 = vmatpush3.xpose.msk.msra.mxu0 %vm1907_vm5, %v8051_v49 }
 0x86e   : > { %v4794_v34 = vrot.slane %v4779_v53, %v9061_v36  ;;  %8425 = vmatprep.subr.mxu0 %v8732_v29  ;;  %v5841_v53 = vcombine.low %v5837_v25, %v5838_v26 }
 0x870   : > { %v4795_v35 = vcombine.low %v4787_v33, %v4794_v34  ;;  %8423 = vmatmul.mubr.msk.f32.vlgmr.msra.gmra.mrb[16].mxu0 %vm1907_vm5, %v9072_v54  ;;  %v5848_v34 = vrot.slane %v5839_v30, %v9061_v36  ;;  %v5862_v39 = vrot.slane %v5841_v53, %v9061_v36 }
 0x871   : > { %8426 = vmatpush3.xpose.msk.msra.mxu0 %vm1907_vm5, %v8056_v61  ;;  %8427 = vmatprep.mubr.msk.f32.mxu0 %vm8734_vm6, %v8732_v29 }
 0x872   : > { %v4867_v38 = vadd.f32 %v4866_v37, %v4795_v35  ;;  %8430 = vmatprep.subr.mxu0 %v8732_v29  ;;  %v5855_v35 = vrot.slane %v5840_v31, %v9061_v36 }
 0x874   : > { %v4871_v40 = vcombine.high %v4867_v38, %v4867_v38  ;;  %v4878_v41 = vrot.slane %v4867_v38, %v9061_v36  ;;  %8428 = vmatmul.mubr.msk.f32.vlgmr.msra.gmra.mrb[18].mxu0 %vm1907_vm5, %v9072_v54 }
 0x875   : > { %8432 = vmatprep.mubr.msk.f32.mxu0 %vm8734_vm6, %v8732_v29  ;;  %8431 = vmatpush3.xpose.msk.msra.mxu0 %vm1907_vm5, %v8061_v6 }
 0x876   : > { %v4885_v42 = vrot.slane %v4871_v40, %v9061_v36  ;;  %v4886_v43 = vcombine.high %v4878_v41, %v4878_v41  ;;  %v4894_v44 = vrot.slane %v4878_v41, %v9061_v36  ;;  %8435 = vmatprep.subr.mxu0 %v8732_v29  ;;  %v5863_v40 = vcombine.low %v5848_v34, %v5855_v35 }
 0x878   : > { %v4887_v45 = vcombine.high %v4885_v42, %v4885_v42  ;;  %v4901_v46 = vrot.slane %v4885_v42, %v9061_v36  ;;  %v4908_v47 = vrot.slane %v4886_v43, %v9061_v36  ;;  %v4916_v48 = vcombine.high %v4894_v44, %v4894_v44  ;;  %8433 = vmatmul.mubr.msk.f32.vlgmr.msra.gmra.mrb[20].mxu0 %vm1907_vm5, %v9072_v54 }
 0x879   : > { %8437 = vmatprep.mubr.msk.f32.mxu0 %vm8734_vm6, %v8732_v29  ;;  %v5870_v42 = vrot.slane %v5863_v40, %v9061_v36  ;;  %v5877_v43 = vrot.slane %v5862_v39, %v9061_v36 }
 0x87a   : > { %v4915_v50 = vrot.slane %v4887_v45, %v9061_v36  ;;  %v4917_v51 = vcombine.high %v4908_v47, %v4908_v47  ;;  %v5180_v52 = vcombine.low %v4894_v44, %v4908_v47  ;;  %v5194_v56 = vrot.slane %v4916_v48, %v9061_v36 }
 0x87b   : > { %v5878_v47 = vcombine.low %v5870_v42, %v5877_v43 }
 0x87c   : > { %v5187_v58 = vrot.slane %v5180_v52, %v9061_v36  ;;  %v5278_v59 = vcombine.low %v4917_v51, %v4901_v46  ;;  %v5292_v60 = vrot.slane %v4915_v50, %v9061_v36 }
 0x87e   : > { %v5195_v62 = vcombine.low %v5187_v58, %v5194_v56  ;;  %v5285_v63 = vrot.slane %v5278_v59, %v9061_v36 }
 0x880   : > { %v9453_v0 = vcombine.low %v5285_v63, %v5292_v60  ;;  %v5202_v1 = vrot.slane %v5195_v62, %v9061_v36 }
 0x882   : > { %8400 = vmatpush3.msk.msra.mxu1 %vm2718_vm8, %v5202_v1 }
 0x883   : > { %8404 = vmatprep.subr.mxu1 %v8732_v29 }
 0x937   : > { %v5034_v2 = vpop.f32.mrb[20].mxu1 }
 0x938   : > { %v9463_v3 = vadd.f32 %v9170_v57, %v5034_v2  ;;  %v8393_v5 = vpop.f32.mrb[21].mxu1 }
 0x93a   : > { %v5158_v7 = vsel %vm2668_vm9, %v9463_v3, -inf }
 0x93b   : > { %v5154_v4 = vpop.f32.mrb[22].mxu1  ;;  %5159 = vmax.xlane.f32.xlu0 %v5158_v7 }
 0x93c   : > { %v9468_v8 = vadd.f32 %v9167_v55, %v5154_v4  ;;  %v8398_v9 = vpop.f32.mrb[23].mxu1  ;;  %v8053_v55 = vld [vmem:[%s8913_s23 + $0x3] ss:$0 sm:$0xff]  ;;  %s9896_s23 = scalar_lea.vmem %s8849_s17, %s8899_s0 }
 0x93d   : > { %v5628_v12 = vrot.slane %v8053_v55, %v9061_v36 }
 0x93e   : > { %v5161_v10 = vsel %vm2668_vm9, %v9468_v8, -inf }
 0x93f   : > { %v9472_v11 = vpop.f32.mrb[14].mxu0  ;;  %5162 = vmax.xlane.f32.xlu1 %v5161_v10  ;;  %v5629_v14 = vcombine.high %v5628_v12, %v5628_v12  ;;  %v5636_v16 = vrot.slane %v5628_v12, %v9061_v36 }
 0x940   : > { %v8373_v57 = vpop.f32.mrb[15].mxu0 }
 0x941   : > { %v5643_v19 = vrot.slane %v5629_v14, %v9061_v36  ;;  %v5644_v20 = vcombine.high %v5636_v16, %v5636_v16 }
 0x943   : > { %v5645_v24 = vcombine.low %v5636_v16, %v5643_v19  ;;  %v5646_v54 = vcombine.low %v5644_v20, %v5636_v16  ;;  %v5647_v22 = vcombine.low %v5643_v19, %v5644_v20  ;;  %v5755_v44 = vpop.f32.mrb[16].mxu0 }
 0x944   : > { %v8424_v46 = vpop.f32.mrb[17].mxu0 }
 0x945   : > { %v5654_v27 = vrot.slane %v5645_v24, %v9061_v36  ;;  %v5661_v28 = vrot.slane %v5646_v54, %v9061_v36  ;;  %v5668_v32 = vrot.slane %v5647_v22, %v9061_v36 }
 0x947   : > { %v5669_v33 = vcombine.low %v5654_v27, %v5661_v28  ;;  %v5683_v38 = vrot.slane %v5668_v32, %v9061_v36  ;;  %v5949_v50 = vpop.f32.mrb[18].mxu0 }
 0x948   : > { %v5950_v58 = vadd.f32 %v5949_v50, %v5878_v47  ;;  %v8429_v59 = vpop.f32.mrb[19].mxu0 }
 0x949   : > { %v5676_v37 = vrot.slane %v5669_v33, %v9061_v36 }
 0x94a   : > { %v5954_v63 = vcombine.high %v5950_v58, %v5950_v58  ;;  %v5961_v1 = vrot.slane %v5950_v58, %v9061_v36 }
 0x94b   : > { %v5684_v41 = vcombine.low %v5676_v37, %v5683_v38 }
 0x94c   : > { %v5968_v9 = vrot.slane %v5954_v63, %v9061_v36  ;;  %v5969_v10 = vcombine.high %v5961_v1, %v5961_v1  ;;  %v5977_v57 = vrot.slane %v5961_v1, %v9061_v36  ;;  %v8044_v63 = vld [vmem:[%s8925_s7 + $0x50] sm:$0xff]  ;;  %v8045_v1 = vld [vmem:[%s8925_s7 + $0x58] sm:$0xff] }
 0x94d   : > { %v5756_v45 = vadd.f32 %v5755_v44, %v5684_v41 }
 0x94e   : > { %v5970_v12 = vcombine.high %v5968_v9, %v5968_v9  ;;  %v5984_v13 = vrot.slane %v5968_v9, %v9061_v36  ;;  %v5991_v14 = vrot.slane %v5969_v10, %v9061_v36  ;;  %v5999_v16 = vcombine.high %v5977_v57, %v5977_v57 }
 0x94f   : > { %v5760_v48 = vcombine.high %v5756_v45, %v5756_v45  ;;  %v5767_v49 = vrot.slane %v5756_v45, %v9061_v36  ;;  %v9534_v45 = vpop.f32.mrb[20].mxu0 }
 0x950   : > { %v5998_v21 = vrot.slane %v5970_v12, %v9061_v36  ;;  %v6000_v23 = vcombine.high %v5991_v14, %v5991_v14  ;;  %v6218_v24 = vcombine.low %v5977_v57, %v5991_v14  ;;  %v6232_v54 = vrot.slane %v5999_v16, %v9061_v36  ;;  %v8434_v46 = vpop.f32.mrb[21].mxu0 }
 0x951   : > { %v5774_v51 = vrot.slane %v5760_v48, %v9061_v36  ;;  %v5775_v52 = vcombine.high %v5767_v49, %v5767_v49  ;;  %v5783_v56 = vrot.slane %v5767_v49, %v9061_v36  ;;  %v5300_v49 = vrot.slane %v9453_v0, %v9061_v36 }
 0x952   : > { %v6225_v26 = vrot.slane %v6218_v24, %v9061_v36  ;;  %v6338_v22 = vcombine.low %v6000_v23, %v5984_v13  ;;  %v6352_v27 = vrot.slane %v5998_v21, %v9061_v36 }
 0x953   : > { %v5776_v60 = vcombine.high %v5774_v51, %v5774_v51  ;;  %v5790_v61 = vrot.slane %v5774_v51, %v9061_v36  ;;  %v5797_v62 = vrot.slane %v5775_v52, %v9061_v36  ;;  %v5805_v5 = vcombine.high %v5783_v56, %v5783_v56  ;;  %v8684_v52 = vld [vmem:[%s9890_s2] ss:$0 sm:$0xff] }
 0x954   : > { %v6233_v30 = vcombine.low %v6225_v26, %v6232_v54  ;;  %v6345_v31 = vrot.slane %v6338_v22, %v9061_v36 }
 0x955   : > { %v5804_v2 = vrot.slane %v5776_v60, %v9061_v36  ;;  %v5806_v7 = vcombine.high %v5797_v62, %v5797_v62  ;;  %v6195_v4 = vcombine.low %v5783_v56, %v5797_v62  ;;  %v6209_v19 = vrot.slane %v5805_v5, %v9061_v36  ;;  %v8042_v60 = vld [vmem:[%s8925_s7 + $0x40] sm:$0xff] }
 0x956   : > { %v9521_v53 = vcombine.low %v6345_v31, %v6352_v27  ;;  %v6240_v32 = vrot.slane %v6233_v30, %v9061_v36 }
 0x957   : > { %v6315_v6 = vcombine.low %v5806_v7, %v5790_v61  ;;  %v6329_v55 = vrot.slane %v5804_v2, %v9061_v36  ;;  %v6202_v18 = vrot.slane %v6195_v4, %v9061_v36  ;;  %v8043_v61 = vld [vmem:[%s8925_s7 + $0x48] sm:$0xff]  ;;  %v8557_v2 = vpack.c.bf16 %v8045_v1, %v8044_v63 }
 0x958   : > { %8436 = vmatpush3.xpose.msk.msra.mxu0 %vm2473_vm7, %v6240_v32  ;;  %v8553_v62 = vpack.c.bf16 %v8043_v61, %v8042_v60 }
 0x959   : > { %v6322_v20 = vrot.slane %v6315_v6, %v9061_v36  ;;  %v6210_v28 = vcombine.low %v6202_v18, %v6209_v19  ;;  %8445 = vmatprep.subr.mxu0 %v8732_v29 }
 0x95b   : > { %v9516_v25 = vcombine.low %v6322_v20, %v6329_v55  ;;  %v6217_v33 = vrot.slane %v6210_v28, %v9061_v36 }
 0x95d   : > { %8438 = vmatmul.mubr.msk.f32.vlgmr.msra.gmra.mrb[22].mxu0 %vm2473_vm7, %v6217_v33 }
 0x95e   : > { %8447 = vmatprep.mubr.msk.f32.mxu0 %vm8734_vm6, %v8732_v29 }
 0x9c8   : > { %v5160_v34 = vpop.xlane.xlu0 %5159 }
 0x9c9   : > { %v5164_v35 = vsub.f32 %v9463_v3, %v5160_v34 }
 0x9cb   : > { %v5166_v37 = vmul.f32 1.442695, %v5164_v35  ;;  %v6360_v35 = vrot.slane %v9521_v53, %v9061_v36 }
 0x9cc   : > { %v5163_v38 = vpop.xlane.xlu1 %5162 }
 0x9cd   : > { %8660 = vpow2.f32 %v5166_v37  ;;  %v5165_v39 = vsub.f32 %v9468_v8, %v5163_v38  ;;  %v6337_v38 = vrot.slane %v9516_v25, %v9061_v36 }
 0x9cf   : > { %v5168_v40 = vmul.f32 1.442695, %v5165_v39  ;;  %v8063_v39 = vld [vmem:[%s8919_s28 + $0x3] ss:$0 sm:$0xff]  ;;  %s9900_s28 = scalar_lea.vmem %s8879_s13, %s8899_s0 }
 0x9d0   : > { %v6016_v53 = vrot.slane %v8063_v39, %v9061_v36 }
 0x9d1   : > { %8662 = vpow2.f32 %v5168_v40 }
 0x9d2   : > { %v6017_v40 = vcombine.high %v6016_v53, %v6016_v53 }
 0x9d7   : > { %v8661_v41 = vpop.eup %8660 }
 0x9d8   : > { %v5170_v42 = vsel %vm2668_vm9, %v8661_v41, 0.0 }
 0x9d9   : > { %5171 = vadd.xlane.f32.xlu0 %v5170_v42  ;;  %v6031_v42 = vrot.slane %v6017_v40, %v9061_v36 }
 0x9db   : > { %v8663_v43 = vpop.eup %8662 }
 0x9dc   : > { %v5173_v44 = vsel %vm2668_vm9, %v8663_v43, 0.0 }
 0x9dd   : > { %5174 = vadd.xlane.f32.xlu1 %v5173_v44 }
 0xa30   : > { %v6311_v0 = vpop.f32.mrb[22].mxu0 }
 0xa31   : > { %v6312_v56 = vadd.f32 %v8684_v52, %v6311_v0  ;;  %v8439_v58 = vpop.f32.mrb[23].mxu0 }
 0xa33   : > { %v6435_v59 = vsel %vm2668_vm9, %v6312_v56, -inf }
 0xa34   : > { %6436 = vmax.xlane.f32.xlu0 %v6435_v59 }
 0xa66   : > { %v5172_v47 = vpop.xlane.xlu0 %5171 }
 0xa67   : > { %8664 = vrcp.f32 %v5172_v47 }
 0xa6a   : > { %v5175_v3 = vpop.xlane.xlu1 %5174 }
 0xa6b   : > { %8666 = vrcp.f32 %v5175_v3 }
 0xa71   : > { %v8665_v48 = vpop.eup %8664 }
 0xa72   : > { %v5178_v8 = vmul.f32 %v8665_v48, %v8661_v41  ;;  %v6024_v41 = vrot.slane %v6016_v53, %v9061_v36 }
 0xa74   : > { %8402 = vmatmul.mubr.msk.f32.vlgmr.msra.gmra.mrb[24].mxu1 %vm2714_vm10, %v5178_v8  ;;  %v6033_v44 = vcombine.low %v6024_v41, %v6031_v42 }
 0xa75   : > { %v8667_v50 = vpop.eup %8666  ;;  %8405 = vmatpush3.msk.msra.mxu1 %vm2718_vm8, %v5300_v49  ;;  %8406 = vmatprep.mubr.msk.f32.mxu1 %vm8734_vm6, %v8732_v29 }
 0xa76   : > { %v5179_v51 = vmul.f32 %v8667_v50, %v8663_v43  ;;  %8552 = vmatprep.subr.bf16.mxu1 %v8735_v15  ;;  %v6032_v43 = vcombine.high %v6024_v41, %v6024_v41  ;;  %v6042_v25 = vrot.slane %v6033_v44, %v9061_v36  ;;  %v8685_v44 = vld [vmem:[%s9890_s2 + $0x1] ss:$0 sm:$0xff] }
 0xa78   : > { %8407 = vmatmul.mubr.msk.f32.vlgmr.msra.gmra.mrb[26].mxu1 %vm2714_vm10, %v5179_v51  ;;  %v6034_v46 = vcombine.low %v6032_v43, %v6024_v41  ;;  %v6035_v47 = vcombine.low %v6031_v42, %v6032_v43 }
 0xa79   : > { %8417 = vmatprep.mubr.msk.f32.mxu1 %vm8734_vm6, %v8732_v29 }
 0xa7a   : > { %v6049_v3 = vrot.slane %v6034_v46, %v9061_v36  ;;  %v6056_v48 = vrot.slane %v6035_v47, %v9061_v36 }
 0xa7c   : > { %8555 = vmatpush3.bf16.xpose.msk.msra.mxu1 %vm9325_vm11, %v8553_v62  ;;  %v6057_v8 = vcombine.low %v6042_v25, %v6049_v3  ;;  %v6071_v50 = vrot.slane %v6056_v48, %v9061_v36 }
 0xa7d   : > { %8556 = vmatprep.subr.bf16.mxu1 %v8735_v15 }
 0xa7e   : > { %v6064_v49 = vrot.slane %v6057_v8, %v9061_v36 }
 0xa80   : > { %v6072_v51 = vcombine.low %v6064_v49, %v6071_v50 }
 0xa82   : > { %v6144_v0 = vadd.f32 %v9534_v45, %v6072_v51 }
 0xa84   : > { %8559 = vmatpush3.bf16.xpose.msk.msra.mxu1 %vm9325_vm11, %v8557_v2  ;;  %v6155_v52 = vrot.slane %v6144_v0, %v9061_v36 }
 0xa85   : > { %8440 = vmatprep.subr.mxu1 %v8732_v29 }
 0xa86   : > { %v6163_v58 = vcombine.high %v6155_v52, %v6155_v52  ;;  %v6171_v62 = vrot.slane %v6155_v52, %v9061_v36 }
 0xa88   : > { %v6185_v60 = vrot.slane %v6163_v58, %v9061_v36 }
 0xa8a   : > { %v6194_v1 = vcombine.high %v6185_v60, %v6185_v60 }
 0xac1   : > { %v6437_v5 = vpop.xlane.xlu0 %6436 }
 0xac2   : > { %v6441_v7 = vsub.f32 %v6312_v56, %v6437_v5  ;;  %v6148_v56 = vcombine.high %v6144_v0, %v6144_v0  ;;  %v6193_v5 = vcombine.high %v6171_v62, %v6171_v62 }
 0xac4   : > { %v6443_v4 = vmul.f32 1.442695, %v6441_v7  ;;  %v6162_v59 = vrot.slane %v6148_v56, %v9061_v36  ;;  %v6457_v7 = vcombine.low %v6171_v62, %v6185_v60 }
 0xac6   : > { %8668 = vpow2.f32 %v6443_v4  ;;  %v6164_v61 = vcombine.high %v6162_v59, %v6162_v59  ;;  %v6178_v63 = vrot.slane %v6162_v59, %v9061_v36 }
 0xac8   : > { %v6192_v2 = vrot.slane %v6164_v61, %v9061_v36  ;;  %v6555_v4 = vcombine.low %v6194_v1, %v6178_v63 }
 0xad0   : > { %v9558_v9 = vpop.eup %8668 }
 0xad1   : > { %v6447_v10 = vsel %vm2668_vm9, %v9558_v9, 0.0 }
 0xad2   : > { %6448 = vadd.xlane.f32.xlu0 %v6447_v10  ;;  %v6464_v10 = vrot.slane %v6457_v7, %v9061_v36 }
 0xb47   : > { %v5274_v57 = vpop.f32.mrb[24].mxu1 }
 0xb48   : > { %v5389_v6 = vrot.slane %v5274_v57, %v9061_v36  ;;  %v8403_v55 = vpop.f32.mrb[25].mxu1  ;;  %v6471_v57 = vrot.slane %v6193_v5, %v9061_v36  ;;  %v8075_v5 = vld [vmem:[%s8925_s7 + $0x68] sm:$0xff] }
 0xb49   : > { %v6569_v55 = vrot.slane %v6192_v2, %v9061_v36  ;;  %v8074_v2 = vld [vmem:[%s8925_s7 + $0x60] sm:$0xff] }
 0xb4a   : > { %v5390_v12 = vcombine.high %v5389_v6, %v5389_v6  ;;  %v5397_v13 = vrot.slane %v5389_v6, %v9061_v36  ;;  %v6562_v6 = vrot.slane %v6555_v4, %v9061_v36  ;;  %v8561_v7 = vpack.c.bf16 %v8075_v5, %v8074_v2  ;;  %v8076_v4 = vld [vmem:[%s8925_s7 + $0x70] sm:$0xff] }
 0xb4b   : > { %v5372_v14 = vpop.f32.mrb[26].mxu1 }
 0xb4c   : > { %v5404_v16 = vrot.slane %v5390_v12, %v9061_v36  ;;  %v5412_v18 = vrot.slane %v5372_v14, %v9061_v36  ;;  %v8408_v19 = vpop.f32.mrb[27].mxu1  ;;  %v5405_v20 = vcombine.high %v5397_v13, %v5397_v13  ;;  %v6472_v12 = vcombine.low %v6464_v10, %v6471_v57 }
 0xb4e   : > { %v5429_v21 = vcombine.low %v5397_v13, %v5404_v16  ;;  %v5413_v23 = vcombine.high %v5412_v18, %v5412_v18  ;;  %v5420_v24 = vrot.slane %v5412_v18, %v9061_v36  ;;  %v6570_v13 = vcombine.low %v6562_v6, %v6569_v55 }
 0xb4f   : > { %v6479_v18 = vrot.slane %v6472_v12, %v9061_v36 }
 0xb50   : > { %v5427_v54 = vrot.slane %v5413_v23, %v9061_v36  ;;  %v5428_v26 = vcombine.high %v5420_v24, %v5420_v24  ;;  %v5430_v22 = vcombine.low %v5405_v20, %v5420_v24  ;;  %v5438_v27 = vrot.slane %v5429_v21, %v9061_v36 }
 0xb51   : > { %v6577_v19 = vrot.slane %v6570_v13, %v9061_v36  ;;  %8446 = vmatpush3.msk.msra.mxu0 %vm2718_vm8, %v6479_v18  ;;  %v4290_v20 = vrot.slane %v9472_v11, %v9061_v36 }
 0xb52   : > { %v5431_v28 = vcombine.low %v5427_v54, %v5428_v26  ;;  %v5445_v30 = vrot.slane %v5430_v22, %v9061_v36  ;;  %8560 = vmatprep.subr.bf16.mxu0 %v8735_v15 }
 0xb53   : > { %v4298_v23 = vcombine.high %v4290_v20, %v4290_v20  ;;  %v4306_v24 = vrot.slane %v4290_v20, %v9061_v36 }
 0xb54   : > { %v5452_v31 = vrot.slane %v5431_v28, %v9061_v36  ;;  %v5453_v32 = vcombine.low %v5438_v27, %v5445_v30 }
 0xb55   : > { %v4320_v30 = vrot.slane %v4298_v23, %v9061_v36 }
 0xb56   : > { %v5460_v33 = vrot.slane %v5453_v32, %v9061_v36  ;;  %v5467_v34 = vrot.slane %v5452_v31, %v9061_v36 }
 0xb57   : > { %v4329_v42 = vcombine.high %v4320_v30, %v4320_v30 }
 0xb58   : > { %v5468_v37 = vcombine.low %v5460_v33, %v5467_v34  ;;  %v4328_v34 = vcombine.high %v4306_v24, %v4306_v24 }
 0xb5a   : > { %8418 = vmatmul.mubr.msk.f32.vlgmr.msra.gmra.mrb[28].mxu1 %vm2473_vm7, %v5468_v37 }
 0xb5b   : > { %8441 = vmatpush3.xpose.msk.msra.mxu1 %vm2473_vm7, %v6360_v35  ;;  %8442 = vmatprep.mubr.msk.f32.mxu1 %vm8734_vm6, %v8732_v29 }
 0xb5c   : > { %8450 = vmatprep.subr.mxu1 %v8732_v29 }
 0xb5e   : > { %8443 = vmatmul.mubr.msk.f32.vlgmr.msra.gmra.mrb[30].mxu1 %vm2473_vm7, %v6337_v38 }
 0xb5f   : > { %8452 = vmatprep.mubr.msk.f32.mxu1 %vm8734_vm6, %v8732_v29  ;;  %v6449_v45 = vpop.xlane.xlu0 %6448  ;;  %8451 = vmatpush3.msk.msra.mxu1 %vm2718_vm8, %v6577_v19 }
 0xb60   : > { %8670 = vrcp.f32 %v6449_v45  ;;  %8568 = vmatprep.subr.bf16.mxu1 %v8735_v15  ;;  %v8077_v45 = vld [vmem:[%s8925_s7 + $0x78] sm:$0xff]  ;;  %s9893_s7 = scalar_lea.vmem %s8844_s8, %s8899_s0 }
 0xb61   : > { %v8565_v10 = vpack.c.bf16 %v8077_v45, %v8076_v4 }
 0xb6a   : > { %v8671_v14 = vpop.eup %8670 }
 0xb6b   : > { %v6455_v16 = vmul.f32 %v8671_v14, %v9558_v9  ;;  %v4283_v9 = vcombine.high %v9472_v11, %v9472_v11 }
 0xb6d   : > { %8448 = vmatmul.mubr.msk.f32.vlgmr.msra.gmra.mrb[24].mxu0 %vm2714_vm10, %v6455_v16  ;;  %v4297_v21 = vrot.slane %v4283_v9, %v9061_v36 }
 0xb6e   : > { %8463 = vmatprep.mubr.msk.f32.mxu0 %vm8734_vm6, %v8732_v29  ;;  %8563 = vmatpush3.bf16.xpose.msk.msra.mxu0 %vm9325_vm11, %v8561_v7 }
 0xb6f   : > { %v4299_v28 = vcombine.high %v4297_v21, %v4297_v21  ;;  %v4313_v11 = vrot.slane %v4297_v21, %v9061_v36  ;;  %8564 = vmatprep.subr.bf16.mxu0 %v8735_v15 }
 0xb71   : > { %v4327_v41 = vrot.slane %v4299_v28, %v9061_v36 }
 0xb76   : > { %8567 = vmatpush3.bf16.xpose.msk.msra.mxu0 %vm9325_vm11, %v8565_v10 }
 0xb77   : > { %8584 = vmatprep.subr.bf16.mxu0 %v8735_v15 }
 0xc2d   : > { %v5549_v54 = vpop.f32.mrb[28].mxu1 }
 0xc2e   : > { %v5554_v26 = vcombine.high %v5549_v54, %v5549_v54  ;;  %v5561_v22 = vrot.slane %v5549_v54, %v9061_v36  ;;  %v8419_v27 = vpop.f32.mrb[29].mxu1 }
 0xc30   : > { %v5568_v31 = vrot.slane %v5554_v26, %v9061_v36  ;;  %v5569_v32 = vcombine.high %v5561_v22, %v5561_v22  ;;  %v5577_v33 = vrot.slane %v5561_v22, %v9061_v36 }
 0xc31   : > { %v6431_v35 = vpop.f32.mrb[30].mxu1 }
 0xc32   : > { %v5570_v37 = vcombine.high %v5568_v31, %v5568_v31  ;;  %v5584_v38 = vrot.slane %v5568_v31, %v9061_v36  ;;  %v5591_v39 = vrot.slane %v5569_v32, %v9061_v36  ;;  %v5599_v53 = vcombine.high %v5577_v33, %v5577_v33  ;;  %v8444_v40 = vpop.f32.mrb[31].mxu1  ;;  %v8083_v32 = vld [vmem:[%s9893_s7] ss:$0 sm:$0xff] }
 0xc33   : > { %v9629_v43 = vadd.f32 %v5577_v33, %v4306_v24  ;;  %v6432_v46 = vadd.f32 %v8685_v44, %v6431_v35  ;;  %v6902_v33 = vrot.slane %v8083_v32, %v9061_v36  ;;  %v7033_v32 = vld [vmem:[%s8933_s29 + $0x18] sm:$0xff] }
 0xc34   : > { %v5598_v47 = vrot.slane %v5570_v37, %v9061_v36  ;;  %v5600_v25 = vcombine.high %v5591_v39, %v5591_v39  ;;  %v9633_v3 = vadd.f32 %v5591_v39, %v4320_v30  ;;  %v9635_v48 = vadd.f32 %v5599_v53, %v4328_v34 }
 0xc35   : > { %v9637_v8 = vadd.f32 %v5584_v38, %v4313_v11  ;;  %v6438_v49 = vsel %vm2668_vm9, %v6432_v46, -inf  ;;  %v6903_v34 = vcombine.high %v6902_v33, %v6902_v33  ;;  %v6910_v35 = vrot.slane %v6902_v33, %v9061_v36 }
 0xc36   : > { %v9640_v50 = vadd.f32 %v5600_v25, %v4329_v42  ;;  %v9642_v51 = vadd.f32 %v5598_v47, %v4327_v41  ;;  %6439 = vmax.xlane.f32.xlu1 %v6438_v49 }
 0xc37   : > { %v6917_v42 = vrot.slane %v6903_v34, %v9061_v36  ;;  %v7035_v34 = vld [vmem:[%s8933_s29 + $0x28] sm:$0xff] }
 0xc40   : > { %v6551_v0 = vpop.f32.mrb[24].mxu0 }
 0xc41   : > { %v8449_v52 = vpop.f32.mrb[25].mxu0  ;;  %v6666_v57 = vrot.slane %v6551_v0, %v9061_v36 }
 0xc43   : > { %v6667_v6 = vcombine.high %v6666_v57, %v6666_v57  ;;  %v6674_v55 = vrot.slane %v6666_v57, %v9061_v36  ;;  %v8686_v57 = vld [vmem:[%s9888_s3] sm:$0x7] }
 0xc45   : > { %v6681_v12 = vrot.slane %v6667_v6, %v9061_v36  ;;  %v6682_v18 = vcombine.high %v6674_v55, %v6674_v55 }
 0xc47   : > { %v6706_v19 = vcombine.low %v6674_v55, %v6681_v12 }
 0xc49   : > { %v6715_v24 = vrot.slane %v6706_v19, %v9061_v36 }
 0xcc3   : > { %v6440_v56 = vpop.xlane.xlu1 %6439 }
 0xcc4   : > { %v6442_v58 = vsub.f32 %v6432_v46, %v6440_v56 }
 0xcc6   : > { %v6445_v59 = vmul.f32 1.442695, %v6442_v58 }
 0xcc8   : > { %8672 = vpow2.f32 %v6445_v59 }
 0xcd2   : > { %v8673_v60 = vpop.eup %8672 }
 0xcd3   : > { %v6450_v61 = vsel %vm2668_vm9, %v8673_v60, 0.0 }
 0xcd4   : > { %6451 = vadd.xlane.f32.xlu1 %v6450_v61 }
 0xd61   : > { %v6452_v62 = vpop.xlane.xlu1 %6451 }
 0xd62   : > { %8674 = vrcp.f32 %v6452_v62 }
 0xd6c   : > { %v8675_v63 = vpop.eup %8674 }
 0xd6d   : > { %v6456_v1 = vmul.f32 %v8675_v63, %v8673_v60 }
 0xd6f   : > { %8453 = vmatmul.mubr.msk.f32.vlgmr.msra.gmra.mrb[32].mxu1 %vm2714_vm10, %v6456_v1 }
 0xd70   : > { %8482 = vmatprep.mubr.msk.f32.mxu1 %vm8734_vm6, %v8732_v29 }
 0xe42   : > { %v6649_v13 = vpop.f32.mrb[32].mxu1 }
 0xe43   : > { %v6689_v14 = vrot.slane %v6649_v13, %v9061_v36  ;;  %v8454_v16 = vpop.f32.mrb[33].mxu1  ;;  %v8687_v13 = vld [vmem:[%s9888_s3 + $0x4] sm:$0x7] }
 0xe45   : > { %v6690_v9 = vcombine.high %v6689_v14, %v6689_v14  ;;  %v6697_v17 = vrot.slane %v6689_v14, %v9061_v36 }
 0xe47   : > { %v6704_v20 = vrot.slane %v6690_v9, %v9061_v36  ;;  %v6705_v21 = vcombine.high %v6697_v17, %v6697_v17  ;;  %v6707_v23 = vcombine.low %v6682_v18, %v6697_v17 }
 0xe49   : > { %v6708_v54 = vcombine.low %v6704_v20, %v6705_v21  ;;  %v6722_v26 = vrot.slane %v6707_v23, %v9061_v36 }
 0xe4b   : > { %v6729_v22 = vrot.slane %v6708_v54, %v9061_v36  ;;  %v6730_v27 = vcombine.low %v6715_v24, %v6722_v26 }
 0xe4d   : > { %v6737_v28 = vrot.slane %v6730_v27, %v9061_v36  ;;  %v6744_v30 = vrot.slane %v6729_v22, %v9061_v36  ;;  %v7030_v22 = vld [vmem:[%s8933_s29] sm:$0xff]  ;;  %v7031_v27 = vld [vmem:[%s8933_s29 + $0x8] sm:$0xff] }
 0xe4f   : > { %v6745_v31 = vcombine.low %v6737_v28, %v6744_v30  ;;  %v8569_v28 = vpack.c.bf16 %v7031_v27, %v7030_v22 }
 0xe51   : > { %8464 = vmatmul.mubr.msk.f32.vlgmr.msra.gmra.mrb[26].mxu0 %vm2473_vm7, %v6745_v31  ;;  %8571 = vmatpush3.bf16.xpose.msk.msra.mxu1 %vm9706_vm13, %v8569_v28  ;;  %v7032_v31 = vld [vmem:[%s8933_s29 + $0x10] sm:$0xff] }
 0xe52   : > { %8493 = vmatprep.mubr.msk.f32.mxu0 %vm8734_vm6, %v8732_v29  ;;  %v6918_v29 = vcombine.high %v6910_v35, %v6910_v35  ;;  %8572 = vmatprep.subr.bf16.mxu1 %v8735_v15  ;;  %v8573_v33 = vpack.c.bf16 %v7033_v32, %v7032_v31 }
 0xe59   : > { %8575 = vmatpush3.bf16.xpose.msk.msra.mxu1 %vm9706_vm13, %v8573_v33 }
 0xe5a   : > { %8576 = vmatprep.subr.bf16.mxu1 %v8735_v15 }
 0xf24   : > { %v6826_v11 = vpop.f32.mrb[26].mxu0 }
 0xf25   : > { %v6831_v37 = vcombine.high %v6826_v11, %v6826_v11  ;;  %v6838_v38 = vrot.slane %v6826_v11, %v9061_v36  ;;  %v8465_v39 = vpop.f32.mrb[27].mxu0  ;;  %v7034_v11 = vld [vmem:[%s8933_s29 + $0x20] sm:$0xff] }
 0xf27   : > { %v6845_v53 = vrot.slane %v6831_v37, %v9061_v36  ;;  %v6846_v40 = vcombine.high %v6838_v38, %v6838_v38  ;;  %v6854_v41 = vrot.slane %v6838_v38, %v9061_v36  ;;  %v7036_v37 = vld [vmem:[%s8933_s29 + $0x30] sm:$0xff]  ;;  %v7037_v38 = vld [vmem:[%s8933_s29 + $0x38] sm:$0xff]  ;;  %s9898_s29 = scalar_lea.vmem %s8864_s5, %s8899_s0 }
 0xf28   : > { %v8581_v39 = vpack.c.bf16 %v7037_v38, %v7036_v37 }
 0xf29   : > { %v6847_v44 = vcombine.high %v6845_v53, %v6845_v53  ;;  %v6861_v46 = vrot.slane %v6845_v53, %v9061_v36  ;;  %v6868_v47 = vrot.slane %v6846_v40, %v9061_v36  ;;  %v6876_v25 = vcombine.high %v6854_v41, %v6854_v41 }
 0xf2a   : > { %v6884_v49 = vadd.f32 %v6854_v41, %v9629_v43 }
 0xf2b   : > { %v6875_v0 = vrot.slane %v6847_v44, %v9061_v36  ;;  %v6877_v52 = vcombine.high %v6868_v47, %v6868_v47  ;;  %v6885_v56 = vadd.f32 %v6868_v47, %v9633_v3  ;;  %v6886_v58 = vadd.f32 %v6876_v25, %v9635_v48  ;;  %v8084_v47 = vld [vmem:[%s9896_s23] ss:$0 sm:$0xff] }
 0xf2c   : > { %v6888_v59 = vadd.f32 %v6861_v46, %v9637_v8  ;;  %v6922_v60 = vadd.f32 %v6910_v35, %v6884_v49 }
 0xf2d   : > { %v6887_v61 = vadd.f32 %v6877_v52, %v9640_v50  ;;  %v6889_v62 = vadd.f32 %v6875_v0, %v9642_v51  ;;  %v6923_v63 = vadd.f32 %v6917_v42, %v6885_v56  ;;  %v6924_v1 = vadd.f32 %v6918_v29, %v6886_v58  ;;  %v8085_v0 = vld [vmem:[%s9897_s26] ss:$0 sm:$0xff] }
 0xf2e   : > { %v6926_v5 = vadd.f32 %v6917_v42, %v6888_v59 }
 0xf2f   : > { %v6925_v2 = vadd.f32 %v6910_v35, %v6887_v61  ;;  %v6934_v43 = vcombine.low %v6922_v60, %v6923_v63  ;;  %v6927_v7 = vadd.f32 %v6918_v29, %v6889_v62  ;;  %v6948_v3 = vrot.slane %v6924_v1, %v9061_v36 }
 0xf30   : > { %v8577_v35 = vpack.c.bf16 %v7035_v34, %v7034_v11 }
 0xf31   : > { %v6941_v4 = vrot.slane %v6934_v43, %v9061_v36  ;;  %v6957_v48 = vcombine.low %v6925_v2, %v6926_v5  ;;  %v6971_v50 = vrot.slane %v6927_v7, %v9061_v36 }
 0xf32   : > { %8579 = vmatpush3.bf16.xpose.msk.msra.mxu1 %vm9706_vm13, %v8577_v35 }
 0xf33   : > { %v6949_v45 = vcombine.low %v6941_v4, %v6948_v3  ;;  %v6964_v8 = vrot.slane %v6957_v48, %v9061_v36  ;;  %8580 = vmatprep.subr.bf16.mxu1 %v8735_v15 }
 0xf35   : > { %v6956_v51 = vrot.slane %v6949_v45, %v9061_v36  ;;  %v6972_v10 = vcombine.low %v6964_v8, %v6971_v50 }
 0xf37   : > { %v6982_v6 = vadd.f32 %v8686_v57, %v6956_v51  ;;  %v6979_v55 = vrot.slane %v6972_v10, %v9061_v36 }
 0xf39   : > { %v6987_v12 = vsel %vm6986_vm12, %v6982_v6, 0.0  ;;  %v6983_v14 = vadd.f32 %v8687_v13, %v6979_v55  ;;  %v7352_v13 = vld [vmem:[%s8938_s18] sm:$0xff] }
 0xf3a   : > { %6988 = vadd.xlane.f32.xlu0 %v6987_v12  ;;  %8583 = vmatpush3.bf16.xpose.msk.msra.mxu1 %vm9706_vm13, %v8581_v39 }
 0xf3b   : > { %v6990_v16 = vsel %vm6986_vm12, %v6983_v14, 0.0 }
 0xf3c   : > { %6991 = vadd.xlane.f32.xlu1 %v6990_v16 }
 0xfc7   : > { %v6989_v18 = vpop.xlane.xlu0 %6988 }
 0xfc8   : > { %v6994_v19 = vmul.f32 0.03125, %v6989_v18  ;;  %v7354_v18 = vld [vmem:[%s8938_s18 + $0x10] sm:$0xff] }
 0xfc9   : > { %v6992_v9 = vpop.xlane.xlu1 %6991 }
 0xfca   : > { %v6996_v17 = vsub.f32 %v6982_v6, %v6994_v19  ;;  %v6995_v20 = vmul.f32 0.03125, %v6992_v9  ;;  %v7355_v19 = vld [vmem:[%s8938_s18 + $0x18] sm:$0xff] }
 0xfcb   : > { %v8589_v9 = vpack.c.bf16 %v7355_v19, %v7354_v18 }
 0xfcc   : > { %v6997_v21 = vsub.f32 %v6983_v14, %v6995_v20  ;;  %v6998_v23 = vmul.f32 %v6996_v17, %v6996_v17  ;;  %v7353_v14 = vld [vmem:[%s8938_s18 + $0x8] sm:$0xff]  ;;  %s9899_s18 = scalar_lea.vmem %s8874_s25, %s8899_s0 }
 0xfcd   : > { %v8585_v16 = vpack.c.bf16 %v7353_v14, %v7352_v13 }
 0xfce   : > { %v7000_v24 = vsel %vm6986_vm12, %v6998_v23, 0.0  ;;  %v6999_v54 = vmul.f32 %v6997_v21, %v6997_v21 }
 0xfcf   : > { %7001 = vadd.xlane.f32.xlu0 %v7000_v24  ;;  %8587 = vmatpush3.bf16.xpose.msk.msra.mxu0 %vm8586_vm15, %v8585_v16 }
 0xfd0   : > { %v7003_v26 = vsel %vm6986_vm12, %v6999_v54, 0.0  ;;  %8588 = vmatprep.subr.bf16.mxu0 %v8735_v15 }
 0xfd1   : > { %7004 = vadd.xlane.f32.xlu1 %v7003_v26 }
 0xfd7   : > { %8591 = vmatpush3.bf16.xpose.msk.msra.mxu0 %vm8586_vm15, %v8589_v9 }
0x105c   : > { %v7002_v53 = vpop.xlane.xlu0 %7001 }
0x105d   : > { %v7006_v40 = vmul.f32 0.03125, %v7002_v53 }
0x105e   : > { %v7005_v41 = vpop.xlane.xlu1 %7004 }
0x105f   : > { %v7008_v42 = vadd.f32 1e-05, %v7006_v40  ;;  %v7007_v29 = vmul.f32 0.03125, %v7005_v41 }
0x1061   : > { %8676 = vrsqrt.f32 %v7008_v42  ;;  %v7009_v44 = vadd.f32 1e-05, %v7007_v29 }
0x1063   : > { %8678 = vrsqrt.f32 %v7009_v44 }
0x106b   : > { %v8677_v46 = vpop.eup %8676 }
0x106c   : > { %v7012_v25 = vmul.f32 %v8677_v46, %v6996_v17  ;;  %v8086_v17 = vld [vmem:[%s9898_s29] ss:$0 sm:$0xff] }
0x106d   : > { %v8679_v49 = vpop.eup %8678  ;;  %v7098_v20 = vrot.slane %v8086_v17, %v9061_v36 }
0x106e   : > { %v7020_v52 = vmul.f32 %v8084_v47, %v7012_v25  ;;  %v7013_v56 = vmul.f32 %v8679_v49, %v6997_v21 }
0x106f   : > { %v7099_v21 = vcombine.high %v7098_v20, %v7098_v20  ;;  %v7106_v23 = vrot.slane %v7098_v20, %v9061_v36 }
0x1070   : > { %v9733_v58 = vadd.f32 %v8085_v0, %v7020_v52  ;;  %v7021_v59 = vmul.f32 %v8084_v47, %v7013_v56 }
0x1071   : > { %v7113_v24 = vrot.slane %v7099_v21, %v9061_v36  ;;  %v7114_v54 = vcombine.high %v7106_v23, %v7106_v23 }
0x1072   : > { %v7052_v60 = vrot.slane %v9733_v58, %v9061_v36  ;;  %v9737_v61 = vadd.f32 %v8085_v0, %v7021_v59 }
0x1073   : > { %v7155_v26 = vcombine.low %v7106_v23, %v7113_v24  ;;  %v7156_v22 = vcombine.low %v7114_v54, %v7106_v23  ;;  %v7157_v27 = vcombine.low %v7113_v24, %v7114_v54 }
0x1074   : > { %v7053_v62 = vcombine.high %v7052_v60, %v7052_v60  ;;  %v7060_v63 = vrot.slane %v7052_v60, %v9061_v36  ;;  %v7075_v1 = vrot.slane %v9737_v61, %v9061_v36 }
0x1075   : > { %v7164_v28 = vrot.slane %v7155_v26, %v9061_v36  ;;  %v7171_v15 = vrot.slane %v7156_v22, %v9061_v36  ;;  %v7178_v30 = vrot.slane %v7157_v27, %v9061_v36 }
0x1076   : > { %v7076_v2 = vcombine.high %v7075_v1, %v7075_v1  ;;  %v7083_v5 = vrot.slane %v7075_v1, %v9061_v36  ;;  %v7067_v43 = vrot.slane %v7053_v62, %v9061_v36  ;;  %v7068_v7 = vcombine.high %v7060_v63, %v7060_v63 }
0x1077   : > { %v7179_v31 = vcombine.low %v7164_v28, %v7171_v15  ;;  %v7193_v33 = vrot.slane %v7178_v30, %v9061_v36 }
0x1078   : > { %v7090_v4 = vrot.slane %v7076_v2, %v9061_v36  ;;  %v7091_v3 = vcombine.high %v7083_v5, %v7083_v5  ;;  %v7115_v48 = vcombine.low %v7060_v63, %v7067_v43  ;;  %v7116_v45 = vcombine.low %v7068_v7, %v7083_v5 }
0x1079   : > { %v7186_v32 = vrot.slane %v7179_v31, %v9061_v36 }
0x107a   : > { %v7117_v8 = vcombine.low %v7090_v4, %v7091_v3  ;;  %v7124_v50 = vrot.slane %v7115_v48, %v9061_v36  ;;  %v7131_v51 = vrot.slane %v7116_v45, %v9061_v36  ;;  %v8096_v45 = vld [vmem:[%s9899_s18] ss:$0 sm:$0xff] }
0x107b   : > { %v7194_v11 = vcombine.low %v7186_v32, %v7193_v33 }
0x107c   : > { %v7138_v10 = vrot.slane %v7117_v8, %v9061_v36  ;;  %v7139_v57 = vcombine.low %v7124_v50, %v7131_v51  ;;  %v7368_v8 = vrot.slane %v8096_v45, %v9061_v36  ;;  %v8103_v45 = vld [vmem:[%s9901_s1] ss:$0 sm:$0xff] }
0x107e   : > { %v7146_v6 = vrot.slane %v7139_v57, %v9061_v36  ;;  %v7153_v55 = vrot.slane %v7138_v10, %v9061_v36  ;;  %v7369_v50 = vcombine.high %v7368_v8, %v7368_v8  ;;  %v7376_v51 = vrot.slane %v7368_v8, %v9061_v36 }
0x1080   : > { %v7154_v12 = vcombine.low %v7146_v6, %v7153_v55  ;;  %v7383_v10 = vrot.slane %v7369_v50, %v9061_v36  ;;  %v7384_v57 = vcombine.high %v7376_v51, %v7376_v51 }
0x1082   : > { %8483 = vmatmul.mubr.msk.f32.vlgmr.msra.gmra.mrb[34].mxu1 %vm1907_vm5, %v7154_v12  ;;  %v7431_v6 = vcombine.low %v7376_v51, %v7383_v10  ;;  %v7432_v55 = vcombine.low %v7384_v57, %v7376_v51  ;;  %v7433_v12 = vcombine.low %v7383_v10, %v7384_v57 }
0x1084   : > { %v7440_v13 = vrot.slane %v7431_v6, %v9061_v36  ;;  %v7447_v14 = vrot.slane %v7432_v55, %v9061_v36  ;;  %v7454_v16 = vrot.slane %v7433_v12, %v9061_v36 }
0x1086   : > { %v7455_v18 = vcombine.low %v7440_v13, %v7447_v14  ;;  %v7469_v9 = vrot.slane %v7454_v16, %v9061_v36 }
0x1088   : > { %v7462_v19 = vrot.slane %v7455_v18, %v9061_v36 }
0x108a   : > { %v7470_v17 = vcombine.low %v7462_v19, %v7469_v9 }
0x1155   : > { %v7288_v34 = vpop.f32.mrb[34].mxu1 }
0x1156   : > { %v7289_v35 = vadd.f32 %v7288_v34, %v7194_v11  ;;  %v8484_v37 = vpop.f32.mrb[35].mxu1 }
0x1158   : > { %v7293_v38 = vcombine.high %v7289_v35, %v7289_v35  ;;  %v7300_v39 = vrot.slane %v7289_v35, %v9061_v36 }
0x115a   : > { %v7307_v53 = vrot.slane %v7293_v38, %v9061_v36  ;;  %v7308_v40 = vcombine.high %v7300_v39, %v7300_v39  ;;  %v7316_v41 = vrot.slane %v7300_v39, %v9061_v36 }
0x115c   : > { %v7309_v42 = vcombine.high %v7307_v53, %v7307_v53  ;;  %v7323_v29 = vrot.slane %v7307_v53, %v9061_v36  ;;  %v7330_v44 = vrot.slane %v7308_v40, %v9061_v36  ;;  %v7338_v46 = vcombine.high %v7316_v41, %v7316_v41 }
0x115d   : > { %v7346_v49 = vmax.f32 %v7316_v41, 0.0 }
0x115e   : > { %v7337_v47 = vrot.slane %v7309_v42, %v9061_v36  ;;  %v7339_v25 = vcombine.high %v7330_v44, %v7330_v44  ;;  %v7347_v0 = vmax.f32 %v7330_v44, 0.0  ;;  %v7348_v52 = vmax.f32 %v7338_v46, 0.0 }
0x115f   : > { %v7350_v59 = vmax.f32 %v7323_v29, 0.0 }
0x1160   : > { %v7349_v56 = vmax.f32 %v7339_v25, 0.0  ;;  %v7351_v60 = vmax.f32 %v7337_v47, 0.0  ;;  %v7391_v62 = vcombine.low %v7346_v49, %v7347_v0 }
0x1162   : > { %v7392_v63 = vcombine.low %v7348_v52, %v7349_v56  ;;  %v7393_v1 = vcombine.low %v7350_v59, %v7351_v60  ;;  %v7400_v2 = vrot.slane %v7391_v62, %v9061_v36 }
0x1164   : > { %v7407_v5 = vrot.slane %v7392_v63, %v9061_v36  ;;  %v7414_v43 = vrot.slane %v7393_v1, %v9061_v36 }
0x1166   : > { %v7415_v7 = vcombine.low %v7400_v2, %v7407_v5  ;;  %v7429_v4 = vrot.slane %v7414_v43, %v9061_v36 }
0x1168   : > { %v7422_v3 = vrot.slane %v7415_v7, %v9061_v36 }
0x116a   : > { %v7430_v48 = vcombine.low %v7422_v3, %v7429_v4  ;;  %v8102_v4 = vld [vmem:[%s9900_s28] ss:$0 sm:$0xff] }
0x116c   : > { %8494 = vmatmul.mubr.msk.f32.vlgmr.msra.gmra.mrb[28].mxu0 %vm7472_vm14, %v7430_v48 }
0x123f   : > { %v7553_v20 = vpop.f32.mrb[28].mxu0 }
0x1240   : > { %v7554_v21 = vadd.f32 %v7553_v20, %v7470_v17  ;;  %v8495_v23 = vpop.f32.mrb[29].mxu0 }
0x1242   : > { %v7558_v24 = vcombine.high %v7554_v21, %v7554_v21  ;;  %v7565_v54 = vrot.slane %v7554_v21, %v9061_v36 }
0x1244   : > { %v7572_v26 = vrot.slane %v7558_v24, %v9061_v36  ;;  %v7573_v22 = vcombine.high %v7565_v54, %v7565_v54  ;;  %v7581_v27 = vrot.slane %v7565_v54, %v9061_v36 }
0x1246   : > { %v7574_v28 = vcombine.high %v7572_v26, %v7572_v26  ;;  %v7595_v15 = vrot.slane %v7573_v22, %v9061_v36  ;;  %v7603_v30 = vcombine.high %v7581_v27, %v7581_v27  ;;  %v7588_v31 = vrot.slane %v7572_v26, %v9061_v36 }
0x1248   : > { %v7602_v32 = vrot.slane %v7574_v28, %v9061_v36  ;;  %v7604_v33 = vcombine.high %v7595_v15, %v7595_v15  ;;  %v7605_v11 = vcombine.low %v7581_v27, %v7595_v15  ;;  %v7619_v37 = vrot.slane %v7603_v30, %v9061_v36 }
0x124a   : > { %v7628_v34 = vcombine.low %v7604_v33, %v7588_v31  ;;  %v7612_v35 = vrot.slane %v7605_v11, %v9061_v36  ;;  %v7642_v53 = vrot.slane %v7602_v32, %v9061_v36 }
0x124c   : > { %v7620_v38 = vcombine.low %v7612_v35, %v7619_v37  ;;  %v7635_v39 = vrot.slane %v7628_v34, %v9061_v36 }
0x124e   : > { %v7627_v40 = vrot.slane %v7620_v38, %v9061_v36  ;;  %v7643_v41 = vcombine.low %v7635_v39, %v7642_v53 }
0x1250   : > { %v7653_v42 = vadd.f32 %v7627_v40, %v9733_v58  ;;  %v7650_v29 = vrot.slane %v7643_v41, %v9061_v36 }
0x1252   : > { %v7657_v44 = vsel %vm6986_vm12, %v7653_v42, 0.0  ;;  %v7654_v46 = vadd.f32 %v7650_v29, %v9737_v61 }
0x1253   : > { %7658 = vadd.xlane.f32.xlu0 %v7657_v44 }
0x1254   : > { %v7660_v47 = vsel %vm6986_vm12, %v7654_v46, 0.0 }
0x1255   : > { %7661 = vadd.xlane.f32.xlu1 %v7660_v47 }
0x12e0   : > { %v7659_v25 = vpop.xlane.xlu0 %7658 }
0x12e1   : > { %v7663_v49 = vmul.f32 0.03125, %v7659_v25 }
0x12e2   : > { %v7662_v0 = vpop.xlane.xlu1 %7661 }
0x12e3   : > { %v7665_v52 = vsub.f32 %v7653_v42, %v7663_v49  ;;  %v7664_v56 = vmul.f32 0.03125, %v7662_v0 }
0x12e5   : > { %v7666_v59 = vsub.f32 %v7654_v46, %v7664_v56  ;;  %v7667_v60 = vmul.f32 %v7665_v52, %v7665_v52 }
0x12e7   : > { %v7669_v58 = vsel %vm6986_vm12, %v7667_v60, 0.0  ;;  %v7668_v36 = vmul.f32 %v7666_v59, %v7666_v59 }
0x12e8   : > { %7670 = vadd.xlane.f32.xlu0 %v7669_v58 }
0x12e9   : > { %v7672_v61 = vsel %vm6986_vm12, %v7668_v36, 0.0 }
0x12ea   : > { %7673 = vadd.xlane.f32.xlu1 %v7672_v61 }
0x1375   : > { %v7671_v62 = vpop.xlane.xlu0 %7670 }
0x1376   : > { %v7675_v63 = vmul.f32 0.03125, %v7671_v62 }
0x1377   : > { %v7674_v1 = vpop.xlane.xlu1 %7673 }
0x1378   : > { %v7677_v2 = vadd.f32 1e-05, %v7675_v63  ;;  %v7676_v5 = vmul.f32 0.03125, %v7674_v1 }
0x137a   : > { %8680 = vrsqrt.f32 %v7677_v2  ;;  %v7678_v43 = vadd.f32 1e-05, %v7676_v5 }
0x137c   : > { %8682 = vrsqrt.f32 %v7678_v43 }
0x1384   : > { %v8681_v7 = vpop.eup %8680 }
0x1385   : > { %v7681_v3 = vmul.f32 %v8681_v7, %v7665_v52 }
0x1386   : > { %v8683_v48 = vpop.eup %8682 }
0x1387   : > { %v7689_v8 = vmul.f32 %v8102_v4, %v7681_v3  ;;  %v7682_v50 = vmul.f32 %v8683_v48, %v7666_v59 }
0x1389   : > { %v7697_v51 = vadd.f32 %v8103_v45, %v7689_v8  ;;  %v7690_v10 = vmul.f32 %v8102_v4, %v7682_v50 }
0x138b   : > { %7699 = vst.msk [vmem:[%s9888_s3] sm:$0x7] %vm6986_vm12, %v7697_v51  ;;  %v7698_v57 = vadd.f32 %v8103_v45, %v7690_v10 }
0x138d   : > { %7700 = vst.msk [vmem:[%s9888_s3 + $0x4] sm:$0x7] %vm6986_vm12, %v7698_v57 }
0x138e PF: > { %s9902_s16 = sld [smem:[#allocation21_spill]] }
0x1394   : > { %s69_s7 = sadd.s32 1, %s9902_s16  }
0x1395   : > { %p66_p5 = scmp.ge.s32.totalorder %s69_s7, 4  }
0x1397   :  { %68 = sbr.rel (!%p66_p5) target bundleno = 55 (0x37), region = 261 }

</bundles_post_ra>
